<compile_context>
chip_gen: v7x
topology: tpu7x:2x2x1
jax: 0.10.0
libtpu: 0.0.40
codegen_flags: <defaults>
</compile_context>

<pallas_src>
import functools

import jax
import jax.numpy as jnp
import numpy as np
from jax.experimental import pallas as pl
from jax.experimental.pallas import tpu as pltpu


def _round_up(x, m):
    return (x + m - 1) // m * m


def _next_pow2(x):
    return 1 << (int(x) - 1).bit_length()


# ------------------------------ Pallas kernel ------------------------------ #

def _cnn_fused_kernel(x_ref, b1band_ref, b1bias_ref, sw1_ref, sh1e_ref,
                      sh1o_ref, b2band_ref, b2bias_ref, sw2_ref, sh2e_ref,
                      sh2o_ref, fc1w_ref, fc1b_ref, fc2w_ref, fc2b_ref, o_ref,
                      *, kh, h1, h2, h2p, batch_block):
    f32 = jnp.float32
    bf16 = jnp.bfloat16

    for b in range(batch_block):       # unrolled, independent per-image chains
        x = x_ref[b].astype(bf16)                               # (56, 56)

        # ---- conv1 + bias + ReLU: kh row-shifted banded MXU matmuls ----
        r1 = jnp.dot(x[0:h1, :], b1band_ref[0], preferred_element_type=f32)
        for i in range(1, kh):
            r1 = r1 + jnp.dot(x[i:i + h1, :], b1band_ref[i],
                              preferred_element_type=f32)
        r1 = jnp.maximum(r1 + b1bias_ref[...], 0.0)             # (52, 512) f32

        # ---- pool1: lane pairwise-max (XLU roll + VPU max) + even selector,
        #      then rows via two tiny exact 0/1 row-selector matmuls ----
        m1 = jnp.maximum(r1, pltpu.roll(r1, r1.shape[-1] - 1, axis=1))
        m1 = jnp.dot(m1.astype(bf16), sw1_ref[...], preferred_element_type=f32)
        m1b = m1.astype(bf16)                                   # (52, 256)
        p1 = jnp.maximum(
            jnp.dot(sh1e_ref[...], m1b, preferred_element_type=f32),
            jnp.dot(sh1o_ref[...], m1b, preferred_element_type=f32))  # (26,256)

        # ---- conv2 + bias + ReLU ----
        p1b = p1.astype(bf16)
        r2 = jnp.dot(p1b[0:h2, :], b2band_ref[0], preferred_element_type=f32)
        for i in range(1, kh):
            r2 = r2 + jnp.dot(p1b[i:i + h2, :], b2band_ref[i],
                              preferred_element_type=f32)
        r2 = jnp.maximum(r2 + b2bias_ref[...], 0.0)             # (22, 512)

        # ---- pool2 ----
        m2 = jnp.maximum(r2, pltpu.roll(r2, r2.shape[-1] - 1, axis=1))
        m2 = jnp.dot(m2.astype(bf16), sw2_ref[...], preferred_element_type=f32)
        m2b = m2.astype(bf16)                                   # (22, 256)
        p2 = jnp.maximum(
            jnp.dot(sh2e_ref[...], m2b, preferred_element_type=f32),
            jnp.dot(sh2o_ref[...], m2b, preferred_element_type=f32))  # (11,256)

        # ---- fc1 + ReLU (NCHW flatten folded into fc1w layout) ----
        p2b = p2.astype(bf16)
        x4 = fc1b_ref[...]                                      # (1, 128) f32
        for h in range(h2p):
            x4 = x4 + jnp.dot(p2b[h:h + 1, :], fc1w_ref[h],
                              preferred_element_type=f32)
        x4 = jnp.maximum(x4, 0.0)
        # TODO(synk): nn.Dropout(p=0.5) is identity in eval mode; no RNG mask.

        # ---- fc2 (128-lane dense store; wrapper slices to text_num) ----
        out = (jnp.dot(x4.astype(bf16), fc2w_ref[...],
                       preferred_element_type=f32) + fc2b_ref[...])
        o_ref[b] = out


# ------------------------- one-time weight re-layout ----------------------- #

def _band_matrix(w_ocij, w_in, in_blk, out_blk, dtype):
    """(O,C,KH,KW) conv weights -> (KH, C*in_blk, O*out_blk) banded matrices so
    that sum_i x[i:i+h_out, :] @ band[i] equals the valid cross-correlation.
    Input lane layout: c*in_blk + w (w < w_in); output: o*out_blk + wo."""
    o, c, kh, kw = w_ocij.shape
    w_out = w_in - kw + 1
    w_np = np.asarray(w_ocij, np.float32)
    band = np.zeros((kh, c * in_blk, o * out_blk), np.float32)
    for i in range(kh):
        for j in range(kw):
            for ci in range(c):
                rows = ci * in_blk + j + np.arange(w_out)
                for oi in range(o):
                    cols = oi * out_blk + np.arange(w_out)
                    band[i, rows, cols] = w_np[oi, ci, i, j]
    return jnp.asarray(band, dtype)


def _lane_pool_selector(w_in, in_blk, out_blk, blocks, dtype):
    """0/1 matrix (blocks*in_blk, blocks*out_blk); column c*out_blk+wo picks
    row c*in_blk+2*wo.  Used as `max(x, roll(x,-1)) @ S` -> exact 1x2 pool."""
    w_out = w_in // 2
    s = np.zeros((blocks * in_blk, blocks * out_blk), np.float32)
    for c in range(blocks):
        rows = c * in_blk + 2 * np.arange(w_out)
        cols = c * out_blk + np.arange(w_out)
        s[rows, cols] = 1.0
    return jnp.asarray(s, dtype)


def _row_pool_selectors(h_in, dtype):
    """0/1 matrices (h_in//2, h_in) picking even/odd rows (used as `S @ x`)."""
    h_out = h_in // 2
    e = np.zeros((h_out, h_in), np.float32)
    o = np.zeros((h_out, h_in), np.float32)
    e[np.arange(h_out), 2 * np.arange(h_out)] = 1.0
    o[np.arange(h_out), 2 * np.arange(h_out) + 1] = 1.0
    return jnp.asarray(e, dtype), jnp.asarray(o, dtype)


def _block_bias(bias, w_valid, blk):
    b_np = np.asarray(bias, np.float32)
    out = np.zeros((1, b_np.shape[0] * blk), np.float32)
    for c in range(b_np.shape[0]):
        out[0, c * blk:c * blk + w_valid] = b_np[c]
    return jnp.asarray(out)


def prepare_params(params, text_num, img_hw=56):
    bf16 = jnp.bfloat16
    c1, _, kh, kw = params["conv1_w"].shape       # (8, 1, 5, 5)
    c2 = params["conv2_w"].shape[0]               # 16
    w1 = img_hw - kw + 1                          # 52
    w1p = w1 // 2                                 # 26
    w2 = w1p - kw + 1                             # 22
    w2p = w2 // 2                                 # 11
    d_hidden = params["fc1_w"].shape[0]           # 128
    n_lanes = _round_up(text_num, 128)

    blk1, blk1p = _next_pow2(w1), _next_pow2(w1p)   # 64, 32
    blk2, blk2p = _next_pow2(w2), _next_pow2(w2p)   # 32, 16
    for lanes in (c1 * blk1, c1 * blk1p, c2 * blk2, c2 * blk2p):
        assert lanes % 128 == 0, lanes            # lane-dense everywhere

    # fc1: fold NCHW flatten (feature = c*w2p*w2p + h*w2p + w) + lane padding.
    W1 = np.asarray(params["fc1_w"], np.float32).reshape(d_hidden, c2, w2p, w2p)
    fc1w = np.zeros((w2p, c2, blk2p, d_hidden), np.float32)
    fc1w[:, :, :w2p, :] = np.transpose(W1, (2, 1, 3, 0))        # [h, c, w, m]
    fc1w = fc1w.reshape(w2p, c2 * blk2p, d_hidden)              # (11, 256, 128)

    fc2w = np.zeros((d_hidden, n_lanes), np.float32)
    fc2w[:, :text_num] = np.asarray(params["fc2_w"], np.float32).T
    fc2b = np.zeros((1, n_lanes), np.float32)
    fc2b[0, :text_num] = np.asarray(params["fc2_b"], np.float32)

    sh1e, sh1o = _row_pool_selectors(w1, bf16)    # (26, 52)
    sh2e, sh2o = _row_pool_selectors(w2, bf16)    # (11, 22)

    return {
        "b1band": _band_matrix(params["conv1_w"], img_hw, img_hw, blk1, bf16),
        "b1bias": _block_bias(params["conv1_b"], w1, blk1),      # (1, 512) f32
        "sw1": _lane_pool_selector(w1, blk1, blk1p, c1, bf16),   # (512, 256)
        "sh1e": sh1e, "sh1o": sh1o,
        "b2band": _band_matrix(params["conv2_w"], w1p, blk1p, blk2, bf16),
        "b2bias": _block_bias(params["conv2_b"], w2, blk2),      # (1, 512) f32
        "sw2": _lane_pool_selector(w2, blk2, blk2p, c2, bf16),   # (512, 256)
        "sh2e": sh2e, "sh2o": sh2o,
        "fc1w": jnp.asarray(fc1w, bf16),
        "fc1b": jnp.asarray(params["fc1_b"], jnp.float32).reshape(1, d_hidden),
        "fc2w": jnp.asarray(fc2w, bf16),
        "fc2b": jnp.asarray(fc2b),
    }


# --------------------------------- forward --------------------------------- #

def cnn_forward(prep, x_nchw, *, text_num, batch_block=None):
    n, cin, h, w = x_nchw.shape
    assert cin == 1 and h == w
    kh = prep["b1band"].shape[0]
    h1 = h - kh + 1           # conv1 out height (52)
    h1p = h1 // 2             # pool1 out height (26)
    h2 = h1p - kh + 1         # conv2 out height (22)
    h2p = h2 // 2             # pool2 out height (11)
    n_lanes = prep["fc2w"].shape[1]

    if batch_block is None:   # keep >=2 grid steps at tiny N so v7x uses both TCs
        batch_block = 4 if (n % 4 == 0 and n >= 8) else \
                      (2 if (n % 2 == 0 and n >= 4) else 1)
    nb = _round_up(n, batch_block)
    x3d = x_nchw.reshape(n, h, w)
    if nb != n:
        x3d = jnp.pad(x3d, ((0, nb - n), (0, 0), (0, 0)))

    const_names = ("b1band", "b1bias", "sw1", "sh1e", "sh1o",
                   "b2band", "b2bias", "sw2", "sh2e", "sh2o",
                   "fc1w", "fc1b", "fc2w", "fc2b")
    const_args = tuple(prep[k] for k in const_names)
    # constant block index across the grid -> Pallas DMAs them once
    const_specs = [pl.BlockSpec(a.shape, lambda g, nd=a.ndim: (0,) * nd)
                   for a in const_args]

    out = pl.pallas_call(
        functools.partial(_cnn_fused_kernel, kh=kh, h1=h1, h2=h2, h2p=h2p,
                          batch_block=batch_block),
        out_shape=jax.ShapeDtypeStruct((nb, 1, n_lanes), jnp.float32),
        grid_spec=pltpu.PrefetchScalarGridSpec(
            num_scalar_prefetch=0,
            grid=(nb // batch_block,),
            in_specs=[pl.BlockSpec((batch_block, h, w), lambda g: (g, 0, 0))]
                     + const_specs,
            out_specs=pl.BlockSpec((batch_block, 1, n_lanes),
                                   lambda g: (g, 0, 0)),
        ),
        compiler_params=pltpu.CompilerParams(
            dimension_semantics=("parallel",),
            vmem_limit_bytes=24 * 1024 * 1024),
    )(x3d, *const_args)
    return out.reshape(nb, n_lanes)[:n, :text_num]


# ----------------------------- params / reference -------------------------- #

def init_params(key, text_num):
    ks = jax.random.split(key, 8)
    s = 0.05
    return {
        "conv1_w": jax.random.normal(ks[0], (8, 1, 5, 5), jnp.float32) * s,
        "conv1_b": jax.random.normal(ks[1], (8,), jnp.float32) * s,
        "conv2_w": jax.random.normal(ks[2], (16, 8, 5, 5), jnp.float32) * s,
        "conv2_b": jax.random.normal(ks[3], (16,), jnp.float32) * s,
        "fc1_w": jax.random.normal(ks[4], (128, 16 * 11 * 11), jnp.float32) * s,
        "fc1_b": jax.random.normal(ks[5], (128,), jnp.float32) * s,
        "fc2_w": jax.random.normal(ks[6], (text_num, 128), jnp.float32) * s,
        "fc2_b": jax.random.normal(ks[7], (text_num,), jnp.float32) * s,
    }


def cnn_reference(params, x_nchw):
    y = jax.lax.conv_general_dilated(
        x_nchw, params["conv1_w"], (1, 1), "VALID",
        dimension_numbers=("NCHW", "OIHW", "NCHW"))
    y = jnp.maximum(y + params["conv1_b"][None, :, None, None], 0.0)
    n, c, h, w = y.shape
    y = y.reshape(n, c, h // 2, 2, w // 2, 2).max(axis=(3, 5))
    y = jax.lax.conv_general_dilated(
        y, params["conv2_w"], (1, 1), "VALID",
        dimension_numbers=("NCHW", "OIHW", "NCHW"))
    y = jnp.maximum(y + params["conv2_b"][None, :, None, None], 0.0)
    n, c, h, w = y.shape
    y = y.reshape(n, c, h // 2, 2, w // 2, 2).max(axis=(3, 5))
    y = y.reshape(n, -1)
    y = jnp.maximum(y @ params["fc1_w"].T + params["fc1_b"], 0.0)
    return y @ params["fc2_w"].T + params["fc2_b"]


if __name__ == "__main__":
    text_num = 10
    key = jax.random.PRNGKey(0)
    kp, kx = jax.random.split(key)
    params = init_params(kp, text_num)
    # forward implies 56x56 single-channel input:
    # 56 -conv5-> 52 -pool-> 26 -conv5-> 22 -pool-> 11, fc1 expects 16*11*11.
    x = jax.random.normal(kx, (2, 1, 56, 56), jnp.float32)

    prep = prepare_params(params, text_num, img_hw=x.shape[-1])  # done once
    fwd = jax.jit(functools.partial(cnn_forward, text_num=text_num))
    out = jax.block_until_ready(fwd(prep, x))
    assert out.shape == (2, text_num)

    ref = jax.block_until_ready(cnn_reference(params, x))
    assert jnp.allclose(out, ref, rtol=2.5e-2, atol=2.5e-2), (
        "Pallas output mismatch vs reference: max abs diff "
        f"{float(jnp.max(jnp.abs(out - ref)))}")
    print("KERNEL_OK")
</pallas_src>

<mosaic_0001>
module attributes {stable_mosaic.version = 11 : i64} {
  func.func @_cnn_fused_kernel(%arg0: i32, %arg1: memref<1x56x56xf32, #tpu.memory_space<vmem>>, %arg2: memref<5x56x512xbf16, #tpu.memory_space<vmem>>, %arg3: memref<1x512xf32, #tpu.memory_space<vmem>>, %arg4: memref<512x256xbf16, #tpu.memory_space<vmem>>, %arg5: memref<26x52xbf16, #tpu.memory_space<vmem>>, %arg6: memref<26x52xbf16, #tpu.memory_space<vmem>>, %arg7: memref<5x256x512xbf16, #tpu.memory_space<vmem>>, %arg8: memref<1x512xf32, #tpu.memory_space<vmem>>, %arg9: memref<512x256xbf16, #tpu.memory_space<vmem>>, %arg10: memref<11x22xbf16, #tpu.memory_space<vmem>>, %arg11: memref<11x22xbf16, #tpu.memory_space<vmem>>, %arg12: memref<11x256x128xbf16, #tpu.memory_space<vmem>>, %arg13: memref<1x128xf32, #tpu.memory_space<vmem>>, %arg14: memref<128x128xbf16, #tpu.memory_space<vmem>>, %arg15: memref<1x128xf32, #tpu.memory_space<vmem>>, %arg16: memref<1x1x128xf32, #tpu.memory_space<vmem>>) attributes {dimension_semantics = [#tpu.dimension_semantics<parallel>], iteration_bounds = array<i64: 2>, scalar_prefetch = 0 : i64, scratch_operands = 0 : i64, tpu.core_type = #tpu.core_type<tc>, window_params = [{transform_indices = @transform_0, window_bounds = array<i64: 1, 56, 56>}, {pipeline_mode = #tpu.pipeline_mode<synchronous>, transform_indices = @transform_1, window_bounds = array<i64: 5, 56, 512>}, {pipeline_mode = #tpu.pipeline_mode<synchronous>, transform_indices = @transform_2, window_bounds = array<i64: 1, 512>}, {pipeline_mode = #tpu.pipeline_mode<synchronous>, transform_indices = @transform_3, window_bounds = array<i64: 512, 256>}, {pipeline_mode = #tpu.pipeline_mode<synchronous>, transform_indices = @transform_4, window_bounds = array<i64: 26, 52>}, {pipeline_mode = #tpu.pipeline_mode<synchronous>, transform_indices = @transform_5, window_bounds = array<i64: 26, 52>}, {pipeline_mode = #tpu.pipeline_mode<synchronous>, transform_indices = @transform_6, window_bounds = array<i64: 5, 256, 512>}, {pipeline_mode = #tpu.pipeline_mode<synchronous>, transform_indices = @transform_7, window_bounds = array<i64: 1, 512>}, {pipeline_mode = #tpu.pipeline_mode<synchronous>, transform_indices = @transform_8, window_bounds = array<i64: 512, 256>}, {pipeline_mode = #tpu.pipeline_mode<synchronous>, transform_indices = @transform_9, window_bounds = array<i64: 11, 22>}, {pipeline_mode = #tpu.pipeline_mode<synchronous>, transform_indices = @transform_10, window_bounds = array<i64: 11, 22>}, {pipeline_mode = #tpu.pipeline_mode<synchronous>, transform_indices = @transform_11, window_bounds = array<i64: 11, 256, 128>}, {pipeline_mode = #tpu.pipeline_mode<synchronous>, transform_indices = @transform_12, window_bounds = array<i64: 1, 128>}, {pipeline_mode = #tpu.pipeline_mode<synchronous>, transform_indices = @transform_13, window_bounds = array<i64: 128, 128>}, {pipeline_mode = #tpu.pipeline_mode<synchronous>, transform_indices = @transform_14, window_bounds = array<i64: 1, 128>}, {transform_indices = @transform_15, window_bounds = array<i64: 1, 1, 128>}]} {
    %c0 = arith.constant 0 : index
    %c0_0 = arith.constant 0 : index
    %c0_1 = arith.constant 0 : index
    %0 = vector.load %arg1[%c0, %c0_0, %c0_1] : memref<1x56x56xf32, #tpu.memory_space<vmem>>, vector<1x56x56xf32>
    %1 = vector.shape_cast %0 : vector<1x56x56xf32> to vector<56x56xf32>
    %2 = arith.truncf %1 : vector<56x56xf32> to vector<56x56xbf16>
    %3 = vector.extract_strided_slice %2 {offsets = [0, 0], sizes = [52, 56], strides = [1, 1]} : vector<56x56xbf16> to vector<52x56xbf16>
    %c0_2 = arith.constant 0 : index
    %c0_3 = arith.constant 0 : index
    %c0_4 = arith.constant 0 : index
    %4 = vector.load %arg2[%c0_2, %c0_3, %c0_4] : memref<5x56x512xbf16, #tpu.memory_space<vmem>>, vector<1x56x512xbf16>
    %5 = vector.shape_cast %4 : vector<1x56x512xbf16> to vector<56x512xbf16>
    %cst = arith.constant dense<0.000000e+00> : vector<52x512xf32>
    %6 = tpu.matmul %3, %5, %cst {dimension_numbers = #tpu.dot_dimension_numbers<[1], [0], [0], [1], [0, 0, 1, 1], [], []>} : vector<52x56xbf16>, vector<56x512xbf16>, vector<52x512xf32> -> vector<52x512xf32>
    %7 = vector.extract_strided_slice %2 {offsets = [1, 0], sizes = [52, 56], strides = [1, 1]} : vector<56x56xbf16> to vector<52x56xbf16>
    %c1 = arith.constant 1 : index
    %c0_5 = arith.constant 0 : index
    %c0_6 = arith.constant 0 : index
    %8 = vector.load %arg2[%c1, %c0_5, %c0_6] : memref<5x56x512xbf16, #tpu.memory_space<vmem>>, vector<1x56x512xbf16>
    %9 = vector.shape_cast %8 : vector<1x56x512xbf16> to vector<56x512xbf16>
    %cst_7 = arith.constant dense<0.000000e+00> : vector<52x512xf32>
    %10 = tpu.matmul %7, %9, %cst_7 {dimension_numbers = #tpu.dot_dimension_numbers<[1], [0], [0], [1], [0, 0, 1, 1], [], []>} : vector<52x56xbf16>, vector<56x512xbf16>, vector<52x512xf32> -> vector<52x512xf32>
    %11 = arith.addf %6, %10 : vector<52x512xf32>
    %12 = vector.extract_strided_slice %2 {offsets = [2, 0], sizes = [52, 56], strides = [1, 1]} : vector<56x56xbf16> to vector<52x56xbf16>
    %c2 = arith.constant 2 : index
    %c0_8 = arith.constant 0 : index
    %c0_9 = arith.constant 0 : index
    %13 = vector.load %arg2[%c2, %c0_8, %c0_9] : memref<5x56x512xbf16, #tpu.memory_space<vmem>>, vector<1x56x512xbf16>
    %14 = vector.shape_cast %13 : vector<1x56x512xbf16> to vector<56x512xbf16>
    %cst_10 = arith.constant dense<0.000000e+00> : vector<52x512xf32>
    %15 = tpu.matmul %12, %14, %cst_10 {dimension_numbers = #tpu.dot_dimension_numbers<[1], [0], [0], [1], [0, 0, 1, 1], [], []>} : vector<52x56xbf16>, vector<56x512xbf16>, vector<52x512xf32> -> vector<52x512xf32>
    %16 = arith.addf %11, %15 : vector<52x512xf32>
    %17 = vector.extract_strided_slice %2 {offsets = [3, 0], sizes = [52, 56], strides = [1, 1]} : vector<56x56xbf16> to vector<52x56xbf16>
    %c3 = arith.constant 3 : index
    %c0_11 = arith.constant 0 : index
    %c0_12 = arith.constant 0 : index
    %18 = vector.load %arg2[%c3, %c0_11, %c0_12] : memref<5x56x512xbf16, #tpu.memory_space<vmem>>, vector<1x56x512xbf16>
    %19 = vector.shape_cast %18 : vector<1x56x512xbf16> to vector<56x512xbf16>
    %cst_13 = arith.constant dense<0.000000e+00> : vector<52x512xf32>
    %20 = tpu.matmul %17, %19, %cst_13 {dimension_numbers = #tpu.dot_dimension_numbers<[1], [0], [0], [1], [0, 0, 1, 1], [], []>} : vector<52x56xbf16>, vector<56x512xbf16>, vector<52x512xf32> -> vector<52x512xf32>
    %21 = arith.addf %16, %20 : vector<52x512xf32>
    %22 = vector.extract_strided_slice %2 {offsets = [4, 0], sizes = [52, 56], strides = [1, 1]} : vector<56x56xbf16> to vector<52x56xbf16>
    %c4 = arith.constant 4 : index
    %c0_14 = arith.constant 0 : index
    %c0_15 = arith.constant 0 : index
    %23 = vector.load %arg2[%c4, %c0_14, %c0_15] : memref<5x56x512xbf16, #tpu.memory_space<vmem>>, vector<1x56x512xbf16>
    %24 = vector.shape_cast %23 : vector<1x56x512xbf16> to vector<56x512xbf16>
    %cst_16 = arith.constant dense<0.000000e+00> : vector<52x512xf32>
    %25 = tpu.matmul %22, %24, %cst_16 {dimension_numbers = #tpu.dot_dimension_numbers<[1], [0], [0], [1], [0, 0, 1, 1], [], []>} : vector<52x56xbf16>, vector<56x512xbf16>, vector<52x512xf32> -> vector<52x512xf32>
    %26 = arith.addf %21, %25 : vector<52x512xf32>
    %c0_17 = arith.constant 0 : index
    %c0_18 = arith.constant 0 : index
    %27 = vector.load %arg3[%c0_17, %c0_18] : memref<1x512xf32, #tpu.memory_space<vmem>>, vector<1x512xf32>
    %28 = vector.broadcast %27 : vector<1x512xf32> to vector<52x512xf32>
    %29 = arith.addf %26, %28 : vector<52x512xf32>
    %cst_19 = arith.constant 0.000000e+00 : f32
    %30 = vector.broadcast %cst_19 : f32 to vector<52x512xf32>
    %31 = arith.maximumf %29, %30 : vector<52x512xf32>
    %c511_i32 = arith.constant 511 : i32
    %32 = tpu.dynamic_rotate %31 by %c511_i32 dim 1 : vector<52x512xf32>, i32 -> vector<52x512xf32>
    %33 = arith.maximumf %31, %32 : vector<52x512xf32>
    %34 = arith.truncf %33 : vector<52x512xf32> to vector<52x512xbf16>
    %c0_20 = arith.constant 0 : index
    %c0_21 = arith.constant 0 : index
    %35 = vector.load %arg4[%c0_20, %c0_21] : memref<512x256xbf16, #tpu.memory_space<vmem>>, vector<512x256xbf16>
    %cst_22 = arith.constant dense<0.000000e+00> : vector<52x256xf32>
    %36 = tpu.matmul %34, %35, %cst_22 {dimension_numbers = #tpu.dot_dimension_numbers<[1], [0], [0], [1], [0, 0, 1, 1], [], []>} : vector<52x512xbf16>, vector<512x256xbf16>, vector<52x256xf32> -> vector<52x256xf32>
    %37 = arith.truncf %36 : vector<52x256xf32> to vector<52x256xbf16>
    %c0_23 = arith.constant 0 : index
    %c0_24 = arith.constant 0 : index
    %38 = vector.load %arg5[%c0_23, %c0_24] : memref<26x52xbf16, #tpu.memory_space<vmem>>, vector<26x52xbf16>
    %cst_25 = arith.constant dense<0.000000e+00> : vector<26x256xf32>
    %39 = tpu.matmul %38, %37, %cst_25 {dimension_numbers = #tpu.dot_dimension_numbers<[1], [0], [0], [1], [0, 0, 1, 1], [], []>} : vector<26x52xbf16>, vector<52x256xbf16>, vector<26x256xf32> -> vector<26x256xf32>
    %c0_26 = arith.constant 0 : index
    %c0_27 = arith.constant 0 : index
    %40 = vector.load %arg6[%c0_26, %c0_27] : memref<26x52xbf16, #tpu.memory_space<vmem>>, vector<26x52xbf16>
    %cst_28 = arith.constant dense<0.000000e+00> : vector<26x256xf32>
    %41 = tpu.matmul %40, %37, %cst_28 {dimension_numbers = #tpu.dot_dimension_numbers<[1], [0], [0], [1], [0, 0, 1, 1], [], []>} : vector<26x52xbf16>, vector<52x256xbf16>, vector<26x256xf32> -> vector<26x256xf32>
    %42 = arith.maximumf %39, %41 : vector<26x256xf32>
    %43 = arith.truncf %42 : vector<26x256xf32> to vector<26x256xbf16>
    %44 = vector.extract_strided_slice %43 {offsets = [0, 0], sizes = [22, 256], strides = [1, 1]} : vector<26x256xbf16> to vector<22x256xbf16>
    %c0_29 = arith.constant 0 : index
    %c0_30 = arith.constant 0 : index
    %c0_31 = arith.constant 0 : index
    %45 = vector.load %arg7[%c0_29, %c0_30, %c0_31] : memref<5x256x512xbf16, #tpu.memory_space<vmem>>, vector<1x256x512xbf16>
    %46 = vector.shape_cast %45 : vector<1x256x512xbf16> to vector<256x512xbf16>
    %cst_32 = arith.constant dense<0.000000e+00> : vector<22x512xf32>
    %47 = tpu.matmul %44, %46, %cst_32 {dimension_numbers = #tpu.dot_dimension_numbers<[1], [0], [0], [1], [0, 0, 1, 1], [], []>} : vector<22x256xbf16>, vector<256x512xbf16>, vector<22x512xf32> -> vector<22x512xf32>
    %48 = vector.extract_strided_slice %43 {offsets = [1, 0], sizes = [22, 256], strides = [1, 1]} : vector<26x256xbf16> to vector<22x256xbf16>
    %c1_33 = arith.constant 1 : index
    %c0_34 = arith.constant 0 : index
    %c0_35 = arith.constant 0 : index
    %49 = vector.load %arg7[%c1_33, %c0_34, %c0_35] : memref<5x256x512xbf16, #tpu.memory_space<vmem>>, vector<1x256x512xbf16>
    %50 = vector.shape_cast %49 : vector<1x256x512xbf16> to vector<256x512xbf16>
    %cst_36 = arith.constant dense<0.000000e+00> : vector<22x512xf32>
    %51 = tpu.matmul %48, %50, %cst_36 {dimension_numbers = #tpu.dot_dimension_numbers<[1], [0], [0], [1], [0, 0, 1, 1], [], []>} : vector<22x256xbf16>, vector<256x512xbf16>, vector<22x512xf32> -> vector<22x512xf32>
    %52 = arith.addf %47, %51 : vector<22x512xf32>
    %53 = vector.extract_strided_slice %43 {offsets = [2, 0], sizes = [22, 256], strides = [1, 1]} : vector<26x256xbf16> to vector<22x256xbf16>
    %c2_37 = arith.constant 2 : index
    %c0_38 = arith.constant 0 : index
    %c0_39 = arith.constant 0 : index
    %54 = vector.load %arg7[%c2_37, %c0_38, %c0_39] : memref<5x256x512xbf16, #tpu.memory_space<vmem>>, vector<1x256x512xbf16>
    %55 = vector.shape_cast %54 : vector<1x256x512xbf16> to vector<256x512xbf16>
    %cst_40 = arith.constant dense<0.000000e+00> : vector<22x512xf32>
    %56 = tpu.matmul %53, %55, %cst_40 {dimension_numbers = #tpu.dot_dimension_numbers<[1], [0], [0], [1], [0, 0, 1, 1], [], []>} : vector<22x256xbf16>, vector<256x512xbf16>, vector<22x512xf32> -> vector<22x512xf32>
    %57 = arith.addf %52, %56 : vector<22x512xf32>
    %58 = vector.extract_strided_slice %43 {offsets = [3, 0], sizes = [22, 256], strides = [1, 1]} : vector<26x256xbf16> to vector<22x256xbf16>
    %c3_41 = arith.constant 3 : index
    %c0_42 = arith.constant 0 : index
    %c0_43 = arith.constant 0 : index
    %59 = vector.load %arg7[%c3_41, %c0_42, %c0_43] : memref<5x256x512xbf16, #tpu.memory_space<vmem>>, vector<1x256x512xbf16>
    %60 = vector.shape_cast %59 : vector<1x256x512xbf16> to vector<256x512xbf16>
    %cst_44 = arith.constant dense<0.000000e+00> : vector<22x512xf32>
    %61 = tpu.matmul %58, %60, %cst_44 {dimension_numbers = #tpu.dot_dimension_numbers<[1], [0], [0], [1], [0, 0, 1, 1], [], []>} : vector<22x256xbf16>, vector<256x512xbf16>, vector<22x512xf32> -> vector<22x512xf32>
    %62 = arith.addf %57, %61 : vector<22x512xf32>
    %63 = vector.extract_strided_slice %43 {offsets = [4, 0], sizes = [22, 256], strides = [1, 1]} : vector<26x256xbf16> to vector<22x256xbf16>
    %c4_45 = arith.constant 4 : index
    %c0_46 = arith.constant 0 : index
    %c0_47 = arith.constant 0 : index
    %64 = vector.load %arg7[%c4_45, %c0_46, %c0_47] : memref<5x256x512xbf16, #tpu.memory_space<vmem>>, vector<1x256x512xbf16>
    %65 = vector.shape_cast %64 : vector<1x256x512xbf16> to vector<256x512xbf16>
    %cst_48 = arith.constant dense<0.000000e+00> : vector<22x512xf32>
    %66 = tpu.matmul %63, %65, %cst_48 {dimension_numbers = #tpu.dot_dimension_numbers<[1], [0], [0], [1], [0, 0, 1, 1], [], []>} : vector<22x256xbf16>, vector<256x512xbf16>, vector<22x512xf32> -> vector<22x512xf32>
    %67 = arith.addf %62, %66 : vector<22x512xf32>
    %c0_49 = arith.constant 0 : index
    %c0_50 = arith.constant 0 : index
    %68 = vector.load %arg8[%c0_49, %c0_50] : memref<1x512xf32, #tpu.memory_space<vmem>>, vector<1x512xf32>
    %69 = vector.broadcast %68 : vector<1x512xf32> to vector<22x512xf32>
    %70 = arith.addf %67, %69 : vector<22x512xf32>
    %cst_51 = arith.constant 0.000000e+00 : f32
    %71 = vector.broadcast %cst_51 : f32 to vector<22x512xf32>
    %72 = arith.maximumf %70, %71 : vector<22x512xf32>
    %c511_i32_52 = arith.constant 511 : i32
    %73 = tpu.dynamic_rotate %72 by %c511_i32_52 dim 1 : vector<22x512xf32>, i32 -> vector<22x512xf32>
    %74 = arith.maximumf %72, %73 : vector<22x512xf32>
    %75 = arith.truncf %74 : vector<22x512xf32> to vector<22x512xbf16>
    %c0_53 = arith.constant 0 : index
    %c0_54 = arith.constant 0 : index
    %76 = vector.load %arg9[%c0_53, %c0_54] : memref<512x256xbf16, #tpu.memory_space<vmem>>, vector<512x256xbf16>
    %cst_55 = arith.constant dense<0.000000e+00> : vector<22x256xf32>
    %77 = tpu.matmul %75, %76, %cst_55 {dimension_numbers = #tpu.dot_dimension_numbers<[1], [0], [0], [1], [0, 0, 1, 1], [], []>} : vector<22x512xbf16>, vector<512x256xbf16>, vector<22x256xf32> -> vector<22x256xf32>
    %78 = arith.truncf %77 : vector<22x256xf32> to vector<22x256xbf16>
    %c0_56 = arith.constant 0 : index
    %c0_57 = arith.constant 0 : index
    %79 = vector.load %arg10[%c0_56, %c0_57] : memref<11x22xbf16, #tpu.memory_space<vmem>>, vector<11x22xbf16>
    %cst_58 = arith.constant dense<0.000000e+00> : vector<11x256xf32>
    %80 = tpu.matmul %79, %78, %cst_58 {dimension_numbers = #tpu.dot_dimension_numbers<[1], [0], [0], [1], [0, 0, 1, 1], [], []>} : vector<11x22xbf16>, vector<22x256xbf16>, vector<11x256xf32> -> vector<11x256xf32>
    %c0_59 = arith.constant 0 : index
    %c0_60 = arith.constant 0 : index
    %81 = vector.load %arg11[%c0_59, %c0_60] : memref<11x22xbf16, #tpu.memory_space<vmem>>, vector<11x22xbf16>
    %cst_61 = arith.constant dense<0.000000e+00> : vector<11x256xf32>
    %82 = tpu.matmul %81, %78, %cst_61 {dimension_numbers = #tpu.dot_dimension_numbers<[1], [0], [0], [1], [0, 0, 1, 1], [], []>} : vector<11x22xbf16>, vector<22x256xbf16>, vector<11x256xf32> -> vector<11x256xf32>
    %83 = arith.maximumf %80, %82 : vector<11x256xf32>
    %84 = arith.truncf %83 : vector<11x256xf32> to vector<11x256xbf16>
    %c0_62 = arith.constant 0 : index
    %c0_63 = arith.constant 0 : index
    %85 = vector.load %arg13[%c0_62, %c0_63] : memref<1x128xf32, #tpu.memory_space<vmem>>, vector<1x128xf32>
    %86 = vector.extract_strided_slice %84 {offsets = [0, 0], sizes = [1, 256], strides = [1, 1]} : vector<11x256xbf16> to vector<1x256xbf16>
    %c0_64 = arith.constant 0 : index
    %c0_65 = arith.constant 0 : index
    %c0_66 = arith.constant 0 : index
    %87 = vector.load %arg12[%c0_64, %c0_65, %c0_66] : memref<11x256x128xbf16, #tpu.memory_space<vmem>>, vector<1x256x128xbf16>
    %88 = vector.shape_cast %87 : vector<1x256x128xbf16> to vector<256x128xbf16>
    %cst_67 = arith.constant dense<0.000000e+00> : vector<1x128xf32>
    %89 = tpu.matmul %86, %88, %cst_67 {dimension_numbers = #tpu.dot_dimension_numbers<[1], [0], [0], [1], [0, 0, 1, 1], [], []>} : vector<1x256xbf16>, vector<256x128xbf16>, vector<1x128xf32> -> vector<1x128xf32>
    %90 = arith.addf %85, %89 : vector<1x128xf32>
    %91 = vector.extract_strided_slice %84 {offsets = [1, 0], sizes = [1, 256], strides = [1, 1]} : vector<11x256xbf16> to vector<1x256xbf16>
    %c1_68 = arith.constant 1 : index
    %c0_69 = arith.constant 0 : index
    %c0_70 = arith.constant 0 : index
    %92 = vector.load %arg12[%c1_68, %c0_69, %c0_70] : memref<11x256x128xbf16, #tpu.memory_space<vmem>>, vector<1x256x128xbf16>
    %93 = vector.shape_cast %92 : vector<1x256x128xbf16> to vector<256x128xbf16>
    %cst_71 = arith.constant dense<0.000000e+00> : vector<1x128xf32>
    %94 = tpu.matmul %91, %93, %cst_71 {dimension_numbers = #tpu.dot_dimension_numbers<[1], [0], [0], [1], [0, 0, 1, 1], [], []>} : vector<1x256xbf16>, vector<256x128xbf16>, vector<1x128xf32> -> vector<1x128xf32>
    %95 = arith.addf %90, %94 : vector<1x128xf32>
    %96 = vector.extract_strided_slice %84 {offsets = [2, 0], sizes = [1, 256], strides = [1, 1]} : vector<11x256xbf16> to vector<1x256xbf16>
    %c2_72 = arith.constant 2 : index
    %c0_73 = arith.constant 0 : index
    %c0_74 = arith.constant 0 : index
    %97 = vector.load %arg12[%c2_72, %c0_73, %c0_74] : memref<11x256x128xbf16, #tpu.memory_space<vmem>>, vector<1x256x128xbf16>
    %98 = vector.shape_cast %97 : vector<1x256x128xbf16> to vector<256x128xbf16>
    %cst_75 = arith.constant dense<0.000000e+00> : vector<1x128xf32>
    %99 = tpu.matmul %96, %98, %cst_75 {dimension_numbers = #tpu.dot_dimension_numbers<[1], [0], [0], [1], [0, 0, 1, 1], [], []>} : vector<1x256xbf16>, vector<256x128xbf16>, vector<1x128xf32> -> vector<1x128xf32>
    %100 = arith.addf %95, %99 : vector<1x128xf32>
    %101 = vector.extract_strided_slice %84 {offsets = [3, 0], sizes = [1, 256], strides = [1, 1]} : vector<11x256xbf16> to vector<1x256xbf16>
    %c3_76 = arith.constant 3 : index
    %c0_77 = arith.constant 0 : index
    %c0_78 = arith.constant 0 : index
    %102 = vector.load %arg12[%c3_76, %c0_77, %c0_78] : memref<11x256x128xbf16, #tpu.memory_space<vmem>>, vector<1x256x128xbf16>
    %103 = vector.shape_cast %102 : vector<1x256x128xbf16> to vector<256x128xbf16>
    %cst_79 = arith.constant dense<0.000000e+00> : vector<1x128xf32>
    %104 = tpu.matmul %101, %103, %cst_79 {dimension_numbers = #tpu.dot_dimension_numbers<[1], [0], [0], [1], [0, 0, 1, 1], [], []>} : vector<1x256xbf16>, vector<256x128xbf16>, vector<1x128xf32> -> vector<1x128xf32>
    %105 = arith.addf %100, %104 : vector<1x128xf32>
    %106 = vector.extract_strided_slice %84 {offsets = [4, 0], sizes = [1, 256], strides = [1, 1]} : vector<11x256xbf16> to vector<1x256xbf16>
    %c4_80 = arith.constant 4 : index
    %c0_81 = arith.constant 0 : index
    %c0_82 = arith.constant 0 : index
    %107 = vector.load %arg12[%c4_80, %c0_81, %c0_82] : memref<11x256x128xbf16, #tpu.memory_space<vmem>>, vector<1x256x128xbf16>
    %108 = vector.shape_cast %107 : vector<1x256x128xbf16> to vector<256x128xbf16>
    %cst_83 = arith.constant dense<0.000000e+00> : vector<1x128xf32>
    %109 = tpu.matmul %106, %108, %cst_83 {dimension_numbers = #tpu.dot_dimension_numbers<[1], [0], [0], [1], [0, 0, 1, 1], [], []>} : vector<1x256xbf16>, vector<256x128xbf16>, vector<1x128xf32> -> vector<1x128xf32>
    %110 = arith.addf %105, %109 : vector<1x128xf32>
    %111 = vector.extract_strided_slice %84 {offsets = [5, 0], sizes = [1, 256], strides = [1, 1]} : vector<11x256xbf16> to vector<1x256xbf16>
    %c5 = arith.constant 5 : index
    %c0_84 = arith.constant 0 : index
    %c0_85 = arith.constant 0 : index
    %112 = vector.load %arg12[%c5, %c0_84, %c0_85] : memref<11x256x128xbf16, #tpu.memory_space<vmem>>, vector<1x256x128xbf16>
    %113 = vector.shape_cast %112 : vector<1x256x128xbf16> to vector<256x128xbf16>
    %cst_86 = arith.constant dense<0.000000e+00> : vector<1x128xf32>
    %114 = tpu.matmul %111, %113, %cst_86 {dimension_numbers = #tpu.dot_dimension_numbers<[1], [0], [0], [1], [0, 0, 1, 1], [], []>} : vector<1x256xbf16>, vector<256x128xbf16>, vector<1x128xf32> -> vector<1x128xf32>
    %115 = arith.addf %110, %114 : vector<1x128xf32>
    %116 = vector.extract_strided_slice %84 {offsets = [6, 0], sizes = [1, 256], strides = [1, 1]} : vector<11x256xbf16> to vector<1x256xbf16>
    %c6 = arith.constant 6 : index
    %c0_87 = arith.constant 0 : index
    %c0_88 = arith.constant 0 : index
    %117 = vector.load %arg12[%c6, %c0_87, %c0_88] : memref<11x256x128xbf16, #tpu.memory_space<vmem>>, vector<1x256x128xbf16>
    %118 = vector.shape_cast %117 : vector<1x256x128xbf16> to vector<256x128xbf16>
    %cst_89 = arith.constant dense<0.000000e+00> : vector<1x128xf32>
    %119 = tpu.matmul %116, %118, %cst_89 {dimension_numbers = #tpu.dot_dimension_numbers<[1], [0], [0], [1], [0, 0, 1, 1], [], []>} : vector<1x256xbf16>, vector<256x128xbf16>, vector<1x128xf32> -> vector<1x128xf32>
    %120 = arith.addf %115, %119 : vector<1x128xf32>
    %121 = vector.extract_strided_slice %84 {offsets = [7, 0], sizes = [1, 256], strides = [1, 1]} : vector<11x256xbf16> to vector<1x256xbf16>
    %c7 = arith.constant 7 : index
    %c0_90 = arith.constant 0 : index
    %c0_91 = arith.constant 0 : index
    %122 = vector.load %arg12[%c7, %c0_90, %c0_91] : memref<11x256x128xbf16, #tpu.memory_space<vmem>>, vector<1x256x128xbf16>
    %123 = vector.shape_cast %122 : vector<1x256x128xbf16> to vector<256x128xbf16>
    %cst_92 = arith.constant dense<0.000000e+00> : vector<1x128xf32>
    %124 = tpu.matmul %121, %123, %cst_92 {dimension_numbers = #tpu.dot_dimension_numbers<[1], [0], [0], [1], [0, 0, 1, 1], [], []>} : vector<1x256xbf16>, vector<256x128xbf16>, vector<1x128xf32> -> vector<1x128xf32>
    %125 = arith.addf %120, %124 : vector<1x128xf32>
    %126 = vector.extract_strided_slice %84 {offsets = [8, 0], sizes = [1, 256], strides = [1, 1]} : vector<11x256xbf16> to vector<1x256xbf16>
    %c8 = arith.constant 8 : index
    %c0_93 = arith.constant 0 : index
    %c0_94 = arith.constant 0 : index
    %127 = vector.load %arg12[%c8, %c0_93, %c0_94] : memref<11x256x128xbf16, #tpu.memory_space<vmem>>, vector<1x256x128xbf16>
    %128 = vector.shape_cast %127 : vector<1x256x128xbf16> to vector<256x128xbf16>
    %cst_95 = arith.constant dense<0.000000e+00> : vector<1x128xf32>
    %129 = tpu.matmul %126, %128, %cst_95 {dimension_numbers = #tpu.dot_dimension_numbers<[1], [0], [0], [1], [0, 0, 1, 1], [], []>} : vector<1x256xbf16>, vector<256x128xbf16>, vector<1x128xf32> -> vector<1x128xf32>
    %130 = arith.addf %125, %129 : vector<1x128xf32>
    %131 = vector.extract_strided_slice %84 {offsets = [9, 0], sizes = [1, 256], strides = [1, 1]} : vector<11x256xbf16> to vector<1x256xbf16>
    %c9 = arith.constant 9 : index
    %c0_96 = arith.constant 0 : index
    %c0_97 = arith.constant 0 : index
    %132 = vector.load %arg12[%c9, %c0_96, %c0_97] : memref<11x256x128xbf16, #tpu.memory_space<vmem>>, vector<1x256x128xbf16>
    %133 = vector.shape_cast %132 : vector<1x256x128xbf16> to vector<256x128xbf16>
    %cst_98 = arith.constant dense<0.000000e+00> : vector<1x128xf32>
    %134 = tpu.matmul %131, %133, %cst_98 {dimension_numbers = #tpu.dot_dimension_numbers<[1], [0], [0], [1], [0, 0, 1, 1], [], []>} : vector<1x256xbf16>, vector<256x128xbf16>, vector<1x128xf32> -> vector<1x128xf32>
    %135 = arith.addf %130, %134 : vector<1x128xf32>
    %136 = vector.extract_strided_slice %84 {offsets = [10, 0], sizes = [1, 256], strides = [1, 1]} : vector<11x256xbf16> to vector<1x256xbf16>
    %c10 = arith.constant 10 : index
    %c0_99 = arith.constant 0 : index
    %c0_100 = arith.constant 0 : index
    %137 = vector.load %arg12[%c10, %c0_99, %c0_100] : memref<11x256x128xbf16, #tpu.memory_space<vmem>>, vector<1x256x128xbf16>
    %138 = vector.shape_cast %137 : vector<1x256x128xbf16> to vector<256x128xbf16>
    %cst_101 = arith.constant dense<0.000000e+00> : vector<1x128xf32>
    %139 = tpu.matmul %136, %138, %cst_101 {dimension_numbers = #tpu.dot_dimension_numbers<[1], [0], [0], [1], [0, 0, 1, 1], [], []>} : vector<1x256xbf16>, vector<256x128xbf16>, vector<1x128xf32> -> vector<1x128xf32>
    %140 = arith.addf %135, %139 : vector<1x128xf32>
    %cst_102 = arith.constant 0.000000e+00 : f32
    %141 = vector.broadcast %cst_102 : f32 to vector<1x128xf32>
    %142 = arith.maximumf %140, %141 : vector<1x128xf32>
    %143 = arith.truncf %142 : vector<1x128xf32> to vector<1x128xbf16>
    %c0_103 = arith.constant 0 : index
    %c0_104 = arith.constant 0 : index
    %144 = vector.load %arg14[%c0_103, %c0_104] : memref<128x128xbf16, #tpu.memory_space<vmem>>, vector<128x128xbf16>
    %cst_105 = arith.constant dense<0.000000e+00> : vector<1x128xf32>
    %145 = tpu.matmul %143, %144, %cst_105 {dimension_numbers = #tpu.dot_dimension_numbers<[1], [0], [0], [1], [0, 0, 1, 1], [], []>} : vector<1x128xbf16>, vector<128x128xbf16>, vector<1x128xf32> -> vector<1x128xf32>
    %c0_106 = arith.constant 0 : index
    %c0_107 = arith.constant 0 : index
    %146 = vector.load %arg15[%c0_106, %c0_107] : memref<1x128xf32, #tpu.memory_space<vmem>>, vector<1x128xf32>
    %147 = arith.addf %145, %146 : vector<1x128xf32>
    %c0_108 = arith.constant 0 : index
    %c0_109 = arith.constant 0 : index
    %c0_110 = arith.constant 0 : index
    %148 = vector.load %arg16[%c0_108, %c0_109, %c0_110] : memref<1x1x128xf32, #tpu.memory_space<vmem>>, vector<1x1x128xf32>
    %149 = vector.shape_cast %148 : vector<1x1x128xf32> to vector<1x128xf32>
    %150 = vector.shape_cast %147 : vector<1x128xf32> to vector<1x1x128xf32>
    tpu.vector_store %arg16[%c0_108, %c0_109, %c0_110], %150 {strides = array<i32>} : memref<1x1x128xf32, #tpu.memory_space<vmem>>, vector<1x1x128xf32>,
    return
  }
  func.func @transform_0(%arg0: i32) -> (i32, i32, i32) {
    %c0_i32 = arith.constant 0 : i32
    %c0_i32_0 = arith.constant 0 : i32
    %c0_i32_1 = arith.constant 0 : i32
    return %arg0, %c0_i32, %c0_i32_0 : i32, i32, i32
  }
  func.func @transform_1(%arg0: i32) -> (i32, i32, i32) {
    %c0_i32 = arith.constant 0 : i32
    %c0_i32_0 = arith.constant 0 : i32
    %c0_i32_1 = arith.constant 0 : i32
    %c0_i32_2 = arith.constant 0 : i32
    return %c0_i32, %c0_i32_0, %c0_i32_1 : i32, i32, i32
  }
  func.func @transform_2(%arg0: i32) -> (i32, i32) {
    %c0_i32 = arith.constant 0 : i32
    %c0_i32_0 = arith.constant 0 : i32
    %c0_i32_1 = arith.constant 0 : i32
    return %c0_i32, %c0_i32_0 : i32, i32
  }
  func.func @transform_3(%arg0: i32) -> (i32, i32) {
    %c0_i32 = arith.constant 0 : i32
    %c0_i32_0 = arith.constant 0 : i32
    %c0_i32_1 = arith.constant 0 : i32
    return %c0_i32, %c0_i32_0 : i32, i32
  }
  func.func @transform_4(%arg0: i32) -> (i32, i32) {
    %c0_i32 = arith.constant 0 : i32
    %c0_i32_0 = arith.constant 0 : i32
    %c0_i32_1 = arith.constant 0 : i32
    return %c0_i32, %c0_i32_0 : i32, i32
  }
  func.func @transform_5(%arg0: i32) -> (i32, i32) {
    %c0_i32 = arith.constant 0 : i32
    %c0_i32_0 = arith.constant 0 : i32
    %c0_i32_1 = arith.constant 0 : i32
    return %c0_i32, %c0_i32_0 : i32, i32
  }
  func.func @transform_6(%arg0: i32) -> (i32, i32, i32) {
    %c0_i32 = arith.constant 0 : i32
    %c0_i32_0 = arith.constant 0 : i32
    %c0_i32_1 = arith.constant 0 : i32
    %c0_i32_2 = arith.constant 0 : i32
    return %c0_i32, %c0_i32_0, %c0_i32_1 : i32, i32, i32
  }
  func.func @transform_7(%arg0: i32) -> (i32, i32) {
    %c0_i32 = arith.constant 0 : i32
    %c0_i32_0 = arith.constant 0 : i32
    %c0_i32_1 = arith.constant 0 : i32
    return %c0_i32, %c0_i32_0 : i32, i32
  }
  func.func @transform_8(%arg0: i32) -> (i32, i32) {
    %c0_i32 = arith.constant 0 : i32
    %c0_i32_0 = arith.constant 0 : i32
    %c0_i32_1 = arith.constant 0 : i32
    return %c0_i32, %c0_i32_0 : i32, i32
  }
  func.func @transform_9(%arg0: i32) -> (i32, i32) {
    %c0_i32 = arith.constant 0 : i32
    %c0_i32_0 = arith.constant 0 : i32
    %c0_i32_1 = arith.constant 0 : i32
    return %c0_i32, %c0_i32_0 : i32, i32
  }
  func.func @transform_10(%arg0: i32) -> (i32, i32) {
    %c0_i32 = arith.constant 0 : i32
    %c0_i32_0 = arith.constant 0 : i32
    %c0_i32_1 = arith.constant 0 : i32
    return %c0_i32, %c0_i32_0 : i32, i32
  }
  func.func @transform_11(%arg0: i32) -> (i32, i32, i32) {
    %c0_i32 = arith.constant 0 : i32
    %c0_i32_0 = arith.constant 0 : i32
    %c0_i32_1 = arith.constant 0 : i32
    %c0_i32_2 = arith.constant 0 : i32
    return %c0_i32, %c0_i32_0, %c0_i32_1 : i32, i32, i32
  }
  func.func @transform_12(%arg0: i32) -> (i32, i32) {
    %c0_i32 = arith.constant 0 : i32
    %c0_i32_0 = arith.constant 0 : i32
    %c0_i32_1 = arith.constant 0 : i32
    return %c0_i32, %c0_i32_0 : i32, i32
  }
  func.func @transform_13(%arg0: i32) -> (i32, i32) {
    %c0_i32 = arith.constant 0 : i32
    %c0_i32_0 = arith.constant 0 : i32
    %c0_i32_1 = arith.constant 0 : i32
    return %c0_i32, %c0_i32_0 : i32, i32
  }
  func.func @transform_14(%arg0: i32) -> (i32, i32) {
    %c0_i32 = arith.constant 0 : i32
    %c0_i32_0 = arith.constant 0 : i32
    %c0_i32_1 = arith.constant 0 : i32
    return %c0_i32, %c0_i32_0 : i32, i32
  }
  func.func @transform_15(%arg0: i32) -> (i32, i32, i32) {
    %c0_i32 = arith.constant 0 : i32
    %c0_i32_0 = arith.constant 0 : i32
    %c0_i32_1 = arith.constant 0 : i32
    return %arg0, %c0_i32, %c0_i32_0 : i32, i32, i32
  }
}

</mosaic_0001>

<bundles_post_ra>
// kernel: cnn_forward.1
= control target key start
LH: loop header
LB: loop body
LE: loop exit
PB: predicated region body
PF: predicated region fallthrough
CT: control target
= control target key end

     0   :  { %s13264_s0 = inlined_call_operand.hbm [shape: f32[2,56,56], index: 0, kind: input, shape index: {}]   ;;  %s13265_s1 = inlined_call_operand.hbm [shape: bf16[5,56,512], index: 1, kind: input, shape index: {}]   ;;  %s13266_s2 = inlined_call_operand.hbm [shape: f32[1,512], index: 2, kind: input, shape index: {}]   ;;  %s13267_s3 = inlined_call_operand.hbm [shape: bf16[512,256], index: 3, kind: input, shape index: {}]   ;;  %s13268_s4 = inlined_call_operand.hbm [shape: bf16[26,52], index: 4, kind: input, shape index: {}]   ;;  %s13269_s5 = inlined_call_operand.hbm [shape: bf16[26,52], index: 5, kind: input, shape index: {}]   ;;  %s13270_s6 = inlined_call_operand.hbm [shape: bf16[5,256,512], index: 6, kind: input, shape index: {}]   ;;  %s13271_s7 = inlined_call_operand.hbm [shape: f32[1,512], index: 7, kind: input, shape index: {}]   ;;  %s13272_s8 = inlined_call_operand.hbm [shape: bf16[512,256], index: 8, kind: input, shape index: {}]   ;;  %s13273_s9 = inlined_call_operand.hbm [shape: bf16[11,22], index: 9, kind: input, shape index: {}]   ;;  %s13274_s10 = inlined_call_operand.hbm [shape: bf16[11,22], index: 10, kind: input, shape index: {}]   ;;  %s13275_s11 = inlined_call_operand.hbm [shape: bf16[11,256,128], index: 11, kind: input, shape index: {}]   ;;  %s13276_s12 = inlined_call_operand.hbm [shape: f32[1,128], index: 12, kind: input, shape index: {}]   ;;  %s13277_s13 = inlined_call_operand.hbm [shape: bf16[128,128], index: 13, kind: input, shape index: {}]   ;;  %s13278_s14 = inlined_call_operand.hbm [shape: f32[1,128], index: 14, kind: input, shape index: {}]   ;;  %s13279_s15 = inlined_call_operand.hbm [shape: f32[2,1,128], index: 15, kind: output, shape index: {}]  }
   0x1   :  { %13316 = sst [smem:[#allocation40_spill]] %s13264_s0 }
   0x2   :  { %13317 = sst [smem:[#allocation41_spill]] %s13265_s1 }
   0x3   :  { %13318 = sst [smem:[#allocation42_spill]] %s13266_s2 }
   0x4   :  { %13319 = sst [smem:[#allocation43_spill]] %s13267_s3 }
   0x5   :  { %13320 = sst [smem:[#allocation44_spill]] %s13268_s4 }
   0x6   :  { %13321 = sst [smem:[#allocation45_spill]] %s13269_s5 }
   0x7   :  { %13322 = sst [smem:[#allocation46_spill]] %s13270_s6 }
   0x8   :  { %13323 = sst [smem:[#allocation47_spill]] %s13279_s15 }
   0x9   :  { %20 = vsyncpa [#allocation3], 0 }
   0xa   :  { %22 = vsyncpa [#allocation3 + $0x1], 0 }
   0xb   :  { %23 = vsyncpa [#allocation6], 0 }
   0xc   :  { %24 = vsyncpa [#allocation9], 0 }
   0xd   :  { %25 = vsyncpa [#allocation12], 0 }
   0xe   :  { %26 = vsyncpa [#allocation15], 0 }
   0xf   :  { %27 = vsyncpa [#allocation18], 0 }
  0x10   :  { %28 = vsyncpa [#allocation21], 0 }
  0x11   :  { %29 = vsyncpa [#allocation24], 0 }
  0x12   :  { %30 = vsyncpa [#allocation4], 0 }
  0x13   :  { %32 = vsyncpa [#allocation4 + $0x1], 0  ;;  %s11657_s18 = smov 0   ;;  %s11659_s19 = smov 0  }
  0x14   :  { %s11661_s20 = smov 0   ;;  %s11663_s21 = smov 0  }
  0x15 LB: > { %13324 = sst [smem:[#allocation36_spill]] %s11537_s18  ;;  %s11551_s22 = smov [#allocation5]   ;;  %s11549_s21 = sphi %s11663_s21, %s13396_s21   ;;  %s11545_s20 = sphi %s11661_s20, %s13395_s20   ;;  %s11541_s19 = sphi %s11659_s19, %s13394_s19   ;;  %s11537_s18 = sphi %s11657_s18, %s13393_s18  }
  0x16   : > { %13325 = sst [smem:[#allocation37_spill]] %s11541_s19  ;;  %s401_s23 = sshll.u32 %s11551_s22, 4  ;;  %s11683_s23 = int_to_ptr.vmem [resolvable:$true] %s401_s23 }
  0x17   : > { %s11678_s24 = sadd.s32 4294967295, %s11549_s21   ;;  %p8527_p0 = scmp.ge.s32.totalorder %s11549_s21, 1 }
  0x18   : > { %13326 = sst [smem:[#allocation38_spill]] %s11678_s24  ;;  %p13289_p1 = scmp.eq.s32.totalorder %s11678_s24, 0 }
  0x19   : > { %p389_p2 = scmp.lt.s32.totalorder %s11549_s21, 3  ;;  %s11552_s26 = smov [#allocation8]  }
  0x1a   : > { %s425_s27 = sshll.u32 %s11552_s26, 4  ;;  %s13330_s1 = sld [smem:[#allocation41_spill]]  ;;  %s11698_s27 = int_to_ptr.vmem [resolvable:$true] %s425_s27 }
  0x1b   : > { %p11685_p3 = pnand %p8527_p0, %p389_p2 }
  0x1d   : > { %s13327_s25 = scalar_select %p11685_p3, 1, 0 }
  0x1e   : > { %p9834_p5 = pneg %p11685_p3 }
  0x1f   : > { %13328 = sst [smem:[#allocation39_spill]] %s13327_s25 }
  0x20   : > { %p11694_p6 = pnand %p9834_p5, %p13289_p1  ;;  %s11033_s16 = scalar_lea.hbm %s13330_s1, 8960 }
  0x21   : > { %p11034_p7 = scmp.ne.s32.totalorder %s13330_s1, %s11033_s16  ;;  %p11040_p11 = scmp.lt.u32.totalorder %s11033_s16, %s13330_s1 }
  0x22   : > { %p11708_p8 = pneg %p11694_p6 }
  0x24   : > { %p11036_p9 = pnand %p11708_p8, %p11034_p7 }
  0x26   : > { %p11037_p10 = pneg %p11036_p9 }
  0x28   : > { %p11042_p12 = pnand %p11040_p11, %p11037_p10 }
  0x2a   : > { %11045 = shalt.err (!%p11042_p12)
}
  0x2b   : > { %s11046_s29 = scalar_lea.vmem %s11683_s23, 8960  ;;  %p11054_p5 = scmp.lt.s32.totalorder %s11683_s23, %s11683_s23 }
  0x2c   : > { %p11047_p13 = scmp.ne.s32.totalorder %s11683_s23, %s11046_s29  ;;  %p11055_p4 = scmp.lt.s32.totalorder %s11046_s29, %s11046_s29 }
  0x2e   : > { %p11049_p0 = pnand %p11047_p13, %p11708_p8  ;;  %p11056_p7 = por %p11055_p4, %p11054_p5 }
  0x30   : > { %p11050_p2 = pneg %p11049_p0 }
  0x32   : > { %p11057_p9 = pnand %p11056_p7, %p11050_p2 }
  0x34   : > { %11060 = shalt.err (!%p11057_p9)
}
  0x35   : > { %s13287_s30 = smov 256   ;;  %s13288_s25 = smov 16  }
  0x36   : > { %9837 = dma.hbm_to_vmem [thread:$0]  (!%p11694_p6), %s13330_s1, 8960, %s11683_s23, [#allocation6], %s13287_s30, %s13287_s30, %s13288_s25  }
  0x37   : > { %s13332_s3 = sld [smem:[#allocation43_spill]] }
  0x3d   : > { %s11061_s29 = scalar_lea.hbm %s13332_s3, 8192 }
  0x3e   : > { %p11062_p4 = scmp.ne.s32.totalorder %s13332_s3, %s11061_s29  ;;  %p11068_p12 = scmp.lt.u32.totalorder %s11061_s29, %s13332_s3 }
  0x40   : > { %p11064_p10 = pnand %p11062_p4, %p11708_p8 }
  0x42   : > { %p11065_p11 = pneg %p11064_p10 }
  0x44   : > { %p11070_p13 = pnand %p11068_p12, %p11065_p11 }
  0x46   : > { %11073 = shalt.err (!%p11070_p13)
}
  0x47   : > { %s11074_s23 = scalar_lea.vmem %s11698_s27, 8192  ;;  %p11082_p7 = scmp.lt.s32.totalorder %s11698_s27, %s11698_s27 }
  0x48   : > { %p11075_p0 = scmp.ne.s32.totalorder %s11698_s27, %s11074_s23  ;;  %p11083_p9 = scmp.lt.s32.totalorder %s11074_s23, %s11074_s23 }
  0x4a   : > { %p11077_p2 = pnand %p11075_p0, %p11708_p8  ;;  %p11084_p4 = por %p11083_p9, %p11082_p7 }
  0x4c   : > { %p11078_p5 = pneg %p11077_p2 }
  0x4e   : > { %p11085_p10 = pnand %p11084_p4, %p11078_p5 }
  0x50   : > { %11088 = shalt.err (!%p11085_p10)
}
  0x51   : > { %s13291_s0 = smov 128   ;;  %s13293_s18 = smov 8  }
  0x52   : > { %9843 = dma.hbm_to_vmem [thread:$0]  (!%p11694_p6), %s13332_s3, 8192, %s11698_s27, [#allocation9], %s13291_s0, %s13291_s0, %s13293_s18  }
  0x53   : > { %s11557_s16 = smov [#allocation11]   ;;  %s11558_s22 = smov [#allocation14]  }
  0x54   : > { %s451_s17 = sshll.u32 %s11557_s16, 4  ;;  %s478_s26 = sshll.u32 %s11558_s22, 4  ;;  %s452_s17 = int_to_ptr.vmem [resolvable:$true] %s451_s17  ;;  %s11758_s26 = int_to_ptr.vmem [resolvable:$true] %s478_s26 }
  0x55   : > { %s13333_s5 = sld [smem:[#allocation45_spill]] }
  0x5b   : > { %s11089_s30 = scalar_lea.hbm %s13333_s5, 256 }
  0x5c   : > { %p11090_p11 = scmp.ne.s32.totalorder %s13333_s5, %s11089_s30  ;;  %p11096_p0 = scmp.lt.u32.totalorder %s11089_s30, %s13333_s5 }
  0x5e   : > { %p11092_p12 = pnand %p11090_p11, %p11708_p8 }
  0x60   : > { %p11093_p13 = pneg %p11092_p12 }
  0x62   : > { %p11098_p2 = pnand %p11096_p0, %p11093_p13 }
  0x64   : > { %11101 = shalt.err (!%p11098_p2)
}
  0x65   : > { %s11102_s24 = scalar_lea.vmem %s452_s17, 256  ;;  %p11110_p4 = scmp.lt.s32.totalorder %s452_s17, %s452_s17 }
  0x66   : > { %p11103_p5 = scmp.ne.s32.totalorder %s452_s17, %s11102_s24  ;;  %p11111_p10 = scmp.lt.s32.totalorder %s11102_s24, %s11102_s24 }
  0x68   : > { %p11105_p7 = pnand %p11103_p5, %p11708_p8  ;;  %p11112_p1 = por %p11111_p10, %p11110_p4 }
  0x6a   : > { %p11106_p9 = pneg %p11105_p7 }
  0x6c   : > { %p11113_p3 = pnand %p11112_p1, %p11106_p9 }
  0x6e   : > { %11116 = shalt.err (!%p11113_p3)
}
  0x6f   : > { %s13295_s1 = smov 64   ;;  %s13296_s25 = smov 4  }
  0x70   : > { %9849 = dma.hbm_to_vmem [thread:$0]  (!%p11694_p6), %s13333_s5, 256, %s452_s17, [#allocation12], %s13295_s1, %s13295_s1, %s13296_s25  }
  0x71   : > { %s11117_s23 = scalar_lea.hbm %s13271_s7, 64 }
  0x72   : > { %p11118_p1 = scmp.ne.s32.totalorder %s13271_s7, %s11117_s23  ;;  %p11124_p12 = scmp.lt.u32.totalorder %s11117_s23, %s13271_s7 }
  0x74   : > { %p11120_p3 = pnand %p11118_p1, %p11708_p8 }
  0x76   : > { %p11121_p11 = pneg %p11120_p3 }
  0x78   : > { %p11126_p13 = pnand %p11124_p12, %p11121_p11 }
  0x7a   : > { %11129 = shalt.err (!%p11126_p13)
}
  0x7b   : > { %s11130_s17 = scalar_lea.vmem %s11758_s26, 64  ;;  %p11138_p7 = scmp.lt.s32.totalorder %s11758_s26, %s11758_s26 }
  0x7c   : > { %p11131_p0 = scmp.ne.s32.totalorder %s11758_s26, %s11130_s17  ;;  %p11139_p9 = scmp.lt.s32.totalorder %s11130_s17, %s11130_s17 }
  0x7e   : > { %p11133_p2 = pnand %p11131_p0, %p11708_p8  ;;  %p11140_p4 = por %p11139_p9, %p11138_p7 }
  0x80   : > { %p11134_p5 = pneg %p11133_p2 }
  0x82   : > { %p11141_p10 = pnand %p11140_p4, %p11134_p5 }
  0x84   : > { %11144 = shalt.err (!%p11141_p10)
}
  0x85   : > { %9855 = dma.hbm_to_vmem [thread:$0]  (!%p11694_p6), %s13271_s7, 64, %s11758_s26, [#allocation15]  }
  0x86   : > { %s11561_s16 = smov [#allocation17]   ;;  %s11562_s29 = smov [#allocation20]  }
  0x87   : > { %s501_s22 = sshll.u32 %s11561_s16, 4  ;;  %s527_s23 = sshll.u32 %s11562_s29, 4  ;;  %s502_s22 = int_to_ptr.vmem [resolvable:$true] %s501_s22  ;;  %s11804_s23 = int_to_ptr.vmem [resolvable:$true] %s527_s23 }
  0x88   : > { %s11145_s24 = scalar_lea.hbm %s13273_s9, 128 }
  0x89   : > { %p11146_p1 = scmp.ne.s32.totalorder %s13273_s9, %s11145_s24  ;;  %p11152_p12 = scmp.lt.u32.totalorder %s11145_s24, %s13273_s9 }
  0x8b   : > { %p11148_p3 = pnand %p11146_p1, %p11708_p8 }
  0x8d   : > { %p11149_p11 = pneg %p11148_p3 }
  0x8f   : > { %p11154_p13 = pnand %p11152_p12, %p11149_p11 }
  0x91   : > { %11157 = shalt.err (!%p11154_p13)
}
  0x92   : > { %s11158_s30 = scalar_lea.vmem %s502_s22, 128  ;;  %p11166_p7 = scmp.lt.s32.totalorder %s502_s22, %s502_s22 }
  0x93   : > { %p11159_p0 = scmp.ne.s32.totalorder %s502_s22, %s11158_s30  ;;  %p11167_p9 = scmp.lt.s32.totalorder %s11158_s30, %s11158_s30 }
  0x95   : > { %p11161_p2 = pnand %p11159_p0, %p11708_p8  ;;  %p11168_p4 = por %p11167_p9, %p11166_p7 }
  0x97   : > { %p11162_p5 = pneg %p11161_p2 }
  0x99   : > { %p11169_p10 = pnand %p11168_p4, %p11162_p5 }
  0x9b   : > { %11172 = shalt.err (!%p11169_p10)
}
  0x9c   : > { %9861 = dma.hbm_to_vmem [thread:$0]  (!%p11694_p6), %s13273_s9, 128, %s502_s22, [#allocation18], %s13295_s1, %s13295_s1, %s13296_s25  }
  0x9d   : > { %s11173_s27 = scalar_lea.hbm %s13275_s11, 22528 }
  0x9e   : > { %p11174_p1 = scmp.ne.s32.totalorder %s13275_s11, %s11173_s27  ;;  %p11180_p12 = scmp.lt.u32.totalorder %s11173_s27, %s13275_s11 }
  0xa0   : > { %p11176_p3 = pnand %p11174_p1, %p11708_p8 }
  0xa2   : > { %p11177_p11 = pneg %p11176_p3 }
  0xa4   : > { %p11182_p13 = pnand %p11180_p12, %p11177_p11 }
  0xa6   : > { %11185 = shalt.err (!%p11182_p13)
}
  0xa7   : > { %s11186_s22 = scalar_lea.vmem %s11804_s23, 22528  ;;  %p11194_p7 = scmp.lt.s32.totalorder %s11804_s23, %s11804_s23 }
  0xa8   : > { %p11187_p0 = scmp.ne.s32.totalorder %s11804_s23, %s11186_s22  ;;  %p11195_p9 = scmp.lt.s32.totalorder %s11186_s22, %s11186_s22 }
  0xaa   : > { %p11189_p2 = pnand %p11187_p0, %p11708_p8  ;;  %p11196_p4 = por %p11195_p9, %p11194_p7 }
  0xac   : > { %p11190_p5 = pneg %p11189_p2 }
  0xae   : > { %p11197_p10 = pnand %p11196_p4, %p11190_p5 }
  0xb0   : > { %11200 = shalt.err (!%p11197_p10)
}
  0xb1   : > { %9867 = dma.hbm_to_vmem [thread:$0]  (!%p11694_p6), %s13275_s11, 22528, %s11804_s23, [#allocation21], %s13295_s1, %s13295_s1, %s13296_s25  }
  0xb2   : > { %s11563_s16 = smov [#allocation23]   ;;  %s11564_s19 = smov [#allocation7]  }
  0xb3   : > { %s551_s29 = sshll.u32 %s11563_s16, 4  ;;  %s415_s27 = sshll.u32 %s11564_s19, 4  ;;  %s552_s29 = int_to_ptr.vmem [resolvable:$true] %s551_s29  ;;  %s11853_s27 = int_to_ptr.vmem [resolvable:$true] %s415_s27 }
  0xb4   : > { %s11201_s0 = scalar_lea.hbm %s13277_s13, 1024 }
  0xb5   : > { %p11202_p1 = scmp.ne.s32.totalorder %s13277_s13, %s11201_s0  ;;  %p11208_p12 = scmp.lt.u32.totalorder %s11201_s0, %s13277_s13 }
  0xb7   : > { %p11204_p3 = pnand %p11202_p1, %p11708_p8 }
  0xb9   : > { %p11205_p11 = pneg %p11204_p3 }
  0xbb   : > { %p11210_p13 = pnand %p11208_p12, %p11205_p11 }
  0xbd   : > { %11213 = shalt.err (!%p11210_p13)
}
  0xbe   : > { %s11214_s18 = scalar_lea.vmem %s552_s29, 1024  ;;  %p11222_p7 = scmp.lt.s32.totalorder %s552_s29, %s552_s29 }
  0xbf   : > { %p11215_p0 = scmp.ne.s32.totalorder %s552_s29, %s11214_s18  ;;  %p11223_p9 = scmp.lt.s32.totalorder %s11214_s18, %s11214_s18 }
  0xc1   : > { %p11217_p2 = pnand %p11215_p0, %p11708_p8  ;;  %p11224_p4 = por %p11223_p9, %p11222_p7 }
  0xc3   : > { %p11218_p5 = pneg %p11217_p2 }
  0xc5   : > { %p11225_p10 = pnand %p11224_p4, %p11218_p5 }
  0xc7   : > { %11228 = shalt.err (!%p11225_p10)
}
  0xc8   : > { %9873 = dma.hbm_to_vmem [thread:$0]  (!%p11694_p6), %s13277_s13, 1024, %s552_s29, [#allocation24], %s13295_s1, %s13295_s1, %s13296_s25  }
  0xc9   : > { %s13334_s2 = sld [smem:[#allocation42_spill]] }
  0xcf   : > { %s11229_s0 = scalar_lea.hbm %s13334_s2, 64 }
  0xd0   : > { %p11230_p1 = scmp.ne.s32.totalorder %s13334_s2, %s11229_s0  ;;  %p11236_p12 = scmp.lt.u32.totalorder %s11229_s0, %s13334_s2 }
  0xd2   : > { %p11232_p3 = pnand %p11230_p1, %p11708_p8 }
  0xd4   : > { %p11233_p11 = pneg %p11232_p3 }
  0xd6   : > { %p11238_p13 = pnand %p11236_p12, %p11233_p11 }
  0xd8   : > { %11241 = shalt.err (!%p11238_p13)
}
  0xd9   : > { %s11242_s29 = scalar_lea.vmem %s11853_s27, 64  ;;  %p11250_p7 = scmp.lt.s32.totalorder %s11853_s27, %s11853_s27 }
  0xda   : > { %p11243_p0 = scmp.ne.s32.totalorder %s11853_s27, %s11242_s29  ;;  %p11251_p9 = scmp.lt.s32.totalorder %s11242_s29, %s11242_s29 }
  0xdc   : > { %p11245_p2 = pnand %p11243_p0, %p11708_p8  ;;  %p11252_p4 = por %p11251_p9, %p11250_p7 }
  0xde   : > { %p11246_p5 = pneg %p11245_p2 }
  0xe0   : > { %p11253_p10 = pnand %p11252_p4, %p11246_p5 }
  0xe2   : > { %11256 = shalt.err (!%p11253_p10)
}
  0xe3   : > { %9840 = dma.hbm_to_vmem [thread:$0]  (!%p11694_p6), %s13334_s2, 64, %s11853_s27, [#allocation6]  }
  0xe4   : > { %s11565_s19 = smov [#allocation10]   ;;  %s11566_s17 = smov [#allocation13]  }
  0xe5   : > { %s438_s24 = sshll.u32 %s11565_s19, 4  ;;  %s464_s0 = sshll.u32 %s11566_s17, 4  ;;  %s439_s24 = int_to_ptr.vmem [resolvable:$true] %s438_s24  ;;  %s11899_s0 = int_to_ptr.vmem [resolvable:$true] %s464_s0 }
  0xe6   : > { %s13335_s4 = sld [smem:[#allocation44_spill]] }
  0xec   : > { %s11257_s30 = scalar_lea.hbm %s13335_s4, 256 }
  0xed   : > { %p11258_p1 = scmp.ne.s32.totalorder %s13335_s4, %s11257_s30  ;;  %p11264_p12 = scmp.lt.u32.totalorder %s11257_s30, %s13335_s4 }
  0xef   : > { %p11260_p3 = pnand %p11258_p1, %p11708_p8 }
  0xf1   : > { %p11261_p11 = pneg %p11260_p3 }
  0xf3   : > { %p11266_p13 = pnand %p11264_p12, %p11261_p11 }
  0xf5   : > { %11269 = shalt.err (!%p11266_p13)
}
  0xf6   : > { %s11270_s16 = scalar_lea.vmem %s439_s24, 256  ;;  %p11278_p7 = scmp.lt.s32.totalorder %s439_s24, %s439_s24 }
  0xf7   : > { %p11271_p0 = scmp.ne.s32.totalorder %s439_s24, %s11270_s16  ;;  %p11279_p9 = scmp.lt.s32.totalorder %s11270_s16, %s11270_s16 }
  0xf9   : > { %p11273_p2 = pnand %p11271_p0, %p11708_p8  ;;  %p11280_p4 = por %p11279_p9, %p11278_p7 }
  0xfb   : > { %p11274_p5 = pneg %p11273_p2 }
  0xfd   : > { %p11281_p10 = pnand %p11280_p4, %p11274_p5 }
  0xff   : > { %11284 = shalt.err (!%p11281_p10)
}
 0x100   : > { %9846 = dma.hbm_to_vmem [thread:$0]  (!%p11694_p6), %s13335_s4, 256, %s439_s24, [#allocation9], %s13295_s1, %s13295_s1, %s13296_s25  }
 0x101   : > { %s13336_s6 = sld [smem:[#allocation46_spill]] }
 0x107   : > { %s11285_s30 = scalar_lea.hbm %s13336_s6, 40960 }
 0x108   : > { %p11286_p1 = scmp.ne.s32.totalorder %s13336_s6, %s11285_s30  ;;  %p11292_p12 = scmp.lt.u32.totalorder %s11285_s30, %s13336_s6 }
 0x10a   : > { %p11288_p3 = pnand %p11286_p1, %p11708_p8 }
 0x10c   : > { %p11289_p11 = pneg %p11288_p3 }
 0x10e   : > { %p11294_p13 = pnand %p11292_p12, %p11289_p11 }
 0x110   : > { %11297 = shalt.err (!%p11294_p13)
}
 0x111   : > { %s11298_s24 = scalar_lea.vmem %s11899_s0, 40960  ;;  %p11306_p7 = scmp.lt.s32.totalorder %s11899_s0, %s11899_s0 }
 0x112   : > { %p11299_p0 = scmp.ne.s32.totalorder %s11899_s0, %s11298_s24  ;;  %p11307_p9 = scmp.lt.s32.totalorder %s11298_s24, %s11298_s24 }
 0x114   : > { %p11301_p2 = pnand %p11299_p0, %p11708_p8  ;;  %p11308_p4 = por %p11307_p9, %p11306_p7 }
 0x116   : > { %p11302_p5 = pneg %p11301_p2 }
 0x118   : > { %p11309_p10 = pnand %p11308_p4, %p11302_p5 }
 0x11a   : > { %11312 = shalt.err (!%p11309_p10)
}
 0x11b   : > { %s13337_s16 = smov 16   ;;  %s13338_s19 = smov 256  }
 0x11c   : > { %9852 = dma.hbm_to_vmem [thread:$0]  (!%p11694_p6), %s13336_s6, 40960, %s11899_s0, [#allocation12], %s13338_s19, %s13338_s19, %s13337_s16  }
 0x11d   : > { %s11567_s22 = smov [#allocation16]   ;;  %s11568_s23 = smov [#allocation19]  }
 0x11e   : > { %s488_s30 = sshll.u32 %s11567_s22, 4  ;;  %s514_s29 = sshll.u32 %s11568_s23, 4  ;;  %s489_s30 = int_to_ptr.vmem [resolvable:$true] %s488_s30  ;;  %s11948_s29 = int_to_ptr.vmem [resolvable:$true] %s514_s29 }
 0x11f   : > { %s11313_s24 = scalar_lea.hbm %s13272_s8, 8192 }
 0x120   : > { %p11314_p1 = scmp.ne.s32.totalorder %s13272_s8, %s11313_s24  ;;  %p11320_p12 = scmp.lt.u32.totalorder %s11313_s24, %s13272_s8 }
 0x122   : > { %p11316_p3 = pnand %p11314_p1, %p11708_p8 }
 0x124   : > { %p11317_p11 = pneg %p11316_p3 }
 0x126   : > { %p11322_p13 = pnand %p11320_p12, %p11317_p11 }
 0x128   : > { %11325 = shalt.err (!%p11322_p13)
}
 0x129   : > { %s11326_s16 = scalar_lea.vmem %s489_s30, 8192  ;;  %p11334_p7 = scmp.lt.s32.totalorder %s489_s30, %s489_s30 }
 0x12a   : > { %p11327_p0 = scmp.ne.s32.totalorder %s489_s30, %s11326_s16  ;;  %p11335_p9 = scmp.lt.s32.totalorder %s11326_s16, %s11326_s16 }
 0x12c   : > { %p11329_p2 = pnand %p11327_p0, %p11708_p8  ;;  %p11336_p4 = por %p11335_p9, %p11334_p7 }
 0x12e   : > { %p11330_p5 = pneg %p11329_p2 }
 0x130   : > { %p11337_p10 = pnand %p11336_p4, %p11330_p5 }
 0x132   : > { %11340 = shalt.err (!%p11337_p10)
}
 0x133   : > { %s13339_s1 = smov 8   ;;  %s13340_s25 = smov 128  }
 0x134   : > { %9858 = dma.hbm_to_vmem [thread:$0]  (!%p11694_p6), %s13272_s8, 8192, %s489_s30, [#allocation15], %s13340_s25, %s13340_s25, %s13339_s1  }
 0x135   : > { %s11341_s18 = scalar_lea.hbm %s13274_s10, 128 }
 0x136   : > { %p11342_p1 = scmp.ne.s32.totalorder %s13274_s10, %s11341_s18  ;;  %p11348_p12 = scmp.lt.u32.totalorder %s11341_s18, %s13274_s10 }
 0x138   : > { %p11344_p3 = pnand %p11342_p1, %p11708_p8 }
 0x13a   : > { %p11345_p11 = pneg %p11344_p3 }
 0x13c   : > { %p11350_p13 = pnand %p11348_p12, %p11345_p11 }
 0x13e   : > { %11353 = shalt.err (!%p11350_p13)
}
 0x13f   : > { %s11354_s30 = scalar_lea.vmem %s11948_s29, 128  ;;  %p11362_p7 = scmp.lt.s32.totalorder %s11948_s29, %s11948_s29 }
 0x140   : > { %p11355_p0 = scmp.ne.s32.totalorder %s11948_s29, %s11354_s30  ;;  %p11363_p9 = scmp.lt.s32.totalorder %s11354_s30, %s11354_s30 }
 0x142   : > { %p11357_p2 = pnand %p11355_p0, %p11708_p8  ;;  %p11364_p4 = por %p11363_p9, %p11362_p7 }
 0x144   : > { %p11358_p5 = pneg %p11357_p2 }
 0x146   : > { %p11365_p10 = pnand %p11364_p4, %p11358_p5 }
 0x148   : > { %11368 = shalt.err (!%p11365_p10)
}
 0x149   : > { %s13341_s16 = smov 4   ;;  %s13342_s19 = smov 64  }
 0x14a   : > { %9864 = dma.hbm_to_vmem [thread:$0]  (!%p11694_p6), %s13274_s10, 128, %s11948_s29, [#allocation18], %s13342_s19, %s13342_s19, %s13341_s16  }
 0x14b   : > { %s11569_s23 = smov [#allocation22]   ;;  %s11570_s27 = smov [#allocation25]  }
 0x14c   : > { %s541_s18 = sshll.u32 %s11569_s23, 4  ;;  %s565_s24 = sshll.u32 %s11570_s27, 4  ;;  %s542_s18 = int_to_ptr.vmem [resolvable:$true] %s541_s18  ;;  %s11997_s24 = int_to_ptr.vmem [resolvable:$true] %s565_s24 }
 0x14d   : > { %s11369_s30 = scalar_lea.hbm %s13276_s12, 16 }
 0x14e   : > { %p11370_p1 = scmp.ne.s32.totalorder %s13276_s12, %s11369_s30  ;;  %p11376_p12 = scmp.lt.u32.totalorder %s11369_s30, %s13276_s12 }
 0x150   : > { %p11372_p3 = pnand %p11370_p1, %p11708_p8 }
 0x152   : > { %p11373_p11 = pneg %p11372_p3 }
 0x154   : > { %p11378_p13 = pnand %p11376_p12, %p11373_p11 }
 0x156   : > { %11381 = shalt.err (!%p11378_p13)
}
 0x157   : > { %s11382_s16 = scalar_lea.vmem %s542_s18, 16  ;;  %s11389_s19 = scalar_lea.vmem %s542_s18, 32 }
 0x158   : > { %p11383_p0 = scmp.ne.s32.totalorder %s542_s18, %s11382_s16  ;;  %p11390_p7 = scmp.lt.s32.totalorder %s542_s18, %s542_s18 }
 0x159   : > { %p11391_p9 = scmp.lt.s32.totalorder %s11389_s19, %s11382_s16 }
 0x15a   : > { %p11385_p2 = pnand %p11383_p0, %p11708_p8 }
 0x15b   : > { %p11392_p4 = por %p11391_p9, %p11390_p7 }
 0x15c   : > { %p11386_p5 = pneg %p11385_p2 }
 0x15e   : > { %p11393_p10 = pnand %p11392_p4, %p11386_p5 }
 0x160   : > { %11396 = shalt.err (!%p11393_p10)
}
 0x161   : > { %9870 = dma.hbm_to_vmem [thread:$0]  (!%p11694_p6), %s13276_s12, 16, %s542_s18, [#allocation21]  }
 0x162   : > { %s11397_s27 = scalar_lea.hbm %s13278_s14, 16 }
 0x163   : > { %p11398_p1 = scmp.ne.s32.totalorder %s13278_s14, %s11397_s27  ;;  %p11404_p12 = scmp.lt.u32.totalorder %s11397_s27, %s13278_s14 }
 0x165   : > { %p11400_p3 = pnand %p11398_p1, %p11708_p8 }
 0x167   : > { %p11401_p11 = pneg %p11400_p3 }
 0x169   : > { %p11406_p13 = pnand %p11404_p12, %p11401_p11 }
 0x16b   : > { %11409 = shalt.err (!%p11406_p13)
}
 0x16c   : > { %s11410_s18 = scalar_lea.vmem %s11997_s24, 16  ;;  %s11417_s29 = scalar_lea.vmem %s11997_s24, 32 }
 0x16d   : > { %p11411_p0 = scmp.ne.s32.totalorder %s11997_s24, %s11410_s18  ;;  %p11418_p7 = scmp.lt.s32.totalorder %s11997_s24, %s11997_s24 }
 0x16e   : > { %p11419_p9 = scmp.lt.s32.totalorder %s11417_s29, %s11410_s18 }
 0x16f   : > { %p11413_p2 = pnand %p11411_p0, %p11708_p8 }
 0x170   : > { %p11420_p4 = por %p11419_p9, %p11418_p7 }
 0x171   : > { %p11414_p5 = pneg %p11413_p2 }
 0x173   : > { %p11421_p10 = pnand %p11420_p4, %p11414_p5 }
 0x175   : > { %11424 = shalt.err (!%p11421_p10)
}
 0x176   : > { %s13343_s15 = sld [smem:[#allocation37_spill]]  ;;  %s13344_s2 = sld [smem:[#allocation36_spill]] }
 0x177   : > { %s13345_s3 = sld [smem:[#allocation38_spill]]  ;;  %s8526_s28 = sadd.s32 4294967294, %s11549_s21  }
 0x178   : > { %9876 = dma.hbm_to_vmem [thread:$0]  (!%p11694_p6), %s13278_s14, 16, %s11997_s24, [#allocation24]  }
 0x179   : > { %s12043_s22 = sadd.s32 1, %s11549_s21   ;;  %s45_s27 = sadd.s32 1, %s11545_s20 }
 0x17a   : > { %s42_s23 = ssub.s32 %s11549_s21, %s12043_s22  ;;  %p53_p3 = scmp.eq.s32.totalorder %s11549_s21, 0 }
 0x17b   : > { %p43_p8 = scmp.eq.s32.totalorder %s42_s23, 0  ;;  %p382_p2 = scmp.eq.s32.totalorder %s8526_s28, 1 }
 0x17c   : > { %p52_p1 = scmp.ne.s32.totalorder %s11545_s20, %s13343_s15  ;;  %p58_p11 = scmp.ne.s32.totalorder %s13343_s15, %s13344_s2 }
 0x17d   : > { %s12054_s17 = scalar_select %p43_p8, %s11545_s20, %s45_s27  }
 0x17e   : > { %p54_p12 = por %p53_p3, %p52_p1  ;;  %p13346_p13 = scmp.eq.s32.totalorder %s13345_s3, 0 }
 0x17f   : > { %p376_p6 = scmp.eq.s32.totalorder %s13345_s3, 1  ;;  %p9899_p5 = scmp.lt.s32.totalorder %s11549_s21, 2 }
 0x180   : > { %p12058_p0 = por %p13346_p13, %p58_p11  ;;  %s576_s24 = sand.u32 1, %s11545_s20  }
 0x181   : > { %p12065_p7 = por %p376_p6, %p52_p1  ;;  %p12069_p9 = por %p382_p2, %p58_p11 }
 0x182   : > { %s9771_s18 = smul.u32 56, %s576_s24  ;;  %p12074_p4 = pnand %p9899_p5, %p54_p12 }
 0x183   : > { %s13348_s30 = scalar_select %p12065_p7, 1, 0 }
 0x184   : > { %s13349_s26 = scalar_select %p12069_p9, 1, 0 }
 0x185   : > { %s9772_s29 = smul.u32 896, %s11549_s21  ;;  %s13351_s2 = sld [smem:[#allocation40_spill]] }
 0x186   : > { %s580_s28 = scalar_lea.vmem [#allocation2], %s9771_s18  ;;  %s12085_s27 = scalar_lea.sflag [#allocation3], %s576_s24 }
 0x187   : > { %s587_s23 = sshll.u32 %s580_s28, 4  ;;  %p11427_p8 = pneg %p12074_p4  ;;  %s12083_s23 = int_to_ptr.vmem [resolvable:$true] %s587_s23 }
 0x18b   : > { %s12081_s3 = scalar_lea.hbm %s13351_s2, %s9772_s29  ;;  %s11430_s15 = scalar_lea.hbm %s13351_s2, 1792 }
 0x18c   : > { %s11425_s4 = scalar_lea.hbm %s12081_s3, 896  ;;  %p11431_p11 = scmp.lt.u32.totalorder %s12081_s3, %s13351_s2 }
 0x18d   : > { %p11426_p10 = scmp.ne.s32.totalorder %s12081_s3, %s11425_s4  ;;  %p11432_p12 = scmp.lt.u32.totalorder %s11430_s15, %s11425_s4 }
 0x18e   : > { %p11434_p6 = scmp.lt.u32.totalorder %s11425_s4, %s12081_s3 }
 0x18f   : > { %p11428_p1 = pnand %p11427_p8, %p11426_p10  ;;  %p11433_p13 = por %p11432_p12, %p11431_p11 }
 0x191   : > { %p11429_p3 = pneg %p11428_p1  ;;  %p11435_p2 = por %p11434_p6, %p11433_p13 }
 0x193   : > { %p11436_p5 = pnand %p11435_p2, %p11429_p3 }
 0x195   : > { %11439 = shalt.err (!%p11436_p5)
}
 0x196   : > { %s11440_s24 = scalar_lea.vmem %s12083_s23, 896  ;;  %s11571_s18 = smov [#allocation2]  }
 0x197   : > { %p11441_p10 = scmp.ne.s32.totalorder %s12083_s23, %s11440_s24  ;;  %s11445_s28 = sshll.u32 %s11571_s18, 4  ;;  %s11446_s28 = int_to_ptr.vmem [resolvable:$false] %s11445_s28 }
 0x198   : > { %s11447_s5 = scalar_lea.vmem %s11446_s28, 1792  ;;  %p11448_p7 = scmp.lt.s32.totalorder %s12083_s23, %s11446_s28 }
 0x199   : > { %p11443_p1 = pnand %p11441_p10, %p11427_p8  ;;  %p11449_p11 = scmp.lt.s32.totalorder %s11447_s5, %s11440_s24 }
 0x19b   : > { %p11444_p9 = pneg %p11443_p1  ;;  %p11450_p12 = por %p11449_p11, %p11448_p7 }
 0x19d   : > { %p11451_p13 = pnand %p11450_p12, %p11444_p9 }
 0x19f   : > { %11454 = shalt.err (!%p11451_p13)
}
 0x1a0   : > { %9880 = dma.hbm_to_vmem [thread:$0]  (!%p12074_p4), %s12081_s3, 896, %s12083_s23, %s12085_s27, %s13340_s25, %s13340_s25, %s13339_s1  }
 0x1a1   : > { %s13352_s4 = sld [smem:[#allocation39_spill]] }
 0x1a7   : > { %p13353_p8 = scmp.ne.s32.totalorder %s13352_s4, 0 }
 0x1a8   : > { %s13354_s6 = sld [smem:[#allocation37_spill]] (!%p13353_p8) }
 0x1a9   : > { %599 = sbr.rel (%p13353_p8) target bundleno = 3736 (0xe98), region = 80 }
 0x1ae   : > { %s12119_s29 = sand.u32 (!%p13353_p8), 1, %s13354_s6  }
 0x1af   : > { %s9773_s19 = smul.u32 (!%p13353_p8), 56, %s12119_s29  ;;  %s602_s15 = scalar_lea.sflag (!%p13353_p8), [#allocation3], %s12119_s29 }
 0x1b1   : > { %s12123_s24 = scalar_lea.vmem [#allocation2], %s9773_s19 }
 0x1b2   : > { %11500 = dma.done.wait (%p12058_p0), %s602_s15, 896  }
 0x1b3   : > { %11502 = vsyncadd (%p12058_p0), %s602_s15, 4294966400  ;;  %s13355_s16 = sld [smem:[#allocation38_spill]] }
 0x1b9   : > { %p13356_p7 = scmp.eq.s32.totalorder %s13355_s16, 0 }
 0x1bb   : > { %11504 = dma.done.wait (%p13356_p7), [#allocation6], 9024   ;;  %p13357_p9 = pmov %p13356_p7 }
 0x1bc   : > { %p13358_p4 = pmov %p13356_p7 }
 0x1bd   : > { %11506 = vsyncadd (%p13357_p9), [#allocation6], 4294958272 }
 0x1be   : > { %11508 = dma.done.wait (%p13358_p4), [#allocation9], 8448   ;;  %p13359_p3 = pmov %p13358_p4 }
 0x1c0   : > { %11510 = vsyncadd (%p13359_p3), [#allocation9], 4294958848  ;;  %p13360_p6 = pmov %p13359_p3 }
 0x1c1   : > { %p13361_p2 = pmov %p13359_p3 }
 0x1c2   : > { %11512 = dma.done.wait (%p13360_p6), [#allocation12], 41216  }
 0x1c3   : > { %11514 = vsyncadd (%p13361_p2), [#allocation12], 4294926080  ;;  %p13362_p0 = pmov %p13361_p2 }
 0x1c5   : > { %11516 = dma.done.wait (%p13362_p0), [#allocation15], 8256   ;;  %p13363_p5 = pmov %p13362_p0 }
 0x1c6   : > { %p13364_p10 = pmov %p13362_p0 }
 0x1c7   : > { %11518 = vsyncadd (%p13363_p5), [#allocation15], 4294959040 }
 0x1c8   : > { %11520 = dma.done.wait (%p13364_p10), [#allocation18], 256   ;;  %p13365_p1 = pmov %p13362_p0 }
 0x1c9   : > { %p13366_p11 = pmov %p13362_p0 }
 0x1ca   : > { %11522 = vsyncadd (%p13365_p1), [#allocation18], 4294967040 }
 0x1cb   : > { %11524 = dma.done.wait (%p13366_p11), [#allocation21], 22544   ;;  %p13367_p12 = pmov %p13362_p0 }
 0x1cc   : > { %p13368_p13 = pmov %p13362_p0 }
 0x1cd   : > { %11526 = vsyncadd (%p13367_p12), [#allocation21], 4294944752 }
 0x1ce   : > { %11528 = dma.done.wait (%p13368_p13), [#allocation24], 1040   ;;  %p13369_p8 = pmov %p13362_p0 }
 0x1cf   : > { %v13302_v0 = vmov 0   ;;  %v10061_v1 = vld [vmem:[#allocation5 + $0x74] ss:$16 sps:$4 sm:$0xff]   ;;  %v12159_v2 = vld [vmem:[#allocation5 + $0x7c] ss:$16 sps:$4 sm:$0xff]   ;;  %vm863_vm0 = vcmask 1043456  }
 0x1d0   : > { %11530 = vsyncadd (%p13369_p8), [#allocation24], 4294966256  ;;  %908 = vmatprep.mubr.bf16.mxu0 %v13302_v0  ;;  %999 = vmatprep.mubr.bf16.mxu1 %v13302_v0  ;;  %v10065_v3 = vld [vmem:[#allocation5 + $0x70] ss:$16 sps:$4 sm:$0xff]   ;;  %v12161_v4 = vld [vmem:[#allocation5 + $0x78] ss:$16 sps:$4 sm:$0xff]  }
 0x1d1   : > { %876 = vmatprep.subr.bf16.mxu0 %v10061_v1  ;;  %9611 = vmatprep.subr.bf16.mxu1 %v12159_v2  ;;  %v10067_v5 = vld [vmem:[#allocation5 + $0x94] ss:$16 sps:$4 sm:$0xff]   ;;  %v12165_v6 = vld [vmem:[#allocation5 + $0x9c] ss:$16 sps:$4 sm:$0xff]   ;;  %v10071_v7 = vld [vmem:[#allocation5 + $0x90] ss:$16 sps:$4 sm:$0xff]  }
 0x1d2   : > { %877 = vmatpush1.bf16.msra.mxu0 %v10065_v3  ;;  %9615 = vmatpush1.bf16.msra.mxu1 %v12161_v4  ;;  %v12167_v8 = vld [vmem:[#allocation5 + $0x98] ss:$16 sps:$4 sm:$0xff]   ;;  %v10073_v9 = vld [vmem:[#allocation5 + $0xb4] ss:$16 sps:$4 sm:$0xff]   ;;  %v12170_v10 = vld [vmem:[#allocation5 + $0xbc] ss:$16 sps:$4 sm:$0xff]  }
 0x1d3   : > { %878 = vmatprep.subr.bf16.mxu0 %v10067_v5  ;;  %9612 = vmatprep.subr.bf16.mxu1 %v12165_v6  ;;  %v10077_v11 = vld [vmem:[#allocation5 + $0xb0] ss:$16 sps:$4 sm:$0xff]   ;;  %v12172_v12 = vld [vmem:[#allocation5 + $0xb8] ss:$16 sps:$4 sm:$0xff]   ;;  %v10085_v35 = vld [vmem:[#allocation5 + $0xc] ss:$16 sps:$4 sm:$0xff]  }
 0x1d4   : > { %v746_v13 = vld [vmem:[#allocation5 + $0xd0] sm:$0xff]  ;;  %v747_v14 = vld [vmem:[#allocation5 + $0xd8] sm:$0xff]  ;;  %v711_v21 = vld [vmem:[%s12123_s24 + $0x18] sm:$0xff]  ;;  %vm748_vm1 = vsmask.f32 7424  ;;  %vm850_vm2 = vcmask 457728  }
 0x1d5   : > { %v708_v15 = vld [vmem:[%s12123_s24] sm:$0xff]  ;;  %v8572_v16 = vcombine.high %v746_v13, %v746_v13  ;;  %v12177_v17 = vcombine.high %v747_v14, %v747_v14  ;;  %v8571_v18 = vcombine.low %v746_v13, %v746_v13  ;;  %v709_v19 = vld [vmem:[%s12123_s24 + $0x8] sm:$0xff]  ;;  %v710_v20 = vld [vmem:[%s12123_s24 + $0x10] sm:$0xff]  ;;  %v8573_v22 = vcombine.low %v747_v14, %v747_v14  ;;  %s11573_s1 = smov 127   ;;  %s9337_s25 = sshll.u32 %s13355_s16, 4 }
 0x1d6   : > { %879 = vmatpush1.bf16.msra.mxu0 %v10071_v7  ;;  %9616 = vmatpush1.bf16.msra.mxu1 %v12167_v8  ;;  %v12182_v23 = vpack.c.bf16 %v709_v19, %v708_v15  ;;  %v12184_v24 = vpack.c.bf16 %v711_v21, %v710_v20  ;;  %v712_v25 = vld [vmem:[%s12123_s24 + $0x20] sm:$0xff]  ;;  %v713_v26 = vld [vmem:[%s12123_s24 + $0x28] sm:$0xff]  ;;  %v714_v27 = vld [vmem:[%s12123_s24 + $0x30] sm:$0xff]  ;;  %vm1556_vm3 = vsmask.f32 6400  ;;  %vm1851_vm4 = vcmask 1045504  }
 0x1d7   : > { %880 = vmatprep.subr.bf16.mxu0 %v10073_v9  ;;  %9613 = vmatprep.subr.bf16.mxu1 %v12170_v10  ;;  %v865_v28 = vsel %vm863_vm0, %v8571_v18, 0  ;;  %v12190_v29 = vpack.c.bf16 %v713_v26, %v712_v25  ;;  %v12192_v30 = vpack.c.bf16 %v714_v27, %v714_v27  ;;  %v12196_v31 = vsel %vm863_vm0, %v8573_v22, 0  ;;  %v10083_v50 = vld [vmem:[#allocation5 + $0x8] ss:$16 sps:$4 sm:$0xff]   ;;  %v10088_v53 = vld [vmem:[#allocation5 + $0x2c] ss:$16 sps:$4 sm:$0xff]  }
 0x1d8   : > { %v750_v32 = vshrl.u32 %v12182_v23, 16  ;;  %v752_v33 = vshll.u32 %v12182_v23, 16  ;;  %v757_v34 = vshll.u32 %v12184_v24, 16  ;;  %v761_v39 = vshrl.u32 %v12184_v24, 16  ;;  %v10086_v59 = vld [vmem:[#allocation5 + $0x28] ss:$16 sps:$4 sm:$0xff]  }
 0x1d9   : > { %v765_v36 = vshll.u32 %v12190_v29, 16  ;;  %v769_v37 = vshrl.u32 %v12190_v29, 16  ;;  %v773_v38 = vshll.u32 %v12192_v30, 16  ;;  %v777_v56 = vshrl.u32 %v12192_v30, 16  ;;  %v10091_v60 = vld [vmem:[#allocation5 + $0x4c] ss:$16 sps:$4 sm:$0xff]  }
 0x1da   : > { %881 = vmatpush1.bf16.msra.mxu0 %v10077_v11  ;;  %9617 = vmatpush1.bf16.msra.mxu1 %v12172_v12  ;;  %v754_v40 = vrot.slane %v752_v33, 1  ;;  %v759_v41 = vrot.slane %v757_v34, 1  ;;  %v1557_v42 = vrot.slane %v750_v32, 1  ;;  %v1558_v43 = vrot.slane %v752_v33, 2  ;;  %v732_v1 = vld [vmem:[#allocation5 + $0x68] sm:$0xff]  ;;  %s706_s0 = scalar_lea.vmem [#allocation26], %s12119_s29 }
 0x1db   : > { %8575 = vmatprep.subr.msk.bf16.mxu0 %vm863_vm0, %v8572_v16  ;;  %9614 = vmatprep.subr.msk.bf16.mxu1 %vm863_vm0, %v12177_v17  ;;  %v767_v44 = vrot.slane %v765_v36, 1  ;;  %v775_v45 = vrot.slane %v773_v38, 1  ;;  %v1561_v47 = vrot.slane %v757_v34, 2  ;;  %v1560_v48 = vrot.slane %v761_v39, 1  ;;  %v10089_v11 = vld [vmem:[#allocation5 + $0x48] ss:$16 sps:$4 sm:$0xff]  }
 0x1dc   : > { %v755_v46 = vor.u32 %v754_v40, %v750_v32  ;;  %v1559_v51 = vor.u32 %v1558_v43, %v1557_v42  ;;  %v763_v55 = vor.u32 %v761_v39, %v759_v41  ;;  %v1564_v58 = vrot.slane %v769_v37, 1  ;;  %v10099_v18 = vld [vmem:[#allocation5 + $0xec] ss:$16 sps:$4 sm:$0xff]   ;;  %v10096_v19 = vld [vmem:[#allocation5 + $0x4] ss:$16 sps:$4 sm:$0xff]   ;;  %s8327_s3 = sshll.u32 %s706_s0, 4  ;;  %s13222_s3 = int_to_ptr.vmem [resolvable:$true] %s8327_s3 }
 0x1dd   : > { %v771_v49 = vor.u32 %v769_v37, %v767_v44  ;;  %v1562_v57 = vor.u32 %v1561_v47, %v1560_v48  ;;  %v1565_v62 = vrot.slane %v765_v36, 2  ;;  %v1569_v3 = vrot.slane %v773_v38, 2  ;;  %v10097_v20 = vld [vmem:[#allocation5 + $0xe8] ss:$16 sps:$4 sm:$0xff]   ;;  %v10105_v21 = vld [vmem:[#allocation5 + $0x10c] ss:$16 sps:$4 sm:$0xff]  }
 0x1de   : > { %883 = vmatpush1.bf16.msra.mxu0 %v865_v28  ;;  %9618 = vmatpush1.bf16.msra.mxu1 %v12196_v31  ;;  %v12211_v52 = vsel %vm748_vm1, %v755_v46, %v759_v41  ;;  %v12225_v63 = vsel %vm748_vm1, %v763_v55, %v767_v44  ;;  %v779_v5 = vor.u32 %v777_v56, %v775_v45  ;;  %v1853_v9 = vrot.slane %v12184_v24, 2  ;;  %v1264_v22 = vld [vmem:[#allocation5 + $0x148] sm:$0xff]  ;;  %v10094_v32 = vld [vmem:[#allocation5] ss:$16 sps:$4 sm:$0xff]   ;;  %v10102_v33 = vld [vmem:[#allocation5 + $0x24] ss:$16 sps:$4 sm:$0xff]  }
 0x1df   : > { %1179 = vmatprep.subr.bf16.mxu1 %v10085_v35  ;;  %947 = vmatprep.subr.bf16.mxu0 %v12159_v2  ;;  %v776_v54 = vsel %vm748_vm1, %v771_v49, %v775_v45  ;;  %v12222_v61 = vsel %vm1556_vm3, %v1559_v51, %v1562_v57  ;;  %v1568_v2 = vrot.slane %v777_v56, 1  ;;  %v1566_v7 = vor.u32 %v1565_v62, %v1564_v58  ;;  %v10109_v25 = vld [vmem:[#allocation5 + $0x128] ss:$16 sps:$4 sm:$0xff]   ;;  %v10100_v34 = vld [vmem:[#allocation5 + $0x20] ss:$16 sps:$4 sm:$0xff]   ;;  %s13387_s18 = sld [smem:[#allocation47_spill]] }
 0x1e0   : > { %v8600_v14 = vcombine.high %v732_v1, %v732_v1  ;;  %v8599_v15 = vcombine.low %v732_v1, %v732_v1  ;;  %v8626_v26 = vcombine.high %v1264_v22, %v1264_v22  ;;  %v8625_v27 = vcombine.low %v1264_v22, %v1264_v22  ;;  %v10108_v35 = vld [vmem:[#allocation5 + $0x44] ss:$16 sps:$4 sm:$0xff]   ;;  %v10106_v37 = vld [vmem:[#allocation5 + $0x40] ss:$16 sps:$4 sm:$0xff]   ;;  %v10122_v46 = vld [vmem:[#allocation5 + $0x158] ss:$16 sps:$4 sm:$0xff]  }
 0x1e1   : > { %8576 = vmatmul.mubr.msk.bf16.vlgmr.msra.gmra.mrb[0].mxu0 %vm850_vm2, %v12211_v52  ;;  %8583 = vmatmul.mubr.msk.bf16.vlgmr.msra.gmra.mrb[0].mxu1 %vm850_vm2, %v776_v54  ;;  %v12231_v13 = vor.u32 %v1569_v3, %v1568_v2  ;;  %v731_v36 = vld [vmem:[#allocation5 + $0x60] sm:$0xff]  ;;  %v1270_v42 = vrot.slane %v12182_v23, 1  ;;  %v1271_v43 = vrot.slane %v12184_v24, 1  ;;  %vm1269_vm5 = vcmask 1046528   ;;  %v10127_v48 = vld [vmem:[#allocation5 + $0x17c] ss:$16 sps:$4 sm:$0xff]  }
 0x1e2   : > { %918 = vmatprep.mubr.bf16.mxu0 %v13302_v0  ;;  %1180 = vmatpush1.bf16.msra.mxu1 %v10083_v50  ;;  %v1366_v28 = vsel %vm863_vm0, %v8625_v27, 0  ;;  %v8598_v38 = vcombine.high %v731_v36, %v731_v36  ;;  %v8597_v39 = vcombine.low %v731_v36, %v731_v36  ;;  %v10118_v40 = vld [vmem:[#allocation5 + $0xe4] ss:$16 sps:$4 sm:$0xff]   ;;  %v10116_v44 = vld [vmem:[#allocation5 + $0xe0] ss:$16 sps:$4 sm:$0xff]   ;;  %v1555_v55 = vld [vmem:[#allocation5 + $0x1b8] sm:$0xff] }
 0x1e3   : > { %948 = vmatpush1.bf16.msra.mxu0 %v12161_v4  ;;  %1181 = vmatprep.subr.bf16.mxu1 %v10088_v53  ;;  %v1852_v4 = vrot.slane %v12182_v23, 2  ;;  %v12241_v16 = vsel %vm1556_vm3, %v1566_v7, %v12231_v13  ;;  %v10121_v45 = vld [vmem:[#allocation5 + $0x104] ss:$16 sps:$4 sm:$0xff]   ;;  %v1272_v47 = vsel %vm1269_vm5, %v1270_v42, %v1271_v43  ;;  %v10119_v49 = vld [vmem:[#allocation5 + $0x100] ss:$16 sps:$4 sm:$0xff]   ;;  %v8651_v62 = vcombine.low %v1555_v55, %v1555_v55  ;;  %s8315_s4 = scalar_lea.sflag [#allocation4], %s12119_s29 }
 0x1e4   : > { %1009 = vmatprep.mubr.bf16.mxu1 %v13302_v0  ;;  %949 = vmatprep.subr.bf16.mxu0 %v12165_v6  ;;  %v12235_v6 = vsel %vm1556_vm3, %v1562_v57, %v1566_v7  ;;  %v1097_v41 = vsel %vm863_vm0, %v8597_v39, 0  ;;  %v10125_v50 = vld [vmem:[#allocation5 + $0x178] ss:$16 sps:$4 sm:$0xff]   ;;  %v10130_v51 = vld [vmem:[#allocation5 + $0x124] ss:$16 sps:$4 sm:$0xff]   ;;  %v12299_v1 = vrot.slane %v12192_v30, 1 }
 0x1e5   : > { %v10133_v53 = vld [vmem:[#allocation5 + $0x19c] ss:$16 sps:$4 sm:$0xff]   ;;  %v10128_v56 = vld [vmem:[#allocation5 + $0x120] ss:$16 sps:$4 sm:$0xff]   ;;  %v10153_v22 = vld [vmem:[#allocation5 + $0x208] ss:$16 sps:$4 sm:$0xff]   ;;  %s13388_s28 = smov %s13387_s18  ;;  %s13220_s5 = scalar_lea.hbm %s13387_s18, %s9337_s25 }
 0x1e6   : > { %1182 = vmatpush1.bf16.msra.mxu1 %v10086_v59  ;;  %v10146_v2 = vld [vmem:[#allocation5 + $0x1cc] ss:$16 sps:$4 sm:$0xff]   ;;  %v10163_v36 = vld [vmem:[#allocation5 + $0x1e0] ss:$16 sps:$4 sm:$0xff]   ;;  %vm2887_vm7 = vcmask 1041408   ;;  %vm2880_vm8 = vcmask 424960  }
 0x1e7   : > { %950 = vmatpush1.bf16.msra.mxu0 %v12167_v8  ;;  %1183 = vmatprep.subr.bf16.mxu1 %v10091_v60  ;;  %v12246_v8 = vsel %vm1851_vm4, %v1852_v4, %v1853_v9  ;;  %v8652_v60 = vcombine.high %v1555_v55, %v1555_v55  ;;  %v10138_v4 = vld [vmem:[#allocation5 + $0x150] ss:$16 sps:$4 sm:$0xff]   ;;  %vm6181_vm9 = vcmask 1042432   ;;  %vm6177_vm10 = vcmask 179200   ;;  %s11455_s6 = scalar_lea.vmem %s13222_s3, 16  ;;  %p13389_p9 = scmp.ne.s32.totalorder %s13348_s30, 0 }
 0x1e8   : > { %951 = vmatprep.subr.bf16.mxu0 %v12170_v10  ;;  %v1103_v10 = vsel %vm863_vm0, %v8599_v15, 0  ;;  %v10149_v15 = vld [vmem:[#allocation5 + $0x1ec] ss:$16 sps:$4 sm:$0xff]   ;;  %v1849_v39 = vld [vmem:[#allocation5 + $0x220] sm:$0xff]  ;;  %vm11575_vm11 = vmmov 0   ;;  %p11456_p7 = scmp.ne.s32.totalorder %s13222_s3, %s11455_s6  ;;  %s11576_s19 = smov [#allocation26]  }
 0x1e9   : > { %8577 = vmatmul.mubr.msk.bf16.gmra.mrb[4].mxu0 %vm850_vm2, %v12225_v63  ;;  %8584 = vmatmul.mubr.msk.bf16.gmra.mrb[4].mxu1 %vm850_vm2, %v779_v5  ;;  %v8675_v42 = vcombine.low %v1849_v39, %v1849_v39  ;;  %s11459_s15 = sshll.u32 %s11576_s19, 4  ;;  %s11460_s15 = int_to_ptr.vmem [resolvable:$false] %s11459_s15 }
 0x1ea   : > { %928 = vmatprep.mubr.bf16.mxu0 %v13302_v0  ;;  %1184 = vmatpush1.bf16.msra.mxu1 %v10089_v11  ;;  %v10143_v11 = vld [vmem:[#allocation5 + $0x174] ss:$16 sps:$4 sm:$0xff]   ;;  %p11457_p4 = pnand %p11456_p7, %p13389_p9  ;;  %s11461_s24 = scalar_lea.vmem %s11460_s15, 32 }
 0x1eb   : > { %1211 = vmatprep.mubr.bf16.mxu1 %v13302_v0  ;;  %8606 = vmatprep.subr.msk.bf16.mxu1 %vm863_vm0, %v8600_v14  ;;  %v10144_v14 = vld [vmem:[#allocation5 + $0x1c8] ss:$16 sps:$4 sm:$0xff]   ;;  %p11462_p6 = scmp.lt.s32.totalorder %s13222_s3, %s11460_s15  ;;  %p11463_p2 = scmp.lt.s32.totalorder %s11461_s24, %s11455_s6 }
 0x1ec   : > { %952 = vmatpush1.bf16.msra.mxu0 %v12172_v12  ;;  %v10103_v12 = vld [vmem:[#allocation5 + $0x108] ss:$16 sps:$4 sm:$0xff]   ;;  %p11458_p3 = pneg %p11457_p4 }
 0x1ed   : > { %8580 = vmatprep.subr.msk.bf16.mxu0 %vm863_vm0, %v12177_v17  ;;  %v10111_v17 = vld [vmem:[#allocation5 + $0x12c] ss:$16 sps:$4 sm:$0xff]   ;;  %p11464_p0 = por %p11463_p2, %p11462_p6 }
 0x1ee   : > { %1186 = vmatpush1.bf16.msra.mxu1 %v1103_v10  ;;  %v10141_v10 = vld [vmem:[#allocation5 + $0x170] ss:$16 sps:$4 sm:$0xff]  }
 0x1ef   : > { %1442 = vmatprep.subr.bf16.mxu1 %v10099_v18  ;;  %v10147_v18 = vld [vmem:[#allocation5 + $0x1e8] ss:$16 sps:$4 sm:$0xff]   ;;  %p11465_p5 = pnand %p11464_p0, %p11458_p3 }
 0x1f0   : > { %954 = vmatpush1.bf16.msra.mxu0 %v12196_v31  ;;  %v10124_v31 = vld [vmem:[#allocation5 + $0x15c] ss:$16 sps:$4 sm:$0xff]  }
 0x1f1   : > { %8578 = vmatmul.mubr.msk.bf16.gmra.mrb[8].mxu0 %vm850_vm2, %v776_v54  ;;  %1108 = vmatprep.subr.bf16.mxu0 %v10096_v19  ;;  %v1263_v54 = vld [vmem:[#allocation5 + $0x140] sm:$0xff] }
 0x1f2   : > { %8607 = vmatmul.mubr.msk.bf16.vlgmr.msra.gmra.mrb[8].mxu1 %vm850_vm2, %v12182_v23  ;;  %938 = vmatprep.mubr.bf16.mxu0 %v13302_v0  ;;  %v8624_v58 = vcombine.high %v1263_v54, %v1263_v54  ;;  %v8623_v59 = vcombine.low %v1263_v54, %v1263_v54  ;;  %v10152_v19 = vld [vmem:[#allocation5 + $0x194] ss:$16 sps:$4 sm:$0xff]  }
 0x1f3   : > { %1221 = vmatprep.mubr.bf16.mxu1 %v13302_v0  ;;  %1443 = vmatpush1.bf16.msra.mxu1 %v10097_v20  ;;  %v10155_v20 = vld [vmem:[#allocation5 + $0x20c] ss:$16 sps:$4 sm:$0xff]  }
 0x1f4   : > { %1444 = vmatprep.subr.bf16.mxu1 %v10105_v21  ;;  %v1360_v3 = vsel %vm863_vm0, %v8623_v59, 0  ;;  %v1554_v21 = vld [vmem:[#allocation5 + $0x1b0] sm:$0xff] }
 0x1f5   : > { %v10171_v59 = vld [vmem:[#allocation8] ss:$8 sps:$4 sm:$0xff]  }
 0x1f7   : > { %1445 = vmatpush1.bf16.msra.mxu1 %v10103_v12  ;;  %v1850_v12 = vld [vmem:[#allocation5 + $0x228] sm:$0xff] }
 0x1f8   : > { %1446 = vmatprep.subr.bf16.mxu1 %v10111_v17  ;;  %v10150_v17 = vld [vmem:[#allocation5 + $0x190] ss:$16 sps:$4 sm:$0xff]   ;;  %v8678_v27 = vcombine.high %v1850_v12, %v1850_v12 }
 0x1f9   : > { %8579 = vmatmul.mubr.msk.bf16.gmra.mrb[12].mxu0 %vm850_vm2, %v779_v5  ;;  %v1661_v5 = vsel %vm863_vm0, %v8651_v62, 0  ;;  %v10176_v62 = vld [vmem:[#allocation8 + $0x14] ss:$8 sps:$4 sm:$0xff]  }
 0x1fa   : > { %8608 = vmatmul.mubr.msk.bf16.gmra.mrb[12].mxu1 %vm850_vm2, %v12184_v24  ;;  %979 = vmatprep.mubr.bf16.mxu0 %v13302_v0 }
 0x1fb   : > { %1231 = vmatprep.mubr.bf16.mxu1 %v13302_v0  ;;  %1447 = vmatpush1.bf16.msra.mxu1 %v10109_v25  ;;  %v8650_v25 = vcombine.high %v1554_v21, %v1554_v21 }
 0x1fc   : > { %8632 = vmatprep.subr.msk.bf16.mxu1 %vm863_vm0, %v8626_v26  ;;  %v8649_v26 = vcombine.low %v1554_v21, %v1554_v21 }
 0x1ff   : > { %1449 = vmatpush1.bf16.msra.mxu1 %v1366_v28  ;;  %v8677_v28 = vcombine.low %v1850_v12, %v1850_v12 }
 0x200   : > { %1737 = vmatprep.subr.bf16.mxu1 %v10124_v31  ;;  %v10162_v31 = vld [vmem:[#allocation5 + $0x1c4] ss:$16 sps:$4 sm:$0xff]  }
 0x201   : > { %8581 = vmatmul.mubr.msk.bf16.vlgmr.msra.gmra.mrb[16].mxu0 %vm850_vm2, %v12211_v52  ;;  %v1273_v52 = vrot.slane %v12190_v29, 1 }
 0x202   : > { %8609 = vmatmul.mubr.msk.bf16.gmra.mrb[0].mxu1 %vm850_vm2, %v12190_v29  ;;  %1109 = vmatpush1.bf16.msra.mxu0 %v10094_v32  ;;  %v1655_v32 = vsel %vm863_vm0, %v8649_v26, 0  ;;  %v10186_v26 = vld [vmem:[#allocation8 + $0x50] ss:$8 sps:$4 sm:$0xff]  }
 0x203   : > { %1110 = vmatprep.subr.bf16.mxu0 %v10102_v33  ;;  %989 = vmatprep.mubr.bf16.mxu0 %v13302_v0  ;;  %v1274_v57 = vsel %vm1269_vm5, %v1271_v43, %v1273_v52  ;;  %v1276_v7 = vsel %vm1269_vm5, %v1273_v52, %v12299_v1  ;;  %v1948_v33 = vsel %vm863_vm0, %v8677_v28, 0  ;;  %v10191_v28 = vld [vmem:[#allocation8 + $0x64] ss:$8 sps:$4 sm:$0xff]  }
 0x204   : > { %1241 = vmatprep.mubr.bf16.mxu1 %v13302_v0 }
 0x206   : > { %1111 = vmatpush1.bf16.msra.mxu0 %v10100_v34  ;;  %v10160_v34 = vld [vmem:[#allocation5 + $0x1c0] ss:$16 sps:$4 sm:$0xff]  }
 0x207   : > { %1112 = vmatprep.subr.bf16.mxu0 %v10108_v35  ;;  %v10165_v35 = vld [vmem:[#allocation5 + $0x1e4] ss:$16 sps:$4 sm:$0xff]  }
 0x209   : > { %8582 = vmatmul.mubr.msk.bf16.gmra.mrb[20].mxu0 %vm850_vm2, %v12225_v63  ;;  %v10140_v63 = vld [vmem:[#allocation5 + $0x154] ss:$16 sps:$4 sm:$0xff]  }
 0x20a   : > { %8610 = vmatmul.mubr.msk.bf16.gmra.mrb[16].mxu1 %vm850_vm2, %v12192_v30  ;;  %1113 = vmatpush1.bf16.msra.mxu0 %v10106_v37  ;;  %v10168_v37 = vld [vmem:[#allocation5 + $0x204] ss:$16 sps:$4 sm:$0xff]  }
 0x20b   : > { %8601 = vmatprep.subr.msk.bf16.mxu0 %vm863_vm0, %v8598_v38  ;;  %1140 = vmatprep.mubr.bf16.mxu0 %v13302_v0  ;;  %v1855_v38 = vrot.slane %v12190_v29, 2 }
 0x20c   : > { %1474 = vmatprep.mubr.bf16.mxu1 %v13302_v0 }
 0x20e   : > { %1115 = vmatpush1.bf16.msra.mxu0 %v1097_v41  ;;  %v1856_v41 = vsel %vm1851_vm4, %v1853_v9, %v1855_v38 }
 0x20f   : > { %1371 = vmatprep.subr.bf16.mxu0 %v10118_v40  ;;  %v10166_v40 = vld [vmem:[#allocation5 + $0x200] ss:$16 sps:$4 sm:$0xff]  }
 0x211   : > { %8602 = vmatmul.mubr.msk.bf16.vlgmr.msra.gmra.mrb[0].mxu0 %vm850_vm2, %v12182_v23  ;;  %v10131_v23 = vld [vmem:[#allocation5 + $0x198] ss:$16 sps:$4 sm:$0xff]  }
 0x212   : > { %8633 = vmatmul.mubr.msk.bf16.vlgmr.msra.gmra.mrb[8].mxu1 %vm850_vm2, %v1272_v47  ;;  %1150 = vmatprep.mubr.bf16.mxu0 %v13302_v0 }
 0x213   : > { %1372 = vmatpush1.bf16.msra.mxu0 %v10116_v44  ;;  %1484 = vmatprep.mubr.bf16.mxu1 %v13302_v0 }
 0x214   : > { %1373 = vmatprep.subr.bf16.mxu0 %v10121_v45  ;;  %1738 = vmatpush1.bf16.msra.mxu1 %v10122_v46 }
 0x215   : > { %1739 = vmatprep.subr.bf16.mxu1 %v10127_v48 }
 0x217   : > { %1374 = vmatpush1.bf16.msra.mxu0 %v10119_v49 }
 0x218   : > { %1740 = vmatpush1.bf16.msra.mxu1 %v10125_v50  ;;  %1375 = vmatprep.subr.bf16.mxu0 %v10130_v51 }
 0x219   : > { %8603 = vmatmul.mubr.msk.bf16.gmra.mrb[4].mxu0 %vm850_vm2, %v12184_v24  ;;  %1741 = vmatprep.subr.bf16.mxu1 %v10133_v53  ;;  %v1942_v24 = vsel %vm863_vm0, %v8675_v42, 0  ;;  %v10207_v42 = vld [vmem:[#allocation8 + $0xc0] ss:$8 sps:$4 sm:$0xff]  }
 0x21a   : > { %8634 = vmatmul.mubr.msk.bf16.gmra.mrb[12].mxu1 %vm850_vm2, %v1274_v57  ;;  %1160 = vmatprep.mubr.bf16.mxu0 %v13302_v0 }
 0x21b   : > { %1494 = vmatprep.mubr.bf16.mxu1 %v13302_v0  ;;  %1376 = vmatpush1.bf16.msra.mxu0 %v10128_v56 }
 0x21c   : > { %1742 = vmatpush1.bf16.msra.mxu1 %v10131_v23  ;;  %8627 = vmatprep.subr.msk.bf16.mxu0 %vm863_vm0, %v8624_v58 }
 0x21d   : > { %8658 = vmatprep.subr.msk.bf16.mxu1 %vm863_vm0, %v8652_v60  ;;  %v10173_v60 = vld [vmem:[#allocation8 + $0x4] ss:$8 sps:$4 sm:$0xff]  }
 0x21f   : > { %1378 = vmatpush1.bf16.msra.mxu0 %v1360_v3  ;;  %v10182_v3 = vld [vmem:[#allocation8 + $0x34] ss:$8 sps:$4 sm:$0xff]  }
 0x220   : > { %1744 = vmatpush1.bf16.msra.mxu1 %v1661_v5  ;;  %1666 = vmatprep.subr.bf16.mxu0 %v10140_v63  ;;  %v10174_v63 = vld [vmem:[#allocation8 + $0x10] ss:$8 sps:$4 sm:$0xff]  }
 0x221   : > { %8604 = vmatmul.mubr.msk.bf16.gmra.mrb[8].mxu0 %vm850_vm2, %v12190_v29  ;;  %2024 = vmatprep.subr.bf16.mxu1 %v10146_v2  ;;  %v1857_v29 = vrot.slane %v12192_v30, 2  ;;  %v10177_v2 = vld [vmem:[#allocation8 + $0x20] ss:$8 sps:$4 sm:$0xff]   ;;  %v10180_v5 = vld [vmem:[#allocation8 + $0x30] ss:$8 sps:$4 sm:$0xff]  }
 0x222   : > { %8635 = vmatmul.mubr.msk.bf16.gmra.mrb[0].mxu1 %vm850_vm2, %v1276_v7  ;;  %1170 = vmatprep.mubr.bf16.mxu0 %v13302_v0 }
 0x223   : > { %1504 = vmatprep.mubr.bf16.mxu1 %v13302_v0  ;;  %v1858_v9 = vsel %vm1851_vm4, %v1855_v38, %v1857_v29  ;;  %v10203_v38 = vld [vmem:[#allocation8 + $0xa4] ss:$8 sps:$4 sm:$0xff]  }
 0x229   : > { %8605 = vmatmul.mubr.msk.bf16.gmra.mrb[24].mxu0 %vm850_vm2, %v12192_v30 }
 0x22a   : > { %8636 = vmatmul.mubr.msk.bf16.gmra.mrb[20].mxu1 %vm850_vm2, %v12299_v1  ;;  %1403 = vmatprep.mubr.bf16.mxu0 %v13302_v0 }
 0x22b   : > { %1769 = vmatprep.mubr.bf16.mxu1 %v13302_v0 }
 0x231   : > { %8628 = vmatmul.mubr.msk.bf16.vlgmr.msra.gmra.mrb[0].mxu0 %vm850_vm2, %v1272_v47 }
 0x232   : > { %8659 = vmatmul.mubr.msk.bf16.vlgmr.msra.gmra.mrb[8].mxu1 %vm850_vm2, %v12222_v61  ;;  %1413 = vmatprep.mubr.bf16.mxu0 %v13302_v0 }
 0x233   : > { %1667 = vmatpush1.bf16.msra.mxu0 %v10138_v4  ;;  %1779 = vmatprep.mubr.bf16.mxu1 %v13302_v0  ;;  %v10183_v4 = vld [vmem:[#allocation8 + $0x40] ss:$8 sps:$4 sm:$0xff]  }
 0x234   : > { %1668 = vmatprep.subr.bf16.mxu0 %v10143_v11  ;;  %2025 = vmatpush1.bf16.msra.mxu1 %v10144_v14  ;;  %v10188_v14 = vld [vmem:[#allocation8 + $0x54] ss:$8 sps:$4 sm:$0xff]  }
 0x235   : > { %2026 = vmatprep.subr.bf16.mxu1 %v10149_v15 }
 0x237   : > { %1669 = vmatpush1.bf16.msra.mxu0 %v10141_v10 }
 0x238   : > { %2027 = vmatpush1.bf16.msra.mxu1 %v10147_v18  ;;  %1670 = vmatprep.subr.bf16.mxu0 %v10152_v19 }
 0x239   : > { %8629 = vmatmul.mubr.msk.bf16.gmra.mrb[4].mxu0 %vm850_vm2, %v1274_v57  ;;  %2028 = vmatprep.subr.bf16.mxu1 %v10155_v20 }
 0x23a   : > { %8660 = vmatmul.mubr.msk.bf16.gmra.mrb[12].mxu1 %vm850_vm2, %v12235_v6  ;;  %1423 = vmatprep.mubr.bf16.mxu0 %v13302_v0 }
 0x23b   : > { %1789 = vmatprep.mubr.bf16.mxu1 %v13302_v0  ;;  %1671 = vmatpush1.bf16.msra.mxu0 %v10150_v17 }
 0x23c   : > { %2029 = vmatpush1.bf16.msra.mxu1 %v10153_v22  ;;  %8653 = vmatprep.subr.msk.bf16.mxu0 %vm863_vm0, %v8650_v25 }
 0x23d   : > { %8684 = vmatprep.subr.msk.bf16.mxu1 %vm863_vm0, %v8678_v27 }
 0x23f   : > { %1673 = vmatpush1.bf16.msra.mxu0 %v1655_v32  ;;  %v10194_v32 = vld [vmem:[#allocation8 + $0x74] ss:$8 sps:$4 sm:$0xff]  }
 0x240   : > { %2031 = vmatpush1.bf16.msra.mxu1 %v1948_v33  ;;  %1953 = vmatprep.subr.bf16.mxu0 %v10162_v31  ;;  %v10189_v31 = vld [vmem:[#allocation8 + $0x60] ss:$8 sps:$4 sm:$0xff]   ;;  %v10192_v33 = vld [vmem:[#allocation8 + $0x70] ss:$8 sps:$4 sm:$0xff]  }
 0x241   : > { %8630 = vmatmul.mubr.msk.bf16.gmra.mrb[8].mxu0 %vm850_vm2, %v1276_v7  ;;  %v10185_v7 = vld [vmem:[#allocation8 + $0x44] ss:$8 sps:$4 sm:$0xff]  }
 0x242   : > { %8661 = vmatmul.mubr.msk.bf16.gmra.mrb[0].mxu1 %vm850_vm2, %v12241_v16  ;;  %1433 = vmatprep.mubr.bf16.mxu0 %v13302_v0 }
 0x243   : > { %1799 = vmatprep.mubr.bf16.mxu1 %v13302_v0 }
 0x249   : > { %8631 = vmatmul.mubr.msk.bf16.gmra.mrb[28].mxu0 %vm850_vm2, %v12299_v1  ;;  %v10179_v1 = vld [vmem:[#allocation8 + $0x24] ss:$8 sps:$4 sm:$0xff]  }
 0x24a   : > { %8662 = vmatmul.mubr.msk.bf16.gmra.mrb[24].mxu1 %vm850_vm2, %v12231_v13  ;;  %1698 = vmatprep.mubr.bf16.mxu0 %v13302_v0 }
 0x24b   : > { %2056 = vmatprep.mubr.bf16.mxu1 %v13302_v0 }
 0x251   : > { %8654 = vmatmul.mubr.msk.bf16.vlgmr.msra.gmra.mrb[0].mxu0 %vm850_vm2, %v12222_v61  ;;  %v8676_v61 = vcombine.high %v1849_v39, %v1849_v39  ;;  %v10201_v39 = vld [vmem:[#allocation8 + $0xa0] ss:$8 sps:$4 sm:$0xff]  }
 0x252   : > { %8685 = vmatmul.mubr.msk.bf16.vlgmr.msra.gmra.mrb[8].mxu1 %vm850_vm2, %v12246_v8  ;;  %1708 = vmatprep.mubr.bf16.mxu0 %v13302_v0 }
 0x253   : > { %1954 = vmatpush1.bf16.msra.mxu0 %v10160_v34  ;;  %2066 = vmatprep.mubr.bf16.mxu1 %v13302_v0  ;;  %v10197_v34 = vld [vmem:[#allocation8 + $0x84] ss:$8 sps:$4 sm:$0xff]  }
 0x254   : > { %1955 = vmatprep.subr.bf16.mxu0 %v10165_v35  ;;  %v10195_v35 = vld [vmem:[#allocation8 + $0x80] ss:$8 sps:$4 sm:$0xff]  }
 0x257   : > { %1956 = vmatpush1.bf16.msra.mxu0 %v10163_v36  ;;  %v10200_v36 = vld [vmem:[#allocation8 + $0x94] ss:$8 sps:$4 sm:$0xff]  }
 0x258   : > { %1957 = vmatprep.subr.bf16.mxu0 %v10168_v37  ;;  %v10198_v37 = vld [vmem:[#allocation8 + $0x90] ss:$8 sps:$4 sm:$0xff]  }
 0x259   : > { %8655 = vmatmul.mubr.msk.bf16.gmra.mrb[4].mxu0 %vm850_vm2, %v12235_v6 }
 0x25a   : > { %8686 = vmatmul.mubr.msk.bf16.gmra.mrb[12].mxu1 %vm850_vm2, %v1856_v41  ;;  %1718 = vmatprep.mubr.bf16.mxu0 %v13302_v0 }
 0x25b   : > { %2076 = vmatprep.mubr.bf16.mxu1 %v13302_v0  ;;  %1958 = vmatpush1.bf16.msra.mxu0 %v10166_v40  ;;  %v10206_v40 = vld [vmem:[#allocation8 + $0xb4] ss:$8 sps:$4 sm:$0xff]  }
 0x25c   : > { %8679 = vmatprep.subr.msk.bf16.mxu0 %vm863_vm0, %v8676_v61  ;;  %v10209_v61 = vld [vmem:[#allocation8 + $0xc4] ss:$8 sps:$4 sm:$0xff]  }
 0x25f   : > { %1960 = vmatpush1.bf16.msra.mxu0 %v1942_v24 }
 0x260   : > { %2716 = vmatprep.subr.bf16.mxu0 %v10173_v60 }
 0x261   : > { %8656 = vmatmul.mubr.msk.bf16.gmra.mrb[8].mxu0 %vm850_vm2, %v12241_v16 }
 0x262   : > { %8687 = vmatmul.mubr.msk.bf16.gmra.mrb[0].mxu1 %vm850_vm2, %v1858_v9  ;;  %1728 = vmatprep.mubr.bf16.mxu0 %v13302_v0 }
 0x263   : > { %2086 = vmatprep.mubr.bf16.mxu1 %v13302_v0 }
 0x269   : > { %8657 = vmatmul.mubr.msk.bf16.gmra.mrb[32].mxu0 %vm850_vm2, %v12231_v13 }
 0x26a   : > { %8688 = vmatmul.mubr.msk.bf16.gmra.mrb[28].mxu1 %vm850_vm2, %v1857_v29  ;;  %1985 = vmatprep.mubr.bf16.mxu0 %v13302_v0 }
 0x26b   : > { %2926 = vmatprep.mubr.bf16.mxu1 %v13302_v0 }
 0x271   : > { %8680 = vmatmul.mubr.msk.bf16.vlgmr.msra.gmra.mrb[0].mxu0 %vm850_vm2, %v12246_v8 }
 0x272   : > { %1995 = vmatprep.mubr.bf16.mxu0 %v13302_v0  ;;  %2717 = vmatpush1.bf16.msra.mxu0 %v10171_v59 }
 0x273   : > { %2718 = vmatprep.subr.bf16.mxu0 %v10176_v62 }
 0x276   : > { %2719 = vmatpush1.bf16.msra.mxu0 %v10174_v63 }
 0x277   : > { %2720 = vmatprep.subr.bf16.mxu0 %v10179_v1 }
 0x279   : > { %8681 = vmatmul.mubr.msk.bf16.gmra.mrb[4].mxu0 %vm850_vm2, %v1856_v41  ;;  %v10204_v41 = vld [vmem:[#allocation8 + $0xb0] ss:$8 sps:$4 sm:$0xff]  }
 0x27a   : > { %2005 = vmatprep.mubr.bf16.mxu0 %v13302_v0  ;;  %2721 = vmatpush1.bf16.msra.mxu0 %v10177_v2 }
 0x27b   : > { %2722 = vmatprep.subr.bf16.mxu0 %v10182_v3 }
 0x27e   : > { %2723 = vmatpush1.bf16.msra.mxu0 %v10180_v5 }
 0x27f   : > { %2724 = vmatprep.subr.bf16.mxu0 %v10185_v7 }
 0x281   : > { %8682 = vmatmul.mubr.msk.bf16.gmra.mrb[8].mxu0 %vm850_vm2, %v1858_v9 }
 0x282   : > { %2015 = vmatprep.mubr.bf16.mxu0 %v13302_v0  ;;  %2725 = vmatpush1.bf16.msra.mxu0 %v10183_v4 }
 0x283   : > { %2726 = vmatprep.subr.bf16.mxu0 %v10188_v14 }
 0x286   : > { %2727 = vmatpush1.bf16.msra.mxu0 %v10186_v26  ;;  %v10212_v26 = vld [vmem:[#allocation8 + $0xd4] ss:$8 sps:$4 sm:$0xff]  }
 0x287   : > { %2728 = vmatprep.subr.bf16.mxu0 %v10191_v28 }
 0x289   : > { %8683 = vmatmul.mubr.msk.bf16.gmra.mrb[36].mxu0 %vm850_vm2, %v1857_v29 }
 0x28a   : > { %2729 = vmatpush1.bf16.msra.mxu0 %v10189_v31  ;;  %v10210_v31 = vld [vmem:[#allocation8 + $0xd0] ss:$8 sps:$4 sm:$0xff]  }
 0x28b   : > { %2730 = vmatprep.subr.bf16.mxu0 %v10194_v32 }
 0x28e   : > { %2731 = vmatpush1.bf16.msra.mxu0 %v10192_v33 }
 0x28f   : > { %2732 = vmatprep.subr.bf16.mxu0 %v10197_v34 }
 0x292   : > { %2733 = vmatpush1.bf16.msra.mxu0 %v10195_v35  ;;  %v10215_v35 = vld [vmem:[#allocation8 + $0xe4] ss:$8 sps:$4 sm:$0xff]  }
 0x293   : > { %2734 = vmatprep.subr.bf16.mxu0 %v10200_v36 }
 0x296   : > { %2735 = vmatpush1.bf16.msra.mxu0 %v10198_v37  ;;  %v10213_v37 = vld [vmem:[#allocation8 + $0xe0] ss:$8 sps:$4 sm:$0xff]  }
 0x297   : > { %2736 = vmatprep.subr.bf16.mxu0 %v10203_v38 }
 0x29a   : > { %2737 = vmatpush1.bf16.msra.mxu0 %v10201_v39 }
 0x29b   : > { %2738 = vmatprep.subr.bf16.mxu0 %v10206_v40 }
 0x29e   : > { %2739 = vmatpush1.bf16.msra.mxu0 %v10204_v41 }
 0x29f   : > { %2740 = vmatprep.subr.bf16.mxu0 %v10209_v61 }
 0x2a2   : > { %2741 = vmatpush1.bf16.msra.mxu0 %v10207_v42 }
 0x2a3   : > { %2742 = vmatprep.subr.bf16.mxu0 %v10212_v26 }
 0x2a6   : > { %2743 = vmatpush1.bf16.msra.mxu0 %v10210_v31 }
 0x2a7   : > { %2744 = vmatprep.subr.bf16.mxu0 %v10215_v35 }
 0x2aa   : > { %2745 = vmatpush1.bf16.msra.mxu0 %v10213_v37 }
 0x2bc   : > { %v1011_v30 = vpop.f32.mrb[4].mxu1 }
 0x2bd   : > { %v1013_v13 = vpop.f32.mrb[5].mxu1 }
 0x2be   : > { %v1015_v6 = vpop.f32.mrb[6].mxu1 }
 0x2bf   : > { %v1016_v16 = vpop.f32.mrb[7].mxu1 }
 0x2cc   : > { %v940_v43 = vpop.f32.mrb[12].mxu0 }
 0x2cd   : > { %v942_v44 = vpop.f32.mrb[13].mxu0 }
 0x2ce   : > { %v944_v45 = vpop.f32.mrb[14].mxu0 }
 0x2cf   : > { %v945_v8 = vpop.f32.mrb[15].mxu0 }
 0x2d4   : > { %v12380_v46 = vpop.f32.mrb[16].mxu0 }
 0x2d5   : > { %v12382_v47 = vpop.f32.mrb[17].mxu0 }
 0x2d6   : > { %v12384_v48 = vpop.f32.mrb[18].mxu0 }
 0x2d7   : > { %v12386_v49 = vpop.f32.mrb[19].mxu0 }
 0x2dc   : > { %v12388_v50 = vpop.f32.mrb[20].mxu0 }
 0x2dd   : > { %v12390_v51 = vpop.f32.mrb[21].mxu0  ;;  %v1243_v52 = vpop.f32.mrb[16].mxu1 }
 0x2de   : > { %v12392_v53 = vpop.f32.mrb[22].mxu0  ;;  %v1244_v54 = vadd.f32 %v1243_v52, %v1011_v30  ;;  %v1245_v55 = vpop.f32.mrb[17].mxu1 }
 0x2df   : > { %v12394_v56 = vpop.f32.mrb[23].mxu0  ;;  %v1246_v23 = vadd.f32 %v1245_v55, %v1013_v13  ;;  %v1247_v57 = vpop.f32.mrb[18].mxu1 }
 0x2e0   : > { %v1248_v58 = vpop.f32.mrb[19].mxu1 }
 0x2fc   : > { %v1172_v11 = vpop.f32.mrb[24].mxu0 }
 0x2fd   : > { %v1173_v15 = vadd.f32 %v1172_v11, %v940_v43  ;;  %v1506_v10 = vpop.f32.mrb[20].mxu1  ;;  %v1174_v18 = vpop.f32.mrb[25].mxu0 }
 0x2fe   : > { %v1539_v19 = vadd.f32 %v1506_v10, %v1244_v54  ;;  %v1175_v20 = vadd.f32 %v1174_v18, %v942_v44  ;;  %v1508_v21 = vpop.f32.mrb[21].mxu1  ;;  %v1176_v12 = vpop.f32.mrb[26].mxu0 }
 0x2ff   : > { %v1540_v17 = vadd.f32 %v1508_v21, %v1246_v23  ;;  %v1177_v22 = vpop.f32.mrb[27].mxu0  ;;  %v1510_v25 = vpop.f32.mrb[22].mxu1 }
 0x300   : > { %v1511_v27 = vpop.f32.mrb[23].mxu1 }
 0x301   : > { %v12435_v27 = vld [vmem:[#allocation7] sm:$0xf] }
 0x31c   : > { %v1435_v29 = vpop.f32.mrb[28].mxu0 }
 0x31d   : > { %v1537_v24 = vadd.f32 %v1435_v29, %v1173_v15  ;;  %v1801_v9 = vpop.f32.mrb[24].mxu1  ;;  %v1437_v30 = vpop.f32.mrb[29].mxu0 }
 0x31e   : > { %v1834_v13 = vadd.f32 %v1801_v9, %v1539_v19  ;;  %v1538_v6 = vadd.f32 %v1437_v30, %v1175_v20  ;;  %v1803_v16 = vpop.f32.mrb[25].mxu1  ;;  %v1439_v43 = vpop.f32.mrb[30].mxu0  ;;  %v10218_v9 = vld [vmem:[#allocation8 + $0xf4] ss:$8 sps:$4 sm:$0xff]  }
 0x31f   : > { %v1835_v44 = vadd.f32 %v1803_v16, %v1540_v17  ;;  %v1440_v45 = vpop.f32.mrb[31].mxu0  ;;  %v1805_v8 = vpop.f32.mrb[26].mxu1  ;;  %2746 = vmatprep.subr.bf16.mxu0 %v10218_v9 }
 0x320   : > { %v1806_v52 = vpop.f32.mrb[27].mxu1 }
 0x321   : > { %v10221_v52 = vld [vmem:[#allocation8 + $0x104] ss:$8 sps:$4 sm:$0xff]  }
 0x325   : > { %v2058_v54 = vpop.f32.mrb[8].mxu1 }
 0x326   : > { %v9619_v55 = vadd.f32 %v2058_v54, %v12380_v46  ;;  %v2060_v23 = vpop.f32.mrb[9].mxu1 }
 0x327   : > { %v12398_v57 = vadd.f32 %v2060_v23, %v12382_v47  ;;  %v2062_v58 = vpop.f32.mrb[10].mxu1 }
 0x328   : > { %v9621_v59 = vadd.f32 %v2062_v58, %v12384_v48  ;;  %v2064_v60 = vpop.f32.mrb[11].mxu1 }
 0x329   : > { %v12402_v62 = vadd.f32 %v2064_v60, %v12386_v49  ;;  %v2125_v49 = vlaneseq }
 0x32b   : > { %v12423_v14 = vshrl.u32 %v2125_v49, 7 }
 0x32d   : > { %v2068_v63 = vpop.f32.mrb[12].mxu1  ;;  %v13300_v12 = vsub.s32 1, %v12423_v14  ;;  %v13298_v33 = vsub.s32 2, %v12423_v14 }
 0x32e   : > { %v12405_v1 = vadd.f32 %v2068_v63, %v12388_v50  ;;  %v2070_v2 = vpop.f32.mrb[13].mxu1 }
 0x32f   : > { %v12408_v3 = vadd.f32 %v2070_v2, %v12390_v51  ;;  %v2072_v46 = vpop.f32.mrb[14].mxu1  ;;  %v12446_v34 = vrot.slane %v12435_v27, %v13300_v12  ;;  %v12454_v40 = vrot.slane %v12435_v27, %v13298_v33 }
 0x330   : > { %v9625_v5 = vadd.f32 %v2072_v46, %v12392_v53  ;;  %v2074_v47 = vpop.f32.mrb[15].mxu1 }
 0x331   : > { %v12412_v7 = vadd.f32 %v2074_v47, %v12394_v56  ;;  %v13299_v56 = vsub.s32 0, %v12423_v14  ;;  %v12463_v30 = vadd.f32 %v9621_v59, %v12454_v40  ;;  %v12471_v43 = vadd.f32 %v9619_v55, %v12454_v40 }
 0x332   : > { %v12481_v23 = vadd.f32 %v9625_v5, %v12454_v40  ;;  %v12491_v63 = vadd.f32 %v12405_v1, %v12454_v40 }
 0x333   : > { %v12440_v32 = vrot.slane %v12435_v27, %v13299_v56  ;;  %v2179_v54 = vmax.f32 %v12463_v30, 0.0  ;;  %v2175_v60 = vmax.f32 %v12471_v43, 0.0 }
 0x334   : > { %v13312_v47 = vmax.f32 %v12481_v23, 0.0 }
 0x335   : > { %v12414_v48 = vpop.f32.mrb[0].mxu1  ;;  %v9976_v1 = vpack.i.bf16 %v2179_v54, %v2175_v60 }
 0x336   : > { %v12416_v4 = vpop.f32.mrb[1].mxu1  ;;  %v12530_v37 = vadd.f32 %v12454_v40, %v12414_v48 }
 0x337   : > { %v12418_v11 = vpop.f32.mrb[2].mxu1 }
 0x338   : > { %v12420_v50 = vpop.f32.mrb[3].mxu1 }
 0x33c   : > { %v1730_v51 = vpop.f32.mrb[32].mxu0 }
 0x33d   : > { %v12425_v15 = vadd.f32 %v1730_v51, %v1537_v24  ;;  %v2088_v53 = vpop.f32.mrb[28].mxu1  ;;  %v1732_v10 = vpop.f32.mrb[33].mxu0  ;;  %v10216_v24 = vld [vmem:[#allocation8 + $0xf0] ss:$8 sps:$4 sm:$0xff]  }
 0x33e   : > { %v12428_v18 = vadd.f32 %v2088_v53, %v1834_v13  ;;  %v12430_v19 = vadd.f32 %v1732_v10, %v1538_v6  ;;  %v2090_v20 = vpop.f32.mrb[29].mxu1  ;;  %v1734_v21 = vpop.f32.mrb[34].mxu0  ;;  %2747 = vmatpush1.bf16.msra.mxu0 %v10216_v24  ;;  %v13313_v10 = vmax.f32 %v12491_v63, 0.0 }
 0x33f   : > { %v12433_v17 = vadd.f32 %v2090_v20, %v1835_v44  ;;  %v1735_v22 = vpop.f32.mrb[35].mxu0  ;;  %v2092_v25 = vpop.f32.mrb[30].mxu1  ;;  %2787 = vmatprep.subr.bf16.mxu0 %v10221_v52  ;;  %v13301_v52 = vsub.s32 3, %v12423_v14 }
 0x340   : > { %v2093_v28 = vpop.f32.mrb[31].mxu1  ;;  %v12517_v25 = vadd.f32 %v12454_v40, %v12418_v11  ;;  %v9986_v35 = vpack.i.bf16 %v13312_v47, %v13313_v10 }
 0x342   : > { %v13310_v24 = vmax.f32 %v12517_v25, 0.0 }
 0x344   : > { %v1987_v36 = vpop.f32.mrb[0].mxu0 }
 0x345   : > { %v12449_v38 = vadd.f32 %v12440_v32, %v1987_v36  ;;  %v1989_v39 = vpop.f32.mrb[1].mxu0 }
 0x346   : > { %v12457_v41 = vadd.f32 %v12446_v34, %v1989_v39  ;;  %v1991_v61 = vpop.f32.mrb[2].mxu0 }
 0x347   : > { %v12460_v42 = vadd.f32 %v12440_v32, %v1991_v61  ;;  %v1993_v29 = vpop.f32.mrb[3].mxu0  ;;  %v2173_v6 = vmax.f32 %v12449_v38, 0.0 }
 0x348   : > { %v12466_v13 = vadd.f32 %v12446_v34, %v1993_v29  ;;  %v2174_v44 = vmax.f32 %v12457_v41, 0.0 }
 0x349   : > { %v2177_v16 = vmax.f32 %v12460_v42, 0.0 }
 0x34a   : > { %v2178_v45 = vmax.f32 %v12466_v13, 0.0  ;;  %v10224_v13 = vld [vmem:[#allocation8 + $0x114] ss:$8 sps:$4 sm:$0xff]  }
 0x34b   : > { %v9981_v8 = vpack.i.bf16 %v2177_v16, %v2173_v6 }
 0x34c   : > { %v1997_v58 = vpop.f32.mrb[4].mxu0  ;;  %v9971_v55 = vpack.i.bf16 %v2178_v45, %v2174_v44 }
 0x34d   : > { %9982 = vrot.lane.b32.xlu1 %v9981_v8, %s11573_s1  ;;  %v1999_v59 = vpop.f32.mrb[5].mxu0  ;;  %v12510_v20 = vadd.f32 %v12440_v32, %v1997_v58  ;;  %v13311_v58 = vmax.f32 %v12530_v37, 0.0 }
 0x34e   : > { %v12494_v2 = vadd.f32 %v12446_v34, %v1999_v59  ;;  %9972 = vrot.lane.b32.xlu0 %v9971_v55, %s11573_s1  ;;  %v2001_v46 = vpop.f32.mrb[6].mxu0 }
 0x34f   : > { %v2003_v5 = vpop.f32.mrb[7].mxu0  ;;  %v12499_v51 = vadd.f32 %v12440_v32, %v2001_v46  ;;  %v2181_v11 = vmax.f32 %v12510_v20, 0.0  ;;  %v10230_v20 = vld [vmem:[#allocation8 + $0x134] ss:$8 sps:$4 sm:$0xff]  }
 0x350   : > { %v12502_v53 = vadd.f32 %v12446_v34, %v2003_v5  ;;  %v2182_v21 = vmax.f32 %v12494_v2, 0.0  ;;  %v10001_v5 = vpack.i.bf16 %v13310_v24, %v13311_v58 }
 0x351   : > { %v2185_v26 = vmax.f32 %v12499_v51, 0.0 }
 0x352   : > { %v2186_v22 = vmax.f32 %v12502_v53, 0.0  ;;  %9977 = vrot.lane.b32.xlu0 %v9976_v1, %s11573_s1  ;;  %v10227_v53 = vld [vmem:[#allocation8 + $0x124] ss:$8 sps:$4 sm:$0xff]  }
 0x353   : > { %v9996_v9 = vpack.i.bf16 %v2185_v26, %v2181_v11 }
 0x354   : > { %v9991_v28 = vpack.i.bf16 %v2186_v22, %v2182_v21  ;;  %v2007_v31 = vpop.f32.mrb[8].mxu0 }
 0x355   : > { %v2009_v36 = vpop.f32.mrb[9].mxu0  ;;  %v12552_v55 = vadd.f32 %v12440_v32, %v2007_v31 }
 0x356   : > { %v12534_v39 = vadd.f32 %v12446_v34, %v2009_v36  ;;  %9987 = vrot.lane.b32.xlu0 %v9986_v35, %s11573_s1  ;;  %9992 = vrot.lane.b32.xlu1 %v9991_v28, %s11573_s1  ;;  %v2011_v61 = vpop.f32.mrb[10].mxu0  ;;  %v2140_v35 = vrot.slane %v12435_v27, %v13301_v52 }
 0x357   : > { %v2013_v29 = vpop.f32.mrb[11].mxu0  ;;  %v12544_v48 = vadd.f32 %v12440_v32, %v2011_v61 }
 0x358   : > { %v12547_v8 = vadd.f32 %v12446_v34, %v2013_v29  ;;  %v2190_v59 = vmax.f32 %v12534_v39, 0.0  ;;  %v12572_v29 = vadd.f32 %v12454_v40, %v12428_v18  ;;  %v12579_v12 = vadd.f32 %v12402_v62, %v2140_v35 }
 0x359   : > { %v2193_v1 = vmax.f32 %v12544_v48, 0.0  ;;  %v12598_v62 = vadd.f32 %v12408_v3, %v2140_v35 }
 0x35a   : > { %v2194_v46 = vmax.f32 %v12547_v8, 0.0  ;;  %9997 = vrot.lane.b32.xlu1 %v9996_v9, %s11573_s1  ;;  %v2189_v9 = vmax.f32 %v12552_v55, 0.0  ;;  %v10233_v8 = vld [vmem:[#allocation8 + $0x144] ss:$8 sps:$4 sm:$0xff]  }
 0x35c   : > { %v10006_v28 = vpack.i.bf16 %v2194_v46, %v2190_v59  ;;  %v2017_v31 = vpop.f32.mrb[36].mxu0  ;;  %v10011_v18 = vpack.i.bf16 %v2193_v1, %v2189_v9 }
 0x35d   : > { %v2119_v36 = vadd.f32 %v2017_v31, %v12425_v15  ;;  %v2019_v61 = vpop.f32.mrb[37].mxu0  ;;  %v12582_v15 = vadd.f32 %v12412_v7, %v2140_v35  ;;  %v13304_v7 = vmax.f32 %v12572_v29, 0.0  ;;  %v12606_v31 = vadd.f32 %v2140_v35, %v12420_v50 }
 0x35e   : > { %v2120_v33 = vadd.f32 %v2019_v61, %v12430_v19  ;;  %10002 = vrot.lane.b32.xlu1 %v10001_v5, %s11573_s1  ;;  %10007 = vrot.lane.b32.xlu0 %v10006_v28, %s11573_s1  ;;  %v2021_v56 = vpop.f32.mrb[38].mxu0  ;;  %v13314_v28 = vmax.f32 %v12579_v12, 0.0  ;;  %v12624_v61 = vadd.f32 %v2140_v35, %v12433_v17 }
 0x35f   : > { %v2022_v27 = vpop.f32.mrb[39].mxu0  ;;  %v12589_v40 = vadd.f32 %v12440_v32, %v2119_v36  ;;  %v12595_v56 = vadd.f32 %v12398_v57, %v2140_v35  ;;  %v13308_v32 = vmax.f32 %v12582_v15, 0.0  ;;  %v12616_v36 = vadd.f32 %v2140_v35, %v12416_v4 }
 0x360   : > { %v12592_v19 = vadd.f32 %v12446_v34, %v2120_v33  ;;  %v13309_v34 = vmax.f32 %v12598_v62, 0.0  ;;  %v13305_v50 = vmax.f32 %v12606_v31, 0.0  ;;  %v13306_v35 = vmax.f32 %v12624_v61, 0.0 }
 0x361   : > { %v2197_v33 = vmax.f32 %v12589_v40, 0.0  ;;  %v13315_v3 = vmax.f32 %v12595_v56, 0.0 }
 0x362   : > { %v2198_v5 = vmax.f32 %v12592_v19, 0.0  ;;  %10012 = vrot.lane.b32.xlu0 %v10011_v18, %s11573_s1  ;;  %v10026_v4 = vpack.i.bf16 %v13308_v32, %v13309_v34  ;;  %v13307_v18 = vmax.f32 %v12616_v36, 0.0 }
 0x363   : > { %v10021_v27 = vpack.i.bf16 %v13314_v28, %v13315_v3  ;;  %v10219_v28 = vld [vmem:[#allocation8 + $0x100] ss:$8 sps:$4 sm:$0xff]  }
 0x364   : > { %v10016_v57 = vpack.i.bf16 %v13304_v7, %v2198_v5  ;;  %v10031_v17 = vpack.i.bf16 %v13305_v50, %v13307_v18 }
 0x366   : > { %10017 = vrot.lane.b32.xlu1 %v10016_v57, %s11573_s1  ;;  %2213 = vrot.lane.b32.xlu0 %v2197_v33, %s11573_s1  ;;  %v12647_v57 = vand.u32 127, %v2125_v49 }
 0x368   : > { %vm2259_vm6 = vcmp.lt.s32.totalorder %v12647_v57, 127 }
 0x36a   : > { %10022 = vrot.lane.b32.xlu1 %v10021_v27, %s11573_s1  ;;  %10027 = vrot.lane.b32.xlu0 %v10026_v4, %s11573_s1 }
 0x36e   : > { %10032 = vrot.lane.b32.xlu1 %v10031_v17, %s11573_s1  ;;  %2255 = vrot.lane.b32.xlu0 %v13306_v35, %s11573_s1 }
 0x3bf   : > { %v12649_v52 = vpop.permute.xlu1 %9982 }
 0x3c0   : > { %v9985_v27 = vunpack.i.h.bf16 %v12649_v52  ;;  %v9984_v4 = vunpack.i.l.bf16 %v12649_v52  ;;  %v9973_v0 = vpop.permute.xlu0 %9972  ;;  %v13370_v52 = vmax.f32 %v12595_v56, 0.0  ;;  %v13371_v56 = vmax.f32 %v12579_v12, 0.0 }
 0x3c1   : > { %v9975_v7 = vunpack.i.h.bf16 %v9973_v0  ;;  %v9974_v50 = vunpack.i.l.bf16 %v9973_v0 }
 0x3c3   : > { %v2275_v17 = vsel %vm2259_vm6, %v9985_v27, %v9975_v7  ;;  %v2274_v49 = vsel %vm2259_vm6, %v9984_v4, %v9974_v50 }
 0x3c4   : > { %v12662_v35 = vpop.permute.xlu0 %9977  ;;  %v2292_v34 = vmax.f32 %v2177_v16, %v2275_v17  ;;  %v2288_v0 = vmax.f32 %v2173_v6, %v2274_v49 }
 0x3c5   : > { %v9980_v18 = vunpack.i.h.bf16 %v12662_v35  ;;  %v9979_v32 = vunpack.i.l.bf16 %v12662_v35 }
 0x3c6   : > { %v2316_v3 = vpack.c.bf16 %v2292_v34, %v2288_v0  ;;  %v10222_v34 = vld [vmem:[#allocation8 + $0x110] ss:$8 sps:$4 sm:$0xff]  }
 0x3c7   : > { %v2267_v24 = vsel %vm2259_vm6, %v9974_v50, %v9979_v32  ;;  %v2268_v58 = vsel %vm2259_vm6, %v9975_v7, %v9980_v18 }
 0x3c8   : > { %v12678_v47 = vpop.permute.xlu0 %9987  ;;  %v9993_v10 = vpop.permute.xlu1 %9992  ;;  %v2289_v42 = vmax.f32 %v2174_v44, %v2267_v24  ;;  %v2293_v38 = vmax.f32 %v2178_v45, %v2268_v58 }
 0x3c9   : > { %v9990_v6 = vunpack.i.h.bf16 %v12678_v47  ;;  %v9989_v16 = vunpack.i.l.bf16 %v12678_v47  ;;  %v9995_v17 = vunpack.i.h.bf16 %v9993_v10  ;;  %v9994_v50 = vunpack.i.l.bf16 %v9993_v10 }
 0x3ca   : > { %v2317_v49 = vpack.c.bf16 %v2293_v38, %v2289_v42 }
 0x3cb   : > { %v2270_v7 = vsel %vm2259_vm6, %v9995_v17, %v9990_v6  ;;  %v2269_v41 = vsel %vm2259_vm6, %v9994_v50, %v9989_v16 }
 0x3cc   : > { %2748 = vmatprep.mubr.bf16.mxu0 %v2317_v49  ;;  %v12694_v44 = vpop.permute.xlu1 %9997  ;;  %v2297_v45 = vmax.f32 %v2182_v21, %v2269_v41  ;;  %v2301_v10 = vmax.f32 %v2186_v22, %v2270_v7 }
 0x3cd   : > { %v10000_v24 = vunpack.i.h.bf16 %v12694_v44  ;;  %v9999_v58 = vunpack.i.l.bf16 %v12694_v44  ;;  %2749 = vmatmul.mubr.bf16.vlgmr.msra.gmra.mrb[40].mxu0 %v2316_v3 }
 0x3ce   : > { %2788 = vmatpush1.bf16.msra.mxu0 %v10219_v28  ;;  %v2321_v0 = vpack.c.bf16 %v2301_v10, %v2297_v45 }
 0x3cf   : > { %v2276_v42 = vsel %vm2259_vm6, %v9999_v58, %v9994_v50  ;;  %v2277_v2 = vsel %vm2259_vm6, %v10000_v24, %v9995_v17  ;;  %2789 = vmatprep.subr.bf16.mxu0 %v10224_v13  ;;  %v10225_v17 = vld [vmem:[#allocation8 + $0x120] ss:$8 sps:$4 sm:$0xff]  }
 0x3d0   : > { %v12710_v21 = vpop.permute.xlu1 %10002  ;;  %2758 = vmatprep.mubr.bf16.mxu0 %v2321_v0  ;;  %v10008_v22 = vpop.permute.xlu0 %10007  ;;  %v2296_v28 = vmax.f32 %v2181_v11, %v2276_v42  ;;  %v2300_v3 = vmax.f32 %v2185_v26, %v2277_v2  ;;  %v10228_v42 = vld [vmem:[#allocation8 + $0x130] ss:$8 sps:$4 sm:$0xff]  }
 0x3d1   : > { %v10005_v38 = vunpack.i.h.bf16 %v12710_v21  ;;  %v10004_v50 = vunpack.i.l.bf16 %v12710_v21  ;;  %v10010_v49 = vunpack.i.h.bf16 %v10008_v22  ;;  %v10009_v7 = vunpack.i.l.bf16 %v10008_v22 }
 0x3d2   : > { %2790 = vmatpush1.bf16.msra.mxu0 %v10222_v34  ;;  %v2320_v41 = vpack.c.bf16 %v2300_v3, %v2296_v28  ;;  %v13374_v21 = vmax.f32 %v12530_v37, 0.0  ;;  %v10252_v37 = vld [vmem:[#allocation8 + $0x1b0] ss:$8 sps:$4 sm:$0xff]  }
 0x3d3   : > { %v2272_v13 = vsel %vm2259_vm6, %v10010_v49, %v10005_v38  ;;  %v2271_v51 = vsel %vm2259_vm6, %v10009_v7, %v10004_v50  ;;  %2791 = vmatprep.subr.bf16.mxu0 %v10227_v53 }
 0x3d4   : > { %v12726_v26 = vpop.permute.xlu0 %10012  ;;  %v2305_v11 = vmax.f32 %v2190_v59, %v2271_v51  ;;  %v2309_v45 = vmax.f32 %v2194_v46, %v2272_v13 }
 0x3d5   : > { %v10015_v10 = vunpack.i.h.bf16 %v12726_v26  ;;  %v10014_v34 = vunpack.i.l.bf16 %v12726_v26  ;;  %2759 = vmatmul.mubr.bf16.gmra.mrb[44].mxu0 %v2320_v41 }
 0x3d6   : > { %2792 = vmatpush1.bf16.msra.mxu0 %v10225_v17  ;;  %v2325_v0 = vpack.c.bf16 %v2309_v45, %v2305_v11  ;;  %v10236_v17 = vld [vmem:[#allocation8 + $0x154] ss:$8 sps:$4 sm:$0xff]   ;;  %v10234_v45 = vld [vmem:[#allocation8 + $0x150] ss:$8 sps:$4 sm:$0xff]  }
 0x3d7   : > { %v2278_v2 = vsel %vm2259_vm6, %v10014_v34, %v10009_v7  ;;  %v2279_v39 = vsel %vm2259_vm6, %v10015_v10, %v10010_v49  ;;  %2793 = vmatprep.subr.bf16.mxu0 %v10230_v20  ;;  %v10231_v7 = vld [vmem:[#allocation8 + $0x140] ss:$8 sps:$4 sm:$0xff]  }
 0x3d8   : > { %2768 = vmatprep.mubr.bf16.mxu0 %v2325_v0  ;;  %v12742_v59 = vpop.permute.xlu1 %10017  ;;  %v12744_v46 = vpop.permute.xlu0 %2213  ;;  %v2304_v53 = vmax.f32 %v2189_v9, %v2278_v2  ;;  %v2308_v22 = vmax.f32 %v2193_v1, %v2279_v39  ;;  %v10239_v39 = vld [vmem:[#allocation8 + $0x164] ss:$8 sps:$4 sm:$0xff]  }
 0x3d9   : > { %v10020_v28 = vunpack.i.h.bf16 %v12742_v59  ;;  %v10019_v3 = vunpack.i.l.bf16 %v12742_v59 }
 0x3da   : > { %2794 = vmatpush1.bf16.msra.mxu0 %v10228_v42  ;;  %v2324_v49 = vpack.c.bf16 %v2308_v22, %v2304_v53  ;;  %v10242_v53 = vld [vmem:[#allocation8 + $0x174] ss:$8 sps:$4 sm:$0xff]   ;;  %v13372_v22 = vmax.f32 %v12491_v63, 0.0  ;;  %v10243_v63 = vld [vmem:[#allocation8 + $0x180] ss:$8 sps:$4 sm:$0xff]  }
 0x3db   : > { %2795 = vmatprep.subr.bf16.mxu0 %v10233_v8  ;;  %v2273_v41 = vsel %vm2259_vm6, %v10019_v3, %v10020_v28  ;;  %v2280_v55 = vsel %vm2259_vm6, %v12744_v46, %v10019_v3 }
 0x3dc   : > { %v10023_v48 = vpop.permute.xlu1 %10022  ;;  %v12759_v1 = vpop.permute.xlu0 %10027  ;;  %v2313_v9 = vmax.f32 %v2198_v5, %v2273_v41  ;;  %v2312_v42 = vmax.f32 %v2197_v33, %v2280_v55  ;;  %v10245_v41 = vld [vmem:[#allocation8 + $0x184] ss:$8 sps:$4 sm:$0xff]  }
 0x3dd   : > { %v10025_v13 = vunpack.i.h.bf16 %v10023_v48  ;;  %v10024_v51 = vunpack.i.l.bf16 %v10023_v48  ;;  %2769 = vmatmul.mubr.bf16.gmra.mrb[48].mxu0 %v2324_v49  ;;  %v10030_v20 = vunpack.i.h.bf16 %v12759_v1  ;;  %v10029_v11 = vunpack.i.l.bf16 %v12759_v1 }
 0x3de   : > { %2796 = vmatpush1.bf16.msra.mxu0 %v10231_v7  ;;  %v2329_v0 = vpack.c.bf16 %v2313_v9, %v2313_v9  ;;  %v2328_v8 = vpack.c.bf16 %v2312_v42, %v2312_v42  ;;  %v13373_v7 = vmax.f32 %v12481_v23, 0.0  ;;  %v10246_v23 = vld [vmem:[#allocation8 + $0x190] ss:$8 sps:$4 sm:$0xff]   ;;  %v10257_v42 = vld [vmem:[#allocation8 + $0x1c4] ss:$8 sps:$4 sm:$0xff]  }
 0x3df   : > { %v2261_v2 = vsel %vm2259_vm6, %v9980_v18, %v10025_v13  ;;  %v2260_v19 = vsel %vm2259_vm6, %v9979_v32, %v10024_v51  ;;  %v2281_v5 = vsel %vm2259_vm6, %v10024_v51, %v9984_v4  ;;  %2797 = vmatprep.subr.bf16.mxu0 %v10236_v17  ;;  %v2282_v32 = vsel %vm2259_vm6, %v10025_v13, %v9985_v27  ;;  %v10248_v13 = vld [vmem:[#allocation8 + $0x194] ss:$8 sps:$4 sm:$0xff]   ;;  %v10251_v51 = vld [vmem:[#allocation8 + $0x1a4] ss:$8 sps:$4 sm:$0xff]  }
 0x3e0   : > { %v12781_v40 = vmax.f32 %v2179_v54, %v2261_v2  ;;  %v12785_v33 = vmax.f32 %v2175_v60, %v2260_v19  ;;  %v12787_v18 = vpop.permute.xlu1 %10032  ;;  %2778 = vmatprep.mubr.bf16.mxu0 %v2329_v0  ;;  %v2263_v43 = vsel %vm2259_vm6, %v9990_v6, %v10030_v20  ;;  %v2262_v54 = vsel %vm2259_vm6, %v9989_v16, %v10029_v11  ;;  %v10237_v60 = vld [vmem:[#allocation8 + $0x160] ss:$8 sps:$4 sm:$0xff]   ;;  %v10254_v0 = vld [vmem:[#allocation8 + $0x1b4] ss:$8 sps:$4 sm:$0xff]   ;;  %v10258_v19 = vld [vmem:[#allocation8 + $0x1d0] ss:$8 sps:$4 sm:$0xff]  }
 0x3e1   : > { %v10035_v35 = vunpack.i.h.bf16 %v12787_v18  ;;  %v10034_v4 = vunpack.i.l.bf16 %v12787_v18  ;;  %v2291_v27 = vmax.f32 %v13370_v52, %v2281_v5  ;;  %v2295_v16 = vmax.f32 %v13371_v56, %v2282_v32  ;;  %v10260_v2 = vld [vmem:[#allocation8 + $0x1d4] ss:$8 sps:$4 sm:$0xff]   ;;  %v10263_v5 = vld [vmem:[#allocation8 + $0x1e4] ss:$8 sps:$4 sm:$0xff]  }
 0x3e2   : > { %v2318_v30 = vpack.c.bf16 %v12781_v40, %v12785_v33  ;;  %2798 = vmatpush1.bf16.msra.mxu0 %v10234_v45  ;;  %v2298_v3 = vmax.f32 %v13372_v22, %v2262_v54  ;;  %v2302_v49 = vmax.f32 %v13373_v7, %v2263_v43  ;;  %v10249_v45 = vld [vmem:[#allocation8 + $0x1a0] ss:$8 sps:$4 sm:$0xff]   ;;  %v10266_v32 = vld [vmem:[#allocation8 + $0x1f4] ss:$8 sps:$4 sm:$0xff]   ;;  %v2284_v43 = vsel %vm2259_vm6, %v10030_v20, %v10000_v24  ;;  %v2256_v20 = vpop.permute.xlu0 %2255 }
 0x3e3   : > { %2799 = vmatprep.subr.bf16.mxu0 %v10239_v39  ;;  %v2265_v6 = vsel %vm2259_vm6, %v10005_v38, %v10035_v35  ;;  %v2264_v47 = vsel %vm2259_vm6, %v10004_v50, %v10034_v4  ;;  %v2319_v17 = vpack.c.bf16 %v2295_v16, %v2291_v27  ;;  %v10240_v38 = vld [vmem:[#allocation8 + $0x170] ss:$8 sps:$4 sm:$0xff]   ;;  %v13375_v50 = vmax.f32 %v12517_v25, 0.0  ;;  %v10255_v25 = vld [vmem:[#allocation8 + $0x1c0] ss:$8 sps:$4 sm:$0xff]  }
 0x3e4   : > { %v2322_v55 = vpack.c.bf16 %v2302_v49, %v2298_v3  ;;  %v2306_v48 = vmax.f32 %v13374_v21, %v2264_v47  ;;  %v10261_v39 = vld [vmem:[#allocation8 + $0x1e0] ss:$8 sps:$4 sm:$0xff]   ;;  %v2283_v54 = vsel %vm2259_vm6, %v10029_v11, %v9999_v58  ;;  %v13376_v52 = vmax.f32 %v12598_v62, 0.0 }
 0x3e5   : > { %2779 = vmatmul.mubr.bf16.gmra.mrb[52].mxu0 %v2328_v8  ;;  %v2310_v12 = vmax.f32 %v13375_v50, %v2265_v6  ;;  %v13377_v8 = vmax.f32 %v12582_v15, 0.0  ;;  %v2286_v44 = vsel %vm2259_vm6, %v10035_v35, %v10015_v10  ;;  %v2285_v62 = vsel %vm2259_vm6, %v10034_v4, %v10014_v34 }
 0x3e6   : > { %2800 = vmatpush1.bf16.msra.mxu0 %v10237_v60  ;;  %2819 = vmatprep.mubr.bf16.mxu0 %v2319_v17  ;;  %v10264_v60 = vld [vmem:[#allocation8 + $0x1f0] ss:$8 sps:$4 sm:$0xff]   ;;  %v2299_v27 = vmax.f32 %v13376_v52, %v2283_v54  ;;  %v13378_v15 = vmax.f32 %v12616_v36, 0.0  ;;  %v13379_v58 = vmax.f32 %v12606_v31, 0.0  ;;  %v2287_v26 = vsel %vm2259_vm6, %v2256_v20, %v12744_v46 }
 0x3e7   : > { %2801 = vmatprep.subr.bf16.mxu0 %v10242_v53  ;;  %v2326_v9 = vpack.c.bf16 %v2310_v12, %v2306_v48  ;;  %v2303_v53 = vmax.f32 %v13377_v8, %v2284_v43  ;;  %v13380_v34 = vmax.f32 %v12624_v61, 0.0  ;;  %v2266_v36 = vsel %vm2259_vm6, %v10020_v28, %v2256_v20  ;;  %v10285_v43 = vld [vmem:[#allocation13 + $0x284] ss:$16 sps:$4 sm:$0xff]   ;;  %v10283_v54 = vld [vmem:[#allocation13 + $0x280] ss:$16 sps:$4 sm:$0xff]  }
 0x3e8   : > { %v2307_v24 = vmax.f32 %v13378_v15, %v2285_v62  ;;  %v2311_v1 = vmax.f32 %v13379_v58, %v2286_v44  ;;  %v13381_v31 = vmax.f32 %v12572_v29, 0.0  ;;  %v10286_v52 = vld [vmem:[#allocation13 + $0x2a0] ss:$16 sps:$4 sm:$0xff]   ;;  %v10297_v44 = vld [vmem:[#allocation13 + $0x304] ss:$16 sps:$4 sm:$0xff]  }
 0x3e9   : > { %v2323_v6 = vpack.c.bf16 %v2303_v53, %v2299_v27  ;;  %v2315_v11 = vmax.f32 %v13380_v34, %v2287_v26  ;;  %v10291_v27 = vld [vmem:[#allocation13 + $0x2c4] ss:$16 sps:$4 sm:$0xff]   ;;  %v10289_v8 = vld [vmem:[#allocation13 + $0x2c0] ss:$16 sps:$4 sm:$0xff]  }
 0x3ea   : > { %2802 = vmatpush1.bf16.msra.mxu0 %v10240_v38  ;;  %v2327_v10 = vpack.c.bf16 %v2311_v1, %v2307_v24  ;;  %v2314_v33 = vmax.f32 %v13381_v31, %v2266_v36  ;;  %v10292_v53 = vld [vmem:[#allocation13 + $0x2e0] ss:$16 sps:$4 sm:$0xff]   ;;  %v10300_v24 = vld [vmem:[#allocation13 + $0x324] ss:$16 sps:$4 sm:$0xff]  }
 0x3eb   : > { %2803 = vmatprep.subr.bf16.mxu0 %v10245_v41  ;;  %v2331_v40 = vpack.c.bf16 %v2315_v11, %v2315_v11  ;;  %v10295_v62 = vld [vmem:[#allocation13 + $0x300] ss:$16 sps:$4 sm:$0xff]   ;;  %v10303_v58 = vld [vmem:[#allocation13 + $0x344] ss:$16 sps:$4 sm:$0xff]  }
 0x3ec   : > { %v2330_v18 = vpack.c.bf16 %v2314_v33, %v2314_v33  ;;  %v10298_v15 = vld [vmem:[#allocation13 + $0x320] ss:$16 sps:$4 sm:$0xff]   ;;  %v10309_v34 = vld [vmem:[#allocation13 + $0x384] ss:$16 sps:$4 sm:$0xff]  }
 0x3ed   : > { %v10301_v1 = vld [vmem:[#allocation13 + $0x340] ss:$16 sps:$4 sm:$0xff]   ;;  %v10312_v36 = vld [vmem:[#allocation13 + $0x3a4] ss:$16 sps:$4 sm:$0xff]  }
 0x3ee   : > { %2804 = vmatpush1.bf16.msra.mxu0 %v10243_v63  ;;  %v10304_v20 = vld [vmem:[#allocation13 + $0x360] ss:$16 sps:$4 sm:$0xff]   ;;  %v10315_v31 = vld [vmem:[#allocation13 + $0x3c4] ss:$16 sps:$4 sm:$0xff]  }
 0x3ef   : > { %2805 = vmatprep.subr.bf16.mxu0 %v10248_v13  ;;  %v10267_v13 = vld [vmem:[#allocation10] sm:$0xff]  }
 0x3f0   : > { %v10307_v26 = vld [vmem:[#allocation13 + $0x380] ss:$16 sps:$4 sm:$0xff]   ;;  %v10318_v33 = vld [vmem:[#allocation13 + $0x3e4] ss:$16 sps:$4 sm:$0xff]  }
 0x3f1   : > { %v10310_v11 = vld [vmem:[#allocation13 + $0x3a0] ss:$16 sps:$4 sm:$0xff]  }
 0x3f2   : > { %2806 = vmatpush1.bf16.msra.mxu0 %v10246_v23  ;;  %v13382_v23 = vmov 0  }
 0x3f3   : > { %2807 = vmatprep.subr.bf16.mxu0 %v10251_v51  ;;  %v10268_v51 = vld [vmem:[#allocation10 + $0x8] sm:$0x1f]  }
 0x3f6   : > { %2808 = vmatpush1.bf16.msra.mxu0 %v10249_v45  ;;  %v10273_v45 = vld [vmem:[#allocation13 + $0x204] ss:$16 sps:$4 sm:$0xff]  }
 0x3f7   : > { %2809 = vmatprep.subr.bf16.mxu0 %v10254_v0  ;;  %v10269_v0 = vld [vmem:[#allocation11] sm:$0xff]  }
 0x3fa   : > { %2810 = vmatpush1.bf16.msra.mxu0 %v10252_v37  ;;  %v10271_v37 = vld [vmem:[#allocation13 + $0x200] ss:$16 sps:$4 sm:$0xff]  }
 0x3fb   : > { %2811 = vmatprep.subr.bf16.mxu0 %v10257_v42  ;;  %v10276_v42 = vld [vmem:[#allocation13 + $0x224] ss:$16 sps:$4 sm:$0xff]  }
 0x3fe   : > { %2812 = vmatpush1.bf16.msra.mxu0 %v10255_v25  ;;  %v10274_v25 = vld [vmem:[#allocation13 + $0x220] ss:$16 sps:$4 sm:$0xff]  }
 0x3ff   : > { %2813 = vmatprep.subr.bf16.mxu0 %v10260_v2  ;;  %v10279_v2 = vld [vmem:[#allocation13 + $0x244] ss:$16 sps:$4 sm:$0xff]  }
 0x402   : > { %2814 = vmatpush1.bf16.msra.mxu0 %v10258_v19  ;;  %v10270_v19 = vld [vmem:[#allocation11 + $0x8] sm:$0x1f]  }
 0x403   : > { %2815 = vmatprep.subr.bf16.mxu0 %v10263_v5  ;;  %v10277_v5 = vld [vmem:[#allocation13 + $0x240] ss:$16 sps:$4 sm:$0xff]  }
 0x406   : > { %2816 = vmatpush1.bf16.msra.mxu0 %v10261_v39  ;;  %v10282_v39 = vld [vmem:[#allocation13 + $0x264] ss:$16 sps:$4 sm:$0xff]  }
 0x407   : > { %2817 = vmatprep.subr.bf16.mxu0 %v10266_v32  ;;  %v10280_v32 = vld [vmem:[#allocation13 + $0x260] ss:$16 sps:$4 sm:$0xff]  }
 0x40a   : > { %2818 = vmatpush1.bf16.msra.mxu0 %v10264_v60  ;;  %v10288_v60 = vld [vmem:[#allocation13 + $0x2a4] ss:$16 sps:$4 sm:$0xff]  }
 0x40d   : > { %2820 = vmatmul.mubr.bf16.vlgmr.msra.gmra.mrb[40].mxu0 %v2318_v30 }
 0x40e   : > { %2829 = vmatprep.mubr.bf16.mxu0 %v2323_v6  ;;  %v10294_v6 = vld [vmem:[#allocation13 + $0x2e4] ss:$16 sps:$4 sm:$0xff]  }
 0x415   : > { %2830 = vmatmul.mubr.bf16.gmra.mrb[44].mxu0 %v2322_v55 }
 0x416   : > { %2839 = vmatprep.mubr.bf16.mxu0 %v2327_v10  ;;  %v10306_v10 = vld [vmem:[#allocation13 + $0x364] ss:$16 sps:$4 sm:$0xff]  }
 0x41d   : > { %2840 = vmatmul.mubr.bf16.gmra.mrb[48].mxu0 %v2326_v9 }
 0x41e   : > { %2849 = vmatprep.mubr.bf16.mxu0 %v2331_v40  ;;  %v10313_v40 = vld [vmem:[#allocation13 + $0x3c0] ss:$16 sps:$4 sm:$0xff]  }
 0x425   : > { %2850 = vmatmul.mubr.bf16.gmra.mrb[52].mxu0 %v2330_v18  ;;  %v10316_v18 = vld [vmem:[#allocation13 + $0x3e0] ss:$16 sps:$4 sm:$0xff]  }
 0x4e0   : > { %v2821_v35 = vpop.f32.mrb[40].mxu0 }
 0x4e1   : > { %v2823_v46 = vpop.f32.mrb[41].mxu0 }
 0x4e2   : > { %v2825_v4 = vpop.f32.mrb[42].mxu0 }
 0x4e3   : > { %v2858_v30 = vpack.c.bf16 %v2825_v4, %v2821_v35  ;;  %v2827_v47 = vpop.f32.mrb[43].mxu0  ;;  %v10321_v35 = vld [vmem:[#allocation13 + $0x20c] ss:$16 sps:$4 sm:$0xff]  }
 0x4e4   : > { %v2859_v61 = vpack.c.bf16 %v2827_v47, %v2823_v46 }
 0x4e6   : > { %2894 = vmatprep.subr.bf16.mxu1 %v2859_v61 }
 0x4e7   : > { %2895 = vmatpush1.bf16.msra.mxu1 %v2858_v30 }
 0x4e8   : > { %v2831_v59 = vpop.f32.mrb[44].mxu0 }
 0x4e9   : > { %v2833_v56 = vpop.f32.mrb[45].mxu0 }
 0x4ea   : > { %v2835_v16 = vpop.f32.mrb[46].mxu0 }
 0x4eb   : > { %v2860_v28 = vpack.c.bf16 %v2835_v16, %v2831_v59  ;;  %v2837_v22 = vpop.f32.mrb[47].mxu0 }
 0x4ec   : > { %v2861_v3 = vpack.c.bf16 %v2837_v22, %v2833_v56 }
 0x4ee   : > { %2896 = vmatprep.subr.bf16.mxu1 %v2861_v3 }
 0x4ef   : > { %2897 = vmatpush1.bf16.msra.mxu1 %v2860_v28 }
 0x4f0   : > { %v2841_v29 = vpop.f32.mrb[48].mxu0 }
 0x4f1   : > { %v2843_v7 = vpop.f32.mrb[49].mxu0 }
 0x4f2   : > { %v2845_v49 = vpop.f32.mrb[50].mxu0 }
 0x4f3   : > { %v2862_v17 = vpack.c.bf16 %v2845_v49, %v2841_v29  ;;  %v2847_v38 = vpop.f32.mrb[51].mxu0 }
 0x4f4   : > { %v2863_v41 = vpack.c.bf16 %v2847_v38, %v2843_v7 }
 0x4f6   : > { %2898 = vmatprep.subr.bf16.mxu1 %v2863_v41 }
 0x4f7   : > { %2899 = vmatpush1.bf16.msra.mxu1 %v2862_v17 }
 0x4f8   : > { %v2851_v55 = vpop.f32.mrb[52].mxu0 }
 0x4f9   : > { %v2864_v21 = vpack.c.bf16 %v2851_v55, %v2851_v55  ;;  %v2853_v48 = vpop.f32.mrb[53].mxu0 }
 0x4fa   : > { %v2865_v50 = vpack.c.bf16 %v2853_v48, %v2853_v48  ;;  %v2855_v12 = vpop.f32.mrb[54].mxu0 }
 0x4fb   : > { %v2889_v9 = vsel %vm2887_vm7, %v2864_v21, 0  ;;  %v2856_v63 = vpop.f32.mrb[55].mxu0 }
 0x4fc   : > { %8755 = vmatprep.subr.msk.bf16.mxu1 %vm2887_vm7, %v2865_v50 }
 0x4fd   : > { %2901 = vmatpush1.bf16.msra.mxu1 %v2889_v9 }
 0x4fe   : > { %2967 = vmatprep.subr.bf16.mxu1 %v2859_v61 }
 0x500   : > { %8756 = vmatmul.mubr.msk.bf16.vlgmr.msra.gmra.mrb[32].mxu1 %vm2880_vm8, %v10267_v13 }
 0x501   : > { %2968 = vmatpush1.bf16.msra.mxu1 %v2858_v30  ;;  %2936 = vmatprep.mubr.bf16.mxu1 %v13382_v23 }
 0x502   : > { %2969 = vmatprep.subr.bf16.mxu1 %v2861_v3 }
 0x505   : > { %2970 = vmatpush1.bf16.msra.mxu1 %v2860_v28 }
 0x506   : > { %2971 = vmatprep.subr.bf16.mxu1 %v2863_v41 }
 0x508   : > { %8757 = vmatmul.mubr.msk.bf16.gmra.mrb[36].mxu1 %vm2880_vm8, %v10268_v51 }
 0x509   : > { %2972 = vmatpush1.bf16.msra.mxu1 %v2862_v17  ;;  %2999 = vmatprep.mubr.bf16.mxu1 %v13382_v23 }
 0x50a   : > { %8760 = vmatprep.subr.msk.bf16.mxu1 %vm2887_vm7, %v2865_v50 }
 0x50d   : > { %2974 = vmatpush1.bf16.msra.mxu1 %v2889_v9 }
 0x50e   : > { %3515 = vmatprep.subr.bf16.mxu1 %v10273_v45 }
 0x510   : > { %8761 = vmatmul.mubr.msk.bf16.vlgmr.msra.gmra.mrb[40].mxu1 %vm2880_vm8, %v10269_v0 }
 0x511   : > { %3009 = vmatprep.mubr.bf16.mxu1 %v13382_v23  ;;  %3516 = vmatpush1.bf16.msra.mxu1 %v10271_v37 }
 0x512   : > { %3517 = vmatprep.subr.bf16.mxu1 %v10276_v42 }
 0x515   : > { %3518 = vmatpush1.bf16.msra.mxu1 %v10274_v25 }
 0x516   : > { %3519 = vmatprep.subr.bf16.mxu1 %v10279_v2 }
 0x518   : > { %8762 = vmatmul.mubr.msk.bf16.gmra.mrb[44].mxu1 %vm2880_vm8, %v10270_v19 }
 0x519   : > { %3520 = vmatpush1.bf16.msra.mxu1 %v10277_v5 }
 0x51a   : > { %3521 = vmatprep.subr.bf16.mxu1 %v10282_v39 }
 0x51d   : > { %3522 = vmatpush1.bf16.msra.mxu1 %v10280_v32 }
 0x51e   : > { %3523 = vmatprep.subr.bf16.mxu1 %v10285_v43 }
 0x521   : > { %3524 = vmatpush1.bf16.msra.mxu1 %v10283_v54 }
 0x522   : > { %3525 = vmatprep.subr.bf16.mxu1 %v10288_v60 }
 0x525   : > { %3526 = vmatpush1.bf16.msra.mxu1 %v10286_v52 }
 0x526   : > { %3527 = vmatprep.subr.bf16.mxu1 %v10291_v27 }
 0x529   : > { %3528 = vmatpush1.bf16.msra.mxu1 %v10289_v8 }
 0x52a   : > { %3529 = vmatprep.subr.bf16.mxu1 %v10294_v6 }
 0x52d   : > { %3530 = vmatpush1.bf16.msra.mxu1 %v10292_v53 }
 0x52e   : > { %3531 = vmatprep.subr.bf16.mxu1 %v10297_v44 }
 0x531   : > { %3532 = vmatpush1.bf16.msra.mxu1 %v10295_v62 }
 0x532   : > { %3533 = vmatprep.subr.bf16.mxu1 %v10300_v24 }
 0x535   : > { %3534 = vmatpush1.bf16.msra.mxu1 %v10298_v15 }
 0x536   : > { %3535 = vmatprep.subr.bf16.mxu1 %v10303_v58 }
 0x539   : > { %3536 = vmatpush1.bf16.msra.mxu1 %v10301_v1 }
 0x53a   : > { %3537 = vmatprep.subr.bf16.mxu1 %v10306_v10 }
 0x53d   : > { %3538 = vmatpush1.bf16.msra.mxu1 %v10304_v20  ;;  %v10319_v20 = vld [vmem:[#allocation13 + $0x208] ss:$16 sps:$4 sm:$0xff]  }
 0x53e   : > { %3539 = vmatprep.subr.bf16.mxu1 %v10309_v34 }
 0x541   : > { %3540 = vmatpush1.bf16.msra.mxu1 %v10307_v26 }
 0x542   : > { %3541 = vmatprep.subr.bf16.mxu1 %v10312_v36 }
 0x545   : > { %3542 = vmatpush1.bf16.msra.mxu1 %v10310_v11 }
 0x546   : > { %3543 = vmatprep.subr.bf16.mxu1 %v10315_v31 }
 0x549   : > { %3544 = vmatpush1.bf16.msra.mxu1 %v10313_v40  ;;  %v10324_v40 = vld [vmem:[#allocation13 + $0x22c] ss:$16 sps:$4 sm:$0xff]  }
 0x54a   : > { %3545 = vmatprep.subr.bf16.mxu1 %v10318_v33 }
 0x54d   : > { %3546 = vmatpush1.bf16.msra.mxu1 %v10316_v18  ;;  %v10322_v18 = vld [vmem:[#allocation13 + $0x228] ss:$16 sps:$4 sm:$0xff]  }
 0x54e   : > { %3566 = vmatprep.subr.bf16.mxu1 %v10321_v35  ;;  %v10327_v35 = vld [vmem:[#allocation13 + $0x24c] ss:$16 sps:$4 sm:$0xff]  }
 0x5d3   : > { %v2928_v46 = vpop.f32.mrb[32].mxu1 }
 0x5d4   : > { %v2930_v4 = vpop.f32.mrb[33].mxu1 }
 0x5d5   : > { %v2932_v30 = vpop.f32.mrb[34].mxu1 }
 0x5d6   : > { %v2934_v47 = vpop.f32.mrb[35].mxu1 }
 0x5db   : > { %v2938_v61 = vpop.f32.mrb[36].mxu1 }
 0x5dc   : > { %v2940_v59 = vpop.f32.mrb[37].mxu1 }
 0x5dd   : > { %v2942_v56 = vpop.f32.mrb[38].mxu1 }
 0x5de   : > { %v2944_v16 = vpop.f32.mrb[39].mxu1 }
 0x5e3   : > { %v3001_v28 = vpop.f32.mrb[40].mxu1 }
 0x5e4   : > { %v3020_v22 = vmax.f32 %v2928_v46, %v3001_v28  ;;  %v3003_v3 = vpop.f32.mrb[41].mxu1  ;;  %v10325_v46 = vld [vmem:[#allocation13 + $0x248] ss:$16 sps:$4 sm:$0xff]   ;;  %v10339_v28 = vld [vmem:[#allocation13 + $0x2cc] ss:$16 sps:$4 sm:$0xff]  }
 0x5e5   : > { %v3021_v29 = vmax.f32 %v2930_v4, %v3003_v3  ;;  %v3005_v7 = vpop.f32.mrb[42].mxu1  ;;  %v10342_v3 = vld [vmem:[#allocation13 + $0x2ec] ss:$16 sps:$4 sm:$0xff]  }
 0x5e6   : > { %v3022_v49 = vmax.f32 %v2932_v30, %v3005_v7  ;;  %v3007_v17 = vpop.f32.mrb[43].mxu1  ;;  %v10330_v30 = vld [vmem:[#allocation13 + $0x26c] ss:$16 sps:$4 sm:$0xff]  }
 0x5e7   : > { %v3023_v38 = vmax.f32 %v2934_v47, %v3007_v17  ;;  %v10328_v47 = vld [vmem:[#allocation13 + $0x268] ss:$16 sps:$4 sm:$0xff]   ;;  %v10345_v7 = vld [vmem:[#allocation13 + $0x30c] ss:$16 sps:$4 sm:$0xff]  }
 0x5e8   : > { %v12889_v41 = vpack.c.bf16 %v3022_v49, %v3020_v22  ;;  %v10337_v22 = vld [vmem:[#allocation13 + $0x2c8] ss:$16 sps:$4 sm:$0xff]   ;;  %v10348_v17 = vld [vmem:[#allocation13 + $0x32c] ss:$16 sps:$4 sm:$0xff]  }
 0x5e9   : > { %v12891_v55 = vpack.c.bf16 %v3023_v38, %v3021_v29  ;;  %v10340_v29 = vld [vmem:[#allocation13 + $0x2e8] ss:$16 sps:$4 sm:$0xff]  }
 0x5ea   : > { %v3162_v21 = vshrl.u32 %v12889_v41, 16  ;;  %v3164_v48 = vshll.u32 %v12889_v41, 16  ;;  %v10343_v49 = vld [vmem:[#allocation13 + $0x308] ss:$16 sps:$4 sm:$0xff]  }
 0x5eb   : > { %v3011_v50 = vpop.f32.mrb[44].mxu1  ;;  %v3174_v12 = vshrl.u32 %v12891_v55, 16  ;;  %v3176_v9 = vshll.u32 %v12891_v55, 16  ;;  %v10346_v38 = vld [vmem:[#allocation13 + $0x328] ss:$16 sps:$4 sm:$0xff]  }
 0x5ec   : > { %v3024_v63 = vmax.f32 %v2938_v61, %v3011_v50  ;;  %v3013_v13 = vpop.f32.mrb[45].mxu1  ;;  %v12897_v51 = vrot.slane %v3162_v21, 1  ;;  %v12899_v45 = vrot.slane %v3164_v48, 2  ;;  %v3166_v52 = vrot.slane %v3164_v48, 1  ;;  %v10333_v61 = vld [vmem:[#allocation13 + $0x28c] ss:$16 sps:$4 sm:$0xff]  }
 0x5ed   : > { %v3025_v0 = vmax.f32 %v2940_v59, %v3013_v13  ;;  %v3015_v37 = vpop.f32.mrb[46].mxu1  ;;  %v12901_v42 = vrot.slane %v3174_v12, 1  ;;  %v12903_v25 = vrot.slane %v3176_v9, 2  ;;  %v3178_v60 = vrot.slane %v3176_v9, 1  ;;  %v10331_v59 = vld [vmem:[#allocation13 + $0x288] ss:$16 sps:$4 sm:$0xff]  }
 0x5ee   : > { %v3026_v2 = vmax.f32 %v2942_v56, %v3015_v37  ;;  %v3017_v19 = vpop.f32.mrb[47].mxu1  ;;  %v4619_v5 = vor.u32 %v12899_v45, %v12897_v51  ;;  %v3167_v10 = vor.u32 %v3166_v52, %v3162_v21  ;;  %v10336_v56 = vld [vmem:[#allocation13 + $0x2ac] ss:$16 sps:$4 sm:$0xff]   ;;  %v10349_v48 = vld [vmem:[#allocation13 + $0x348] ss:$16 sps:$4 sm:$0xff]  }
 0x5ef   : > { %v3027_v39 = vmax.f32 %v2944_v16, %v3017_v19  ;;  %v4626_v32 = vor.u32 %v12903_v25, %v12901_v42  ;;  %v3179_v24 = vor.u32 %v3178_v60, %v3174_v12  ;;  %v10334_v16 = vld [vmem:[#allocation13 + $0x2a8] ss:$16 sps:$4 sm:$0xff]   ;;  %v10351_v21 = vld [vmem:[#allocation13 + $0x34c] ss:$16 sps:$4 sm:$0xff]   ;;  %v10369_v60 = vld [vmem:[#allocation13 + $0x4] ss:$16 sps:$4 sm:$0xff]  }
 0x5f0   : > { %v12909_v43 = vpack.c.bf16 %v3026_v2, %v3024_v63  ;;  %v10354_v50 = vld [vmem:[#allocation13 + $0x36c] ss:$16 sps:$4 sm:$0xff]   ;;  %v10352_v12 = vld [vmem:[#allocation13 + $0x368] ss:$16 sps:$4 sm:$0xff]   ;;  %v10367_v52 = vld [vmem:[#allocation13] ss:$16 sps:$4 sm:$0xff]  }
 0x5f1   : > { %v12911_v54 = vpack.c.bf16 %v3027_v39, %v3025_v0  ;;  %v10357_v9 = vld [vmem:[#allocation13 + $0x38c] ss:$16 sps:$4 sm:$0xff]   ;;  %v10355_v63 = vld [vmem:[#allocation13 + $0x388] ss:$16 sps:$4 sm:$0xff]   ;;  %v10582_v42 = vld [vmem:[#allocation13 + $0x6e4] ss:$16 sps:$4 sm:$0xff]  }
 0x5f2   : > { %v3169_v27 = vshll.u32 %v12909_v43, 16  ;;  %v3185_v8 = vshrl.u32 %v12909_v43, 16  ;;  %v10360_v13 = vld [vmem:[#allocation13 + $0x3ac] ss:$16 sps:$4 sm:$0xff]   ;;  %v10358_v0 = vld [vmem:[#allocation13 + $0x3a8] ss:$16 sps:$4 sm:$0xff]  }
 0x5f3   : > { %v3181_v53 = vshll.u32 %v12911_v54, 16  ;;  %v3188_v6 = vshrl.u32 %v12911_v54, 16  ;;  %v10363_v37 = vld [vmem:[#allocation13 + $0x3cc] ss:$16 sps:$4 sm:$0xff]   ;;  %v10361_v2 = vld [vmem:[#allocation13 + $0x3c8] ss:$16 sps:$4 sm:$0xff]  }
 0x5f4   : > { %v3171_v44 = vrot.slane %v3169_v27, 1  ;;  %v4620_v62 = vrot.slane %v3185_v8, 1  ;;  %v4621_v15 = vrot.slane %v3169_v27, 2  ;;  %v10366_v19 = vld [vmem:[#allocation13 + $0x3ec] ss:$16 sps:$4 sm:$0xff]  }
 0x5f5   : > { %v3183_v58 = vrot.slane %v3181_v53, 1  ;;  %v4627_v1 = vrot.slane %v3188_v6, 1  ;;  %v4628_v34 = vrot.slane %v3181_v53, 2  ;;  %v10364_v39 = vld [vmem:[#allocation13 + $0x3e8] ss:$16 sps:$4 sm:$0xff]  }
 0x5f6   : > { %v12917_v26 = vor.u32 %v4621_v15, %v4620_v62  ;;  %v12923_v31 = vsel %vm748_vm1, %v3167_v10, %v3171_v44  ;;  %v12929_v4 = vor.u32 %v3185_v8, %v3171_v44  ;;  %v10372_v27 = vld [vmem:[#allocation13 + $0x24] ss:$16 sps:$4 sm:$0xff]   ;;  %v10370_v8 = vld [vmem:[#allocation13 + $0x20] ss:$16 sps:$4 sm:$0xff]   ;;  %v10616_v51 = vld [vmem:[#allocation13 + $0x668] ss:$16 sps:$4 sm:$0xff]  }
 0x5f7   : > { %v3184_v11 = vsel %vm748_vm1, %v3179_v24, %v3183_v58  ;;  %v12920_v36 = vor.u32 %v3188_v6, %v3183_v58  ;;  %v12925_v33 = vor.u32 %v4628_v34, %v4627_v1  ;;  %v10375_v53 = vld [vmem:[#allocation13 + $0x44] ss:$16 sps:$4 sm:$0xff]   ;;  %v10373_v6 = vld [vmem:[#allocation13 + $0x40] ss:$16 sps:$4 sm:$0xff]   ;;  %v10621_v45 = vld [vmem:[#allocation13 + $0x68c] ss:$16 sps:$4 sm:$0xff]  }
 0x5f8   : > { %3547 = vmatprep.mubr.bf16.mxu1 %v3184_v11  ;;  %v10378_v44 = vld [vmem:[#allocation13 + $0x64] ss:$16 sps:$4 sm:$0xff]   ;;  %v10376_v62 = vld [vmem:[#allocation13 + $0x60] ss:$16 sps:$4 sm:$0xff]  }
 0x5f9   : > { %3548 = vmatmul.mubr.bf16.vlgmr.msra.gmra.mrb[48].mxu1 %v12923_v31  ;;  %v10381_v15 = vld [vmem:[#allocation13 + $0x84] ss:$16 sps:$4 sm:$0xff]   ;;  %v10379_v24 = vld [vmem:[#allocation13 + $0x80] ss:$16 sps:$4 sm:$0xff]  }
 0x5fa   : > { %3567 = vmatpush1.bf16.msra.mxu1 %v10319_v20  ;;  %3557 = vmatprep.mubr.bf16.mxu1 %v12920_v36  ;;  %v10384_v58 = vld [vmem:[#allocation13 + $0xa4] ss:$16 sps:$4 sm:$0xff]   ;;  %v10382_v1 = vld [vmem:[#allocation13 + $0xa0] ss:$16 sps:$4 sm:$0xff]  }
 0x5fb   : > { %3568 = vmatprep.subr.bf16.mxu1 %v10324_v40  ;;  %v10387_v20 = vld [vmem:[#allocation13 + $0xc4] ss:$16 sps:$4 sm:$0xff]   ;;  %v10385_v10 = vld [vmem:[#allocation13 + $0xc0] ss:$16 sps:$4 sm:$0xff]  }
 0x5fc   : > { %v10390_v34 = vld [vmem:[#allocation13 + $0xe4] ss:$16 sps:$4 sm:$0xff]   ;;  %v10391_v40 = vld [vmem:[#allocation13 + $0x100] ss:$16 sps:$4 sm:$0xff]  }
 0x5fd   : > { %v10580_v25 = vld [vmem:[#allocation13 + $0x6e0] ss:$16 sps:$4 sm:$0xff]  }
 0x5fe   : > { %3569 = vmatpush1.bf16.msra.mxu1 %v10322_v18  ;;  %v10394_v18 = vld [vmem:[#allocation13 + $0x120] ss:$16 sps:$4 sm:$0xff]  }
 0x5ff   : > { %3570 = vmatprep.subr.bf16.mxu1 %v10327_v35  ;;  %v10399_v35 = vld [vmem:[#allocation13 + $0x144] ss:$16 sps:$4 sm:$0xff]  }
 0x601   : > { %3558 = vmatmul.mubr.bf16.gmra.mrb[52].mxu1 %v12929_v4 }
 0x602   : > { %3571 = vmatpush1.bf16.msra.mxu1 %v10325_v46  ;;  %3598 = vmatprep.mubr.bf16.mxu1 %v3184_v11  ;;  %v10388_v11 = vld [vmem:[#allocation13 + $0xe0] ss:$16 sps:$4 sm:$0xff]  }
 0x603   : > { %3572 = vmatprep.subr.bf16.mxu1 %v10330_v30  ;;  %v10397_v46 = vld [vmem:[#allocation13 + $0x140] ss:$16 sps:$4 sm:$0xff]  }
 0x604   : > { %v10400_v30 = vld [vmem:[#allocation13 + $0x160] ss:$16 sps:$4 sm:$0xff]  }
 0x606   : > { %3573 = vmatpush1.bf16.msra.mxu1 %v10328_v47  ;;  %v10405_v47 = vld [vmem:[#allocation13 + $0x184] ss:$16 sps:$4 sm:$0xff]  }
 0x607   : > { %3574 = vmatprep.subr.bf16.mxu1 %v10333_v61  ;;  %v10403_v61 = vld [vmem:[#allocation13 + $0x180] ss:$16 sps:$4 sm:$0xff]  }
 0x60a   : > { %3575 = vmatpush1.bf16.msra.mxu1 %v10331_v59  ;;  %v10408_v59 = vld [vmem:[#allocation13 + $0x1a4] ss:$16 sps:$4 sm:$0xff]  }
 0x60b   : > { %3576 = vmatprep.subr.bf16.mxu1 %v10336_v56  ;;  %v10406_v56 = vld [vmem:[#allocation13 + $0x1a0] ss:$16 sps:$4 sm:$0xff]  }
 0x60e   : > { %3577 = vmatpush1.bf16.msra.mxu1 %v10334_v16  ;;  %v10411_v16 = vld [vmem:[#allocation13 + $0x1c4] ss:$16 sps:$4 sm:$0xff]  }
 0x60f   : > { %3578 = vmatprep.subr.bf16.mxu1 %v10339_v28  ;;  %v10409_v28 = vld [vmem:[#allocation13 + $0x1c0] ss:$16 sps:$4 sm:$0xff]  }
 0x612   : > { %3579 = vmatpush1.bf16.msra.mxu1 %v10337_v22  ;;  %v10414_v22 = vld [vmem:[#allocation13 + $0x1e4] ss:$16 sps:$4 sm:$0xff]  }
 0x613   : > { %3580 = vmatprep.subr.bf16.mxu1 %v10342_v3  ;;  %v10412_v3 = vld [vmem:[#allocation13 + $0x1e0] ss:$16 sps:$4 sm:$0xff]  }
 0x616   : > { %3581 = vmatpush1.bf16.msra.mxu1 %v10340_v29  ;;  %v10417_v29 = vld [vmem:[#allocation13 + $0xc] ss:$16 sps:$4 sm:$0xff]  }
 0x617   : > { %3582 = vmatprep.subr.bf16.mxu1 %v10345_v7  ;;  %v10415_v7 = vld [vmem:[#allocation13 + $0x8] ss:$16 sps:$4 sm:$0xff]  }
 0x61a   : > { %3583 = vmatpush1.bf16.msra.mxu1 %v10343_v49  ;;  %v10420_v49 = vld [vmem:[#allocation13 + $0x2c] ss:$16 sps:$4 sm:$0xff]  }
 0x61b   : > { %3584 = vmatprep.subr.bf16.mxu1 %v10348_v17  ;;  %v10418_v17 = vld [vmem:[#allocation13 + $0x28] ss:$16 sps:$4 sm:$0xff]  }
 0x61e   : > { %3585 = vmatpush1.bf16.msra.mxu1 %v10346_v38  ;;  %v10423_v38 = vld [vmem:[#allocation13 + $0x4c] ss:$16 sps:$4 sm:$0xff]  }
 0x61f   : > { %3586 = vmatprep.subr.bf16.mxu1 %v10351_v21  ;;  %v10421_v21 = vld [vmem:[#allocation13 + $0x48] ss:$16 sps:$4 sm:$0xff]  }
 0x622   : > { %3587 = vmatpush1.bf16.msra.mxu1 %v10349_v48  ;;  %v10426_v48 = vld [vmem:[#allocation13 + $0x6c] ss:$16 sps:$4 sm:$0xff]  }
 0x623   : > { %3588 = vmatprep.subr.bf16.mxu1 %v10354_v50  ;;  %v10424_v50 = vld [vmem:[#allocation13 + $0x68] ss:$16 sps:$4 sm:$0xff]  }
 0x626   : > { %3589 = vmatpush1.bf16.msra.mxu1 %v10352_v12  ;;  %v10429_v12 = vld [vmem:[#allocation13 + $0x8c] ss:$16 sps:$4 sm:$0xff]  }
 0x627   : > { %3590 = vmatprep.subr.bf16.mxu1 %v10357_v9  ;;  %v10427_v9 = vld [vmem:[#allocation13 + $0x88] ss:$16 sps:$4 sm:$0xff]  }
 0x62a   : > { %3591 = vmatpush1.bf16.msra.mxu1 %v10355_v63  ;;  %v10432_v63 = vld [vmem:[#allocation13 + $0xac] ss:$16 sps:$4 sm:$0xff]  }
 0x62b   : > { %3592 = vmatprep.subr.bf16.mxu1 %v10360_v13  ;;  %v10430_v13 = vld [vmem:[#allocation13 + $0xa8] ss:$16 sps:$4 sm:$0xff]  }
 0x62e   : > { %3593 = vmatpush1.bf16.msra.mxu1 %v10358_v0  ;;  %v10435_v0 = vld [vmem:[#allocation13 + $0xcc] ss:$16 sps:$4 sm:$0xff]  }
 0x62f   : > { %3594 = vmatprep.subr.bf16.mxu1 %v10363_v37  ;;  %v10433_v37 = vld [vmem:[#allocation13 + $0xc8] ss:$16 sps:$4 sm:$0xff]  }
 0x632   : > { %3595 = vmatpush1.bf16.msra.mxu1 %v10361_v2  ;;  %v10438_v2 = vld [vmem:[#allocation13 + $0xec] ss:$16 sps:$4 sm:$0xff]  }
 0x633   : > { %3596 = vmatprep.subr.bf16.mxu1 %v10366_v19  ;;  %v10436_v19 = vld [vmem:[#allocation13 + $0xe8] ss:$16 sps:$4 sm:$0xff]  }
 0x636   : > { %3597 = vmatpush1.bf16.msra.mxu1 %v10364_v39  ;;  %v10441_v39 = vld [vmem:[#allocation13 + $0x10c] ss:$16 sps:$4 sm:$0xff]  }
 0x637   : > { %3937 = vmatprep.subr.bf16.mxu1 %v10369_v60  ;;  %v10439_v60 = vld [vmem:[#allocation13 + $0x108] ss:$16 sps:$4 sm:$0xff]  }
 0x639   : > { %3599 = vmatmul.mubr.bf16.vlgmr.msra.gmra.mrb[56].mxu1 %v12923_v31  ;;  %v10396_v31 = vld [vmem:[#allocation13 + $0x124] ss:$16 sps:$4 sm:$0xff]  }
 0x63a   : > { %3608 = vmatprep.mubr.bf16.mxu1 %v12920_v36  ;;  %3938 = vmatpush1.bf16.msra.mxu1 %v10367_v52  ;;  %v10393_v36 = vld [vmem:[#allocation13 + $0x104] ss:$16 sps:$4 sm:$0xff]   ;;  %v10444_v52 = vld [vmem:[#allocation13 + $0x12c] ss:$16 sps:$4 sm:$0xff]  }
 0x63b   : > { %3939 = vmatprep.subr.bf16.mxu1 %v10372_v27  ;;  %v10442_v27 = vld [vmem:[#allocation13 + $0x128] ss:$16 sps:$4 sm:$0xff]  }
 0x63e   : > { %3940 = vmatpush1.bf16.msra.mxu1 %v10370_v8  ;;  %v10447_v8 = vld [vmem:[#allocation13 + $0x14c] ss:$16 sps:$4 sm:$0xff]  }
 0x63f   : > { %3941 = vmatprep.subr.bf16.mxu1 %v10375_v53  ;;  %v10445_v53 = vld [vmem:[#allocation13 + $0x148] ss:$16 sps:$4 sm:$0xff]  }
 0x641   : > { %3609 = vmatmul.mubr.bf16.gmra.mrb[60].mxu1 %v12929_v4  ;;  %v10402_v4 = vld [vmem:[#allocation13 + $0x164] ss:$16 sps:$4 sm:$0xff]  }
 0x642   : > { %3942 = vmatpush1.bf16.msra.mxu1 %v10373_v6  ;;  %3969 = vmatprep.mubr.bf16.mxu1 %v12891_v55  ;;  %v10450_v6 = vld [vmem:[#allocation13 + $0x16c] ss:$16 sps:$4 sm:$0xff]  }
 0x643   : > { %3943 = vmatprep.subr.bf16.mxu1 %v10378_v44  ;;  %v10448_v44 = vld [vmem:[#allocation13 + $0x168] ss:$16 sps:$4 sm:$0xff]  }
 0x646   : > { %3944 = vmatpush1.bf16.msra.mxu1 %v10376_v62  ;;  %v10453_v62 = vld [vmem:[#allocation13 + $0x18c] ss:$16 sps:$4 sm:$0xff]  }
 0x647   : > { %3945 = vmatprep.subr.bf16.mxu1 %v10381_v15  ;;  %v10451_v15 = vld [vmem:[#allocation13 + $0x188] ss:$16 sps:$4 sm:$0xff]  }
 0x64a   : > { %3946 = vmatpush1.bf16.msra.mxu1 %v10379_v24  ;;  %v10456_v24 = vld [vmem:[#allocation13 + $0x1ac] ss:$16 sps:$4 sm:$0xff]  }
 0x64b   : > { %3947 = vmatprep.subr.bf16.mxu1 %v10384_v58  ;;  %v10454_v58 = vld [vmem:[#allocation13 + $0x1a8] ss:$16 sps:$4 sm:$0xff]  }
 0x64e   : > { %3948 = vmatpush1.bf16.msra.mxu1 %v10382_v1  ;;  %v10459_v1 = vld [vmem:[#allocation13 + $0x1cc] ss:$16 sps:$4 sm:$0xff]  }
 0x64f   : > { %3949 = vmatprep.subr.bf16.mxu1 %v10387_v20  ;;  %v10457_v20 = vld [vmem:[#allocation13 + $0x1c8] ss:$16 sps:$4 sm:$0xff]  }
 0x652   : > { %3950 = vmatpush1.bf16.msra.mxu1 %v10385_v10  ;;  %v10462_v10 = vld [vmem:[#allocation13 + $0x1ec] ss:$16 sps:$4 sm:$0xff]  }
 0x653   : > { %3951 = vmatprep.subr.bf16.mxu1 %v10390_v34  ;;  %v10460_v34 = vld [vmem:[#allocation13 + $0x1e8] ss:$16 sps:$4 sm:$0xff]  }
 0x656   : > { %3952 = vmatpush1.bf16.msra.mxu1 %v10388_v11  ;;  %v10465_v11 = vld [vmem:[#allocation13 + $0x404] ss:$16 sps:$4 sm:$0xff]  }
 0x657   : > { %3953 = vmatprep.subr.bf16.mxu1 %v10393_v36  ;;  %v10463_v36 = vld [vmem:[#allocation13 + $0x400] ss:$16 sps:$4 sm:$0xff]  }
 0x65a   : > { %3954 = vmatpush1.bf16.msra.mxu1 %v10391_v40  ;;  %v10468_v40 = vld [vmem:[#allocation13 + $0x424] ss:$16 sps:$4 sm:$0xff]  }
 0x65b   : > { %3955 = vmatprep.subr.bf16.mxu1 %v10396_v31  ;;  %v10466_v31 = vld [vmem:[#allocation13 + $0x420] ss:$16 sps:$4 sm:$0xff]  }
 0x65e   : > { %3956 = vmatpush1.bf16.msra.mxu1 %v10394_v18  ;;  %v10471_v18 = vld [vmem:[#allocation13 + $0x444] ss:$16 sps:$4 sm:$0xff]  }
 0x65f   : > { %3957 = vmatprep.subr.bf16.mxu1 %v10399_v35  ;;  %v12943_v35 = vrot.slane %v12911_v54, 1 }
 0x662   : > { %3958 = vmatpush1.bf16.msra.mxu1 %v10397_v46  ;;  %v10469_v46 = vld [vmem:[#allocation13 + $0x440] ss:$16 sps:$4 sm:$0xff]  }
 0x663   : > { %3959 = vmatprep.subr.bf16.mxu1 %v10402_v4  ;;  %v4111_v4 = vrot.slane %v12891_v55, 1 }
 0x666   : > { %3960 = vmatpush1.bf16.msra.mxu1 %v10400_v30  ;;  %v10474_v30 = vld [vmem:[#allocation13 + $0x464] ss:$16 sps:$4 sm:$0xff]  }
 0x667   : > { %3961 = vmatprep.subr.bf16.mxu1 %v10405_v47  ;;  %v12949_v47 = vsel %vm1269_vm5, %v4111_v4, %v12943_v35  ;;  %v10529_v4 = vld [vmem:[#allocation13 + $0x4c8] ss:$16 sps:$4 sm:$0xff]  }
 0x66a   : > { %3962 = vmatpush1.bf16.msra.mxu1 %v10403_v61  ;;  %v10472_v61 = vld [vmem:[#allocation13 + $0x460] ss:$16 sps:$4 sm:$0xff]  }
 0x66b   : > { %3963 = vmatprep.subr.bf16.mxu1 %v10408_v59  ;;  %v10477_v59 = vld [vmem:[#allocation13 + $0x484] ss:$16 sps:$4 sm:$0xff]  }
 0x66e   : > { %3964 = vmatpush1.bf16.msra.mxu1 %v10406_v56  ;;  %v10475_v56 = vld [vmem:[#allocation13 + $0x480] ss:$16 sps:$4 sm:$0xff]  }
 0x66f   : > { %3965 = vmatprep.subr.bf16.mxu1 %v10411_v16  ;;  %v10480_v16 = vld [vmem:[#allocation13 + $0x4a4] ss:$16 sps:$4 sm:$0xff]  }
 0x672   : > { %3966 = vmatpush1.bf16.msra.mxu1 %v10409_v28  ;;  %v10478_v28 = vld [vmem:[#allocation13 + $0x4a0] ss:$16 sps:$4 sm:$0xff]  }
 0x673   : > { %3967 = vmatprep.subr.bf16.mxu1 %v10414_v22  ;;  %v10483_v22 = vld [vmem:[#allocation13 + $0x4c4] ss:$16 sps:$4 sm:$0xff]  }
 0x676   : > { %3968 = vmatpush1.bf16.msra.mxu1 %v10412_v3  ;;  %v10481_v3 = vld [vmem:[#allocation13 + $0x4c0] ss:$16 sps:$4 sm:$0xff]  }
 0x677   : > { %3988 = vmatprep.subr.bf16.mxu1 %v10417_v29  ;;  %v10486_v29 = vld [vmem:[#allocation13 + $0x4e4] ss:$16 sps:$4 sm:$0xff]  }
 0x679   : > { %3970 = vmatmul.mubr.bf16.vlgmr.msra.gmra.mrb[48].mxu1 %v12889_v41 }
 0x67a   : > { %3979 = vmatprep.mubr.bf16.mxu1 %v12911_v54  ;;  %3989 = vmatpush1.bf16.msra.mxu1 %v10415_v7  ;;  %v10484_v7 = vld [vmem:[#allocation13 + $0x4e0] ss:$16 sps:$4 sm:$0xff]  }
 0x67b   : > { %3990 = vmatprep.subr.bf16.mxu1 %v10420_v49  ;;  %v10489_v49 = vld [vmem:[#allocation13 + $0x504] ss:$16 sps:$4 sm:$0xff]  }
 0x67e   : > { %3991 = vmatpush1.bf16.msra.mxu1 %v10418_v17 }
 0x67f   : > { %3992 = vmatprep.subr.bf16.mxu1 %v10423_v38 }
 0x681   : > { %3980 = vmatmul.mubr.bf16.gmra.mrb[64].mxu1 %v12909_v43 }
 0x682   : > { %3993 = vmatpush1.bf16.msra.mxu1 %v10421_v21  ;;  %4020 = vmatprep.mubr.bf16.mxu1 %v12891_v55 }
 0x683   : > { %3994 = vmatprep.subr.bf16.mxu1 %v10426_v48  ;;  %v10487_v48 = vld [vmem:[#allocation13 + $0x500] ss:$16 sps:$4 sm:$0xff]  }
 0x686   : > { %3995 = vmatpush1.bf16.msra.mxu1 %v10424_v50 }
 0x687   : > { %3996 = vmatprep.subr.bf16.mxu1 %v10429_v12  ;;  %v10492_v12 = vld [vmem:[#allocation13 + $0x524] ss:$16 sps:$4 sm:$0xff]  }
 0x68a   : > { %3997 = vmatpush1.bf16.msra.mxu1 %v10427_v9  ;;  %v10490_v9 = vld [vmem:[#allocation13 + $0x520] ss:$16 sps:$4 sm:$0xff]  }
 0x68b   : > { %3998 = vmatprep.subr.bf16.mxu1 %v10432_v63  ;;  %v10495_v63 = vld [vmem:[#allocation13 + $0x544] ss:$16 sps:$4 sm:$0xff]  }
 0x68e   : > { %3999 = vmatpush1.bf16.msra.mxu1 %v10430_v13  ;;  %v10493_v13 = vld [vmem:[#allocation13 + $0x540] ss:$16 sps:$4 sm:$0xff]  }
 0x68f   : > { %4000 = vmatprep.subr.bf16.mxu1 %v10435_v0  ;;  %v10498_v0 = vld [vmem:[#allocation13 + $0x564] ss:$16 sps:$4 sm:$0xff]  }
 0x692   : > { %4001 = vmatpush1.bf16.msra.mxu1 %v10433_v37  ;;  %v10496_v37 = vld [vmem:[#allocation13 + $0x560] ss:$16 sps:$4 sm:$0xff]  }
 0x693   : > { %4002 = vmatprep.subr.bf16.mxu1 %v10438_v2  ;;  %v10501_v2 = vld [vmem:[#allocation13 + $0x584] ss:$16 sps:$4 sm:$0xff]  }
 0x696   : > { %4003 = vmatpush1.bf16.msra.mxu1 %v10436_v19  ;;  %v10499_v19 = vld [vmem:[#allocation13 + $0x580] ss:$16 sps:$4 sm:$0xff]  }
 0x697   : > { %4004 = vmatprep.subr.bf16.mxu1 %v10441_v39  ;;  %v10504_v39 = vld [vmem:[#allocation13 + $0x5a4] ss:$16 sps:$4 sm:$0xff]  }
 0x69a   : > { %4005 = vmatpush1.bf16.msra.mxu1 %v10439_v60  ;;  %v10502_v60 = vld [vmem:[#allocation13 + $0x5a0] ss:$16 sps:$4 sm:$0xff]  }
 0x69b   : > { %4006 = vmatprep.subr.bf16.mxu1 %v10444_v52  ;;  %v10507_v52 = vld [vmem:[#allocation13 + $0x5c4] ss:$16 sps:$4 sm:$0xff]  }
 0x69e   : > { %4007 = vmatpush1.bf16.msra.mxu1 %v10442_v27  ;;  %v10505_v27 = vld [vmem:[#allocation13 + $0x5c0] ss:$16 sps:$4 sm:$0xff]  }
 0x69f   : > { %4008 = vmatprep.subr.bf16.mxu1 %v10447_v8  ;;  %v10510_v8 = vld [vmem:[#allocation13 + $0x5e4] ss:$16 sps:$4 sm:$0xff]  }
 0x6a2   : > { %4009 = vmatpush1.bf16.msra.mxu1 %v10445_v53  ;;  %v10508_v53 = vld [vmem:[#allocation13 + $0x5e0] ss:$16 sps:$4 sm:$0xff]  }
 0x6a3   : > { %4010 = vmatprep.subr.bf16.mxu1 %v10450_v6  ;;  %v10513_v6 = vld [vmem:[#allocation13 + $0x40c] ss:$16 sps:$4 sm:$0xff]  }
 0x6a6   : > { %4011 = vmatpush1.bf16.msra.mxu1 %v10448_v44  ;;  %v12957_v44 = vrot.slane %v12909_v43, 1 }
 0x6a7   : > { %4012 = vmatprep.subr.bf16.mxu1 %v10453_v62  ;;  %v4108_v62 = vrot.slane %v12889_v41, 1 }
 0x6aa   : > { %4013 = vmatpush1.bf16.msra.mxu1 %v10451_v15  ;;  %v10511_v15 = vld [vmem:[#allocation13 + $0x408] ss:$16 sps:$4 sm:$0xff]  }
 0x6ab   : > { %4014 = vmatprep.subr.bf16.mxu1 %v10456_v24  ;;  %v10516_v24 = vld [vmem:[#allocation13 + $0x42c] ss:$16 sps:$4 sm:$0xff]  }
 0x6ae   : > { %4015 = vmatpush1.bf16.msra.mxu1 %v10454_v58  ;;  %v12962_v58 = vsel %vm1269_vm5, %v4108_v62, %v12957_v44  ;;  %v10573_v62 = vld [vmem:[#allocation13 + $0x684] ss:$16 sps:$4 sm:$0xff]  }
 0x6af   : > { %4016 = vmatprep.subr.bf16.mxu1 %v10459_v1  ;;  %v10514_v1 = vld [vmem:[#allocation13 + $0x428] ss:$16 sps:$4 sm:$0xff]  }
 0x6b2   : > { %4017 = vmatpush1.bf16.msra.mxu1 %v10457_v20  ;;  %v10519_v20 = vld [vmem:[#allocation13 + $0x44c] ss:$16 sps:$4 sm:$0xff]  }
 0x6b3   : > { %4018 = vmatprep.subr.bf16.mxu1 %v10462_v10  ;;  %v10517_v10 = vld [vmem:[#allocation13 + $0x448] ss:$16 sps:$4 sm:$0xff]  }
 0x6b6   : > { %4019 = vmatpush1.bf16.msra.mxu1 %v10460_v34  ;;  %v10522_v34 = vld [vmem:[#allocation13 + $0x46c] ss:$16 sps:$4 sm:$0xff]  }
 0x6b7   : > { %4438 = vmatprep.subr.bf16.mxu1 %v10465_v11  ;;  %v10520_v11 = vld [vmem:[#allocation13 + $0x468] ss:$16 sps:$4 sm:$0xff]  }
 0x6b9   : > { %4021 = vmatmul.mubr.bf16.vlgmr.msra.gmra.mrb[56].mxu1 %v12889_v41 }
 0x6ba   : > { %4030 = vmatprep.mubr.bf16.mxu1 %v12911_v54  ;;  %4439 = vmatpush1.bf16.msra.mxu1 %v10463_v36  ;;  %v10525_v36 = vld [vmem:[#allocation13 + $0x48c] ss:$16 sps:$4 sm:$0xff]  }
 0x6bb   : > { %4440 = vmatprep.subr.bf16.mxu1 %v10468_v40  ;;  %v10523_v40 = vld [vmem:[#allocation13 + $0x488] ss:$16 sps:$4 sm:$0xff]  }
 0x6be   : > { %4441 = vmatpush1.bf16.msra.mxu1 %v10466_v31  ;;  %v10528_v31 = vld [vmem:[#allocation13 + $0x4ac] ss:$16 sps:$4 sm:$0xff]  }
 0x6bf   : > { %4442 = vmatprep.subr.bf16.mxu1 %v10471_v18  ;;  %v10526_v18 = vld [vmem:[#allocation13 + $0x4a8] ss:$16 sps:$4 sm:$0xff]  }
 0x6c1   : > { %4031 = vmatmul.mubr.bf16.gmra.mrb[68].mxu1 %v12909_v43 }
 0x6c2   : > { %4443 = vmatpush1.bf16.msra.mxu1 %v10469_v46  ;;  %4470 = vmatprep.mubr.bf16.mxu1 %v12949_v47  ;;  %v10531_v46 = vld [vmem:[#allocation13 + $0x4cc] ss:$16 sps:$4 sm:$0xff]  }
 0x6c3   : > { %4444 = vmatprep.subr.bf16.mxu1 %v10474_v30  ;;  %v10534_v30 = vld [vmem:[#allocation13 + $0x4ec] ss:$16 sps:$4 sm:$0xff]  }
 0x6c6   : > { %4445 = vmatpush1.bf16.msra.mxu1 %v10472_v61  ;;  %v10532_v61 = vld [vmem:[#allocation13 + $0x4e8] ss:$16 sps:$4 sm:$0xff]  }
 0x6c7   : > { %4446 = vmatprep.subr.bf16.mxu1 %v10477_v59  ;;  %v10537_v59 = vld [vmem:[#allocation13 + $0x50c] ss:$16 sps:$4 sm:$0xff]  }
 0x6ca   : > { %4447 = vmatpush1.bf16.msra.mxu1 %v10475_v56 }
 0x6cb   : > { %4448 = vmatprep.subr.bf16.mxu1 %v10480_v16 }
 0x6ce   : > { %4449 = vmatpush1.bf16.msra.mxu1 %v10478_v28  ;;  %v10535_v28 = vld [vmem:[#allocation13 + $0x508] ss:$16 sps:$4 sm:$0xff]  }
 0x6cf   : > { %4450 = vmatprep.subr.bf16.mxu1 %v10483_v22 }
 0x6d2   : > { %4451 = vmatpush1.bf16.msra.mxu1 %v10481_v3  ;;  %v10540_v3 = vld [vmem:[#allocation13 + $0x52c] ss:$16 sps:$4 sm:$0xff]  }
 0x6d3   : > { %4452 = vmatprep.subr.bf16.mxu1 %v10486_v29  ;;  %v10538_v29 = vld [vmem:[#allocation13 + $0x528] ss:$16 sps:$4 sm:$0xff]  }
 0x6d4   : > { %v12952_v17 = vpop.f32.mrb[52].mxu1 }
 0x6d5   : > { %v12954_v38 = vpop.f32.mrb[53].mxu1 }
 0x6d6   : > { %4453 = vmatpush1.bf16.msra.mxu1 %v10484_v7  ;;  %v3563_v21 = vpop.f32.mrb[54].mxu1  ;;  %v10543_v7 = vld [vmem:[#allocation13 + $0x54c] ss:$16 sps:$4 sm:$0xff]  }
 0x6d7   : > { %v3564_v50 = vpop.f32.mrb[55].mxu1  ;;  %4454 = vmatprep.subr.bf16.mxu1 %v10489_v49  ;;  %v10541_v49 = vld [vmem:[#allocation13 + $0x548] ss:$16 sps:$4 sm:$0xff]   ;;  %v10546_v21 = vld [vmem:[#allocation13 + $0x56c] ss:$16 sps:$4 sm:$0xff]  }
 0x6d8   : > { %v10549_v50 = vld [vmem:[#allocation13 + $0x58c] ss:$16 sps:$4 sm:$0xff]  }
 0x6da   : > { %4455 = vmatpush1.bf16.msra.mxu1 %v10487_v48  ;;  %v10544_v48 = vld [vmem:[#allocation13 + $0x568] ss:$16 sps:$4 sm:$0xff]  }
 0x6db   : > { %4456 = vmatprep.subr.bf16.mxu1 %v10492_v12  ;;  %v10547_v12 = vld [vmem:[#allocation13 + $0x588] ss:$16 sps:$4 sm:$0xff]  }
 0x6de   : > { %4457 = vmatpush1.bf16.msra.mxu1 %v10490_v9  ;;  %v10552_v9 = vld [vmem:[#allocation13 + $0x5ac] ss:$16 sps:$4 sm:$0xff]  }
 0x6df   : > { %4458 = vmatprep.subr.bf16.mxu1 %v10495_v63  ;;  %v10550_v63 = vld [vmem:[#allocation13 + $0x5a8] ss:$16 sps:$4 sm:$0xff]  }
 0x6e2   : > { %4459 = vmatpush1.bf16.msra.mxu1 %v10493_v13  ;;  %v10555_v13 = vld [vmem:[#allocation13 + $0x5cc] ss:$16 sps:$4 sm:$0xff]  }
 0x6e3   : > { %4460 = vmatprep.subr.bf16.mxu1 %v10498_v0  ;;  %v10553_v0 = vld [vmem:[#allocation13 + $0x5c8] ss:$16 sps:$4 sm:$0xff]  }
 0x6e6   : > { %4461 = vmatpush1.bf16.msra.mxu1 %v10496_v37  ;;  %v10558_v37 = vld [vmem:[#allocation13 + $0x5ec] ss:$16 sps:$4 sm:$0xff]  }
 0x6e7   : > { %4462 = vmatprep.subr.bf16.mxu1 %v10501_v2  ;;  %v10556_v2 = vld [vmem:[#allocation13 + $0x5e8] ss:$16 sps:$4 sm:$0xff]  }
 0x6ea   : > { %4463 = vmatpush1.bf16.msra.mxu1 %v10499_v19  ;;  %v10561_v19 = vld [vmem:[#allocation13 + $0x604] ss:$16 sps:$4 sm:$0xff]  }
 0x6eb   : > { %4464 = vmatprep.subr.bf16.mxu1 %v10504_v39  ;;  %v10559_v39 = vld [vmem:[#allocation13 + $0x600] ss:$16 sps:$4 sm:$0xff]  }
 0x6ee   : > { %4465 = vmatpush1.bf16.msra.mxu1 %v10502_v60  ;;  %v10564_v60 = vld [vmem:[#allocation13 + $0x624] ss:$16 sps:$4 sm:$0xff]  }
 0x6ef   : > { %4466 = vmatprep.subr.bf16.mxu1 %v10507_v52  ;;  %v10562_v52 = vld [vmem:[#allocation13 + $0x620] ss:$16 sps:$4 sm:$0xff]  }
 0x6f2   : > { %4467 = vmatpush1.bf16.msra.mxu1 %v10505_v27  ;;  %v10567_v27 = vld [vmem:[#allocation13 + $0x644] ss:$16 sps:$4 sm:$0xff]  }
 0x6f3   : > { %4468 = vmatprep.subr.bf16.mxu1 %v10510_v8  ;;  %v10565_v8 = vld [vmem:[#allocation13 + $0x640] ss:$16 sps:$4 sm:$0xff]  }
 0x6f6   : > { %4469 = vmatpush1.bf16.msra.mxu1 %v10508_v53  ;;  %v10570_v53 = vld [vmem:[#allocation13 + $0x664] ss:$16 sps:$4 sm:$0xff]  }
 0x6f7   : > { %4489 = vmatprep.subr.bf16.mxu1 %v10513_v6  ;;  %v12980_v6 = vsel %vm1556_vm3, %v4626_v32, %v12925_v33  ;;  %v10585_v32 = vld [vmem:[#allocation13 + $0x704] ss:$16 sps:$4 sm:$0xff]  }
 0x6f9   : > { %4471 = vmatmul.mubr.bf16.vlgmr.msra.gmra.mrb[48].mxu1 %v12962_v58 }
 0x6fa   : > { %4480 = vmatprep.mubr.bf16.mxu1 %v12943_v35  ;;  %4490 = vmatpush1.bf16.msra.mxu1 %v10511_v15  ;;  %v10571_v15 = vld [vmem:[#allocation13 + $0x680] ss:$16 sps:$4 sm:$0xff]  }
 0x6fb   : > { %4491 = vmatprep.subr.bf16.mxu1 %v10516_v24  ;;  %v10576_v24 = vld [vmem:[#allocation13 + $0x6a4] ss:$16 sps:$4 sm:$0xff]  }
 0x6fe   : > { %4492 = vmatpush1.bf16.msra.mxu1 %v10514_v1  ;;  %v10577_v1 = vld [vmem:[#allocation13 + $0x6c0] ss:$16 sps:$4 sm:$0xff]  }
 0x6ff   : > { %4493 = vmatprep.subr.bf16.mxu1 %v10519_v20 }
 0x701   : > { %4481 = vmatmul.mubr.bf16.gmra.mrb[72].mxu1 %v12957_v44 }
 0x702   : > { %4494 = vmatpush1.bf16.msra.mxu1 %v10517_v10  ;;  %4521 = vmatprep.mubr.bf16.mxu1 %v12949_v47 }
 0x703   : > { %4495 = vmatprep.subr.bf16.mxu1 %v10522_v34 }
 0x706   : > { %4496 = vmatpush1.bf16.msra.mxu1 %v10520_v11 }
 0x707   : > { %4497 = vmatprep.subr.bf16.mxu1 %v10525_v36 }
 0x70a   : > { %4498 = vmatpush1.bf16.msra.mxu1 %v10523_v40  ;;  %v10583_v40 = vld [vmem:[#allocation13 + $0x700] ss:$16 sps:$4 sm:$0xff]  }
 0x70b   : > { %4499 = vmatprep.subr.bf16.mxu1 %v10528_v31 }
 0x70e   : > { %4500 = vmatpush1.bf16.msra.mxu1 %v10526_v18  ;;  %v10588_v18 = vld [vmem:[#allocation13 + $0x724] ss:$16 sps:$4 sm:$0xff]  }
 0x70f   : > { %4501 = vmatprep.subr.bf16.mxu1 %v10531_v46  ;;  %v10586_v46 = vld [vmem:[#allocation13 + $0x720] ss:$16 sps:$4 sm:$0xff]  }
 0x712   : > { %4502 = vmatpush1.bf16.msra.mxu1 %v10529_v4  ;;  %v10591_v4 = vld [vmem:[#allocation13 + $0x744] ss:$16 sps:$4 sm:$0xff]  }
 0x713   : > { %4503 = vmatprep.subr.bf16.mxu1 %v10534_v30  ;;  %v10589_v30 = vld [vmem:[#allocation13 + $0x740] ss:$16 sps:$4 sm:$0xff]  }
 0x714   : > { %v12968_v47 = vpop.f32.mrb[60].mxu1 }
 0x715   : > { %v12970_v56 = vpop.f32.mrb[61].mxu1 }
 0x716   : > { %v3614_v16 = vpop.f32.mrb[62].mxu1  ;;  %4504 = vmatpush1.bf16.msra.mxu1 %v10532_v61  ;;  %v10594_v61 = vld [vmem:[#allocation13 + $0x764] ss:$16 sps:$4 sm:$0xff]  }
 0x717   : > { %v3615_v22 = vpop.f32.mrb[63].mxu1  ;;  %4505 = vmatprep.subr.bf16.mxu1 %v10537_v59  ;;  %v10597_v59 = vld [vmem:[#allocation13 + $0x784] ss:$16 sps:$4 sm:$0xff]  }
 0x718   : > { %v10600_v16 = vld [vmem:[#allocation13 + $0x7a4] ss:$16 sps:$4 sm:$0xff]  }
 0x719   : > { %v10603_v22 = vld [vmem:[#allocation13 + $0x7c4] ss:$16 sps:$4 sm:$0xff]  }
 0x71a   : > { %4506 = vmatpush1.bf16.msra.mxu1 %v10535_v28  ;;  %v10598_v28 = vld [vmem:[#allocation13 + $0x7a0] ss:$16 sps:$4 sm:$0xff]  }
 0x71b   : > { %4507 = vmatprep.subr.bf16.mxu1 %v10540_v3  ;;  %v10601_v3 = vld [vmem:[#allocation13 + $0x7c0] ss:$16 sps:$4 sm:$0xff]  }
 0x71e   : > { %4508 = vmatpush1.bf16.msra.mxu1 %v10538_v29  ;;  %v10606_v29 = vld [vmem:[#allocation13 + $0x7e4] ss:$16 sps:$4 sm:$0xff]  }
 0x71f   : > { %4509 = vmatprep.subr.bf16.mxu1 %v10543_v7  ;;  %v10604_v7 = vld [vmem:[#allocation13 + $0x7e0] ss:$16 sps:$4 sm:$0xff]  }
 0x722   : > { %4510 = vmatpush1.bf16.msra.mxu1 %v10541_v49  ;;  %v10609_v49 = vld [vmem:[#allocation13 + $0x60c] ss:$16 sps:$4 sm:$0xff]  }
 0x723   : > { %4511 = vmatprep.subr.bf16.mxu1 %v10546_v21  ;;  %v10607_v21 = vld [vmem:[#allocation13 + $0x608] ss:$16 sps:$4 sm:$0xff]  }
 0x726   : > { %4512 = vmatpush1.bf16.msra.mxu1 %v10544_v48  ;;  %v10612_v48 = vld [vmem:[#allocation13 + $0x62c] ss:$16 sps:$4 sm:$0xff]  }
 0x727   : > { %4513 = vmatprep.subr.bf16.mxu1 %v10549_v50  ;;  %v12994_v50 = vsel %vm1556_vm3, %v4619_v5, %v12917_v26  ;;  %v10619_v5 = vld [vmem:[#allocation13 + $0x688] ss:$16 sps:$4 sm:$0xff]  }
 0x72a   : > { %4514 = vmatpush1.bf16.msra.mxu1 %v10547_v12  ;;  %v10610_v12 = vld [vmem:[#allocation13 + $0x628] ss:$16 sps:$4 sm:$0xff]  }
 0x72b   : > { %4515 = vmatprep.subr.bf16.mxu1 %v10552_v9  ;;  %v10615_v9 = vld [vmem:[#allocation13 + $0x64c] ss:$16 sps:$4 sm:$0xff]  }
 0x72e   : > { %4516 = vmatpush1.bf16.msra.mxu1 %v10550_v63  ;;  %v10613_v63 = vld [vmem:[#allocation13 + $0x648] ss:$16 sps:$4 sm:$0xff]  }
 0x72f   : > { %4517 = vmatprep.subr.bf16.mxu1 %v10555_v13  ;;  %v10618_v13 = vld [vmem:[#allocation13 + $0x66c] ss:$16 sps:$4 sm:$0xff]  }
 0x732   : > { %4518 = vmatpush1.bf16.msra.mxu1 %v10553_v0  ;;  %v10624_v0 = vld [vmem:[#allocation13 + $0x6ac] ss:$16 sps:$4 sm:$0xff]  }
 0x733   : > { %4519 = vmatprep.subr.bf16.mxu1 %v10558_v37  ;;  %v10622_v37 = vld [vmem:[#allocation13 + $0x6a8] ss:$16 sps:$4 sm:$0xff]  }
 0x736   : > { %4520 = vmatpush1.bf16.msra.mxu1 %v10556_v2  ;;  %v10627_v2 = vld [vmem:[#allocation13 + $0x6cc] ss:$16 sps:$4 sm:$0xff]  }
 0x737   : > { %4955 = vmatprep.subr.bf16.mxu1 %v10561_v19  ;;  %v10625_v19 = vld [vmem:[#allocation13 + $0x6c8] ss:$16 sps:$4 sm:$0xff]  }
 0x739   : > { %4522 = vmatmul.mubr.bf16.vlgmr.msra.gmra.mrb[56].mxu1 %v12962_v58  ;;  %v10574_v58 = vld [vmem:[#allocation13 + $0x6a0] ss:$16 sps:$4 sm:$0xff]  }
 0x73a   : > { %4531 = vmatprep.mubr.bf16.mxu1 %v12943_v35  ;;  %4956 = vmatpush1.bf16.msra.mxu1 %v10559_v39  ;;  %v10568_v35 = vld [vmem:[#allocation13 + $0x660] ss:$16 sps:$4 sm:$0xff]   ;;  %v10630_v39 = vld [vmem:[#allocation13 + $0x6ec] ss:$16 sps:$4 sm:$0xff]  }
 0x73b   : > { %4957 = vmatprep.subr.bf16.mxu1 %v10564_v60  ;;  %v10628_v60 = vld [vmem:[#allocation13 + $0x6e8] ss:$16 sps:$4 sm:$0xff]  }
 0x73e   : > { %4958 = vmatpush1.bf16.msra.mxu1 %v10562_v52  ;;  %v10633_v52 = vld [vmem:[#allocation13 + $0x70c] ss:$16 sps:$4 sm:$0xff]  }
 0x73f   : > { %4959 = vmatprep.subr.bf16.mxu1 %v10567_v27 }
 0x741   : > { %4532 = vmatmul.mubr.bf16.gmra.mrb[76].mxu1 %v12957_v44  ;;  %v10579_v44 = vld [vmem:[#allocation13 + $0x6c4] ss:$16 sps:$4 sm:$0xff]  }
 0x742   : > { %4960 = vmatpush1.bf16.msra.mxu1 %v10565_v8  ;;  %4987 = vmatprep.mubr.bf16.mxu1 %v12980_v6 }
 0x743   : > { %4961 = vmatprep.subr.bf16.mxu1 %v10570_v53 }
 0x746   : > { %4962 = vmatpush1.bf16.msra.mxu1 %v10568_v35 }
 0x747   : > { %4963 = vmatprep.subr.bf16.mxu1 %v10573_v62  ;;  %v10631_v62 = vld [vmem:[#allocation13 + $0x708] ss:$16 sps:$4 sm:$0xff]  }
 0x74a   : > { %4964 = vmatpush1.bf16.msra.mxu1 %v10571_v15 }
 0x74b   : > { %4965 = vmatprep.subr.bf16.mxu1 %v10576_v24  ;;  %v10636_v24 = vld [vmem:[#allocation13 + $0x72c] ss:$16 sps:$4 sm:$0xff]  }
 0x74e   : > { %4966 = vmatpush1.bf16.msra.mxu1 %v10574_v58  ;;  %v10634_v58 = vld [vmem:[#allocation13 + $0x728] ss:$16 sps:$4 sm:$0xff]  }
 0x74f   : > { %4967 = vmatprep.subr.bf16.mxu1 %v10579_v44  ;;  %v10639_v44 = vld [vmem:[#allocation13 + $0x74c] ss:$16 sps:$4 sm:$0xff]  }
 0x752   : > { %4968 = vmatpush1.bf16.msra.mxu1 %v10577_v1  ;;  %v10637_v1 = vld [vmem:[#allocation13 + $0x748] ss:$16 sps:$4 sm:$0xff]  }
 0x753   : > { %4969 = vmatprep.subr.bf16.mxu1 %v10582_v42  ;;  %v10642_v42 = vld [vmem:[#allocation13 + $0x76c] ss:$16 sps:$4 sm:$0xff]  }
 0x754   : > { %v3981_v20 = vpop.f32.mrb[64].mxu1 }
 0x755   : > { %v12984_v10 = vadd.f32 %v3981_v20, %v12952_v17  ;;  %v3983_v34 = vpop.f32.mrb[65].mxu1  ;;  %v10592_v17 = vld [vmem:[#allocation13 + $0x760] ss:$16 sps:$4 sm:$0xff]   ;;  %v10646_v20 = vld [vmem:[#allocation13 + $0x7a8] ss:$16 sps:$4 sm:$0xff]  }
 0x756   : > { %v12987_v11 = vadd.f32 %v3983_v34, %v12954_v38  ;;  %v3985_v36 = vpop.f32.mrb[66].mxu1  ;;  %4970 = vmatpush1.bf16.msra.mxu1 %v10580_v25  ;;  %v10595_v38 = vld [vmem:[#allocation13 + $0x780] ss:$16 sps:$4 sm:$0xff]   ;;  %v10645_v25 = vld [vmem:[#allocation13 + $0x78c] ss:$16 sps:$4 sm:$0xff]  }
 0x757   : > { %v3986_v31 = vpop.f32.mrb[67].mxu1  ;;  %4971 = vmatprep.subr.bf16.mxu1 %v10585_v32  ;;  %v10648_v32 = vld [vmem:[#allocation13 + $0x7ac] ss:$16 sps:$4 sm:$0xff]   ;;  %v10649_v36 = vld [vmem:[#allocation13 + $0x7c8] ss:$16 sps:$4 sm:$0xff]  }
 0x758   : > { %v10651_v34 = vld [vmem:[#allocation13 + $0x7cc] ss:$16 sps:$4 sm:$0xff]   ;;  %v10652_v31 = vld [vmem:[#allocation13 + $0x7e8] ss:$16 sps:$4 sm:$0xff]  }
 0x75a   : > { %4972 = vmatpush1.bf16.msra.mxu1 %v10583_v40  ;;  %v10654_v40 = vld [vmem:[#allocation13 + $0x7ec] ss:$16 sps:$4 sm:$0xff]  }
 0x75b   : > { %4973 = vmatprep.subr.bf16.mxu1 %v10588_v18  ;;  %v10657_v18 = vld [vmem:[#allocation13 + $0x804] ss:$16 sps:$4 sm:$0xff]  }
 0x75e   : > { %4974 = vmatpush1.bf16.msra.mxu1 %v10586_v46  ;;  %v10655_v46 = vld [vmem:[#allocation13 + $0x800] ss:$16 sps:$4 sm:$0xff]  }
 0x75f   : > { %4975 = vmatprep.subr.bf16.mxu1 %v10591_v4  ;;  %v10660_v4 = vld [vmem:[#allocation13 + $0x824] ss:$16 sps:$4 sm:$0xff]  }
 0x762   : > { %4976 = vmatpush1.bf16.msra.mxu1 %v10589_v30  ;;  %v10658_v30 = vld [vmem:[#allocation13 + $0x820] ss:$16 sps:$4 sm:$0xff]  }
 0x763   : > { %4977 = vmatprep.subr.bf16.mxu1 %v10594_v61  ;;  %v10663_v61 = vld [vmem:[#allocation13 + $0x844] ss:$16 sps:$4 sm:$0xff]  }
 0x766   : > { %4978 = vmatpush1.bf16.msra.mxu1 %v10592_v17  ;;  %v13009_v17 = vrot.slane %v12911_v54, 2  ;;  %v10667_v54 = vld [vmem:[#allocation13 + $0x880] ss:$16 sps:$4 sm:$0xff]  }
 0x767   : > { %4979 = vmatprep.subr.bf16.mxu1 %v10597_v59  ;;  %v10661_v59 = vld [vmem:[#allocation13 + $0x840] ss:$16 sps:$4 sm:$0xff]  }
 0x76a   : > { %4980 = vmatpush1.bf16.msra.mxu1 %v10595_v38  ;;  %v5137_v38 = vrot.slane %v12891_v55, 2  ;;  %v10675_v55 = vld [vmem:[#allocation13 + $0x8c4] ss:$16 sps:$4 sm:$0xff]  }
 0x76b   : > { %4981 = vmatprep.subr.bf16.mxu1 %v10600_v16  ;;  %v10666_v16 = vld [vmem:[#allocation13 + $0x864] ss:$16 sps:$4 sm:$0xff]  }
 0x76e   : > { %4982 = vmatpush1.bf16.msra.mxu1 %v10598_v28  ;;  %v13015_v28 = vsel %vm1851_vm4, %v5137_v38, %v13009_v17 }
 0x76f   : > { %4983 = vmatprep.subr.bf16.mxu1 %v10603_v22  ;;  %v10669_v22 = vld [vmem:[#allocation13 + $0x884] ss:$16 sps:$4 sm:$0xff]  }
 0x772   : > { %4984 = vmatpush1.bf16.msra.mxu1 %v10601_v3  ;;  %v10672_v3 = vld [vmem:[#allocation13 + $0x8a4] ss:$16 sps:$4 sm:$0xff]  }
 0x773   : > { %4985 = vmatprep.subr.bf16.mxu1 %v10606_v29  ;;  %v10670_v29 = vld [vmem:[#allocation13 + $0x8a0] ss:$16 sps:$4 sm:$0xff]  }
 0x776   : > { %4986 = vmatpush1.bf16.msra.mxu1 %v10604_v7  ;;  %v10678_v7 = vld [vmem:[#allocation13 + $0x8e4] ss:$16 sps:$4 sm:$0xff]  }
 0x777   : > { %5006 = vmatprep.subr.bf16.mxu1 %v10609_v49  ;;  %v10676_v49 = vld [vmem:[#allocation13 + $0x8e0] ss:$16 sps:$4 sm:$0xff]  }
 0x779   : > { %4988 = vmatmul.mubr.bf16.vlgmr.msra.gmra.mrb[48].mxu1 %v12994_v50 }
 0x77a   : > { %4997 = vmatprep.mubr.bf16.mxu1 %v12925_v33  ;;  %5007 = vmatpush1.bf16.msra.mxu1 %v10607_v21  ;;  %v10681_v21 = vld [vmem:[#allocation13 + $0x904] ss:$16 sps:$4 sm:$0xff]  }
 0x77b   : > { %5008 = vmatprep.subr.bf16.mxu1 %v10612_v48 }
 0x77e   : > { %5009 = vmatpush1.bf16.msra.mxu1 %v10610_v12 }
 0x77f   : > { %5010 = vmatprep.subr.bf16.mxu1 %v10615_v9 }
 0x781   : > { %4998 = vmatmul.mubr.bf16.gmra.mrb[80].mxu1 %v12917_v26 }
 0x782   : > { %5011 = vmatpush1.bf16.msra.mxu1 %v10613_v63  ;;  %5038 = vmatprep.mubr.bf16.mxu1 %v12980_v6 }
 0x783   : > { %5012 = vmatprep.subr.bf16.mxu1 %v10618_v13  ;;  %v10679_v13 = vld [vmem:[#allocation13 + $0x900] ss:$16 sps:$4 sm:$0xff]  }
 0x786   : > { %5013 = vmatpush1.bf16.msra.mxu1 %v10616_v51 }
 0x787   : > { %5014 = vmatprep.subr.bf16.mxu1 %v10621_v45  ;;  %v10684_v45 = vld [vmem:[#allocation13 + $0x924] ss:$16 sps:$4 sm:$0xff]  }
 0x78a   : > { %5015 = vmatpush1.bf16.msra.mxu1 %v10619_v5  ;;  %v10682_v5 = vld [vmem:[#allocation13 + $0x920] ss:$16 sps:$4 sm:$0xff]  }
 0x78b   : > { %5016 = vmatprep.subr.bf16.mxu1 %v10624_v0  ;;  %v10687_v0 = vld [vmem:[#allocation13 + $0x944] ss:$16 sps:$4 sm:$0xff]  }
 0x78e   : > { %5017 = vmatpush1.bf16.msra.mxu1 %v10622_v37  ;;  %v10685_v37 = vld [vmem:[#allocation13 + $0x940] ss:$16 sps:$4 sm:$0xff]  }
 0x78f   : > { %5018 = vmatprep.subr.bf16.mxu1 %v10627_v2  ;;  %v10690_v2 = vld [vmem:[#allocation13 + $0x964] ss:$16 sps:$4 sm:$0xff]  }
 0x792   : > { %5019 = vmatpush1.bf16.msra.mxu1 %v10625_v19  ;;  %v10693_v19 = vld [vmem:[#allocation13 + $0x984] ss:$16 sps:$4 sm:$0xff]  }
 0x793   : > { %5020 = vmatprep.subr.bf16.mxu1 %v10630_v39  ;;  %v10696_v39 = vld [vmem:[#allocation13 + $0x9a4] ss:$16 sps:$4 sm:$0xff]  }
 0x794   : > { %v4032_v27 = vpop.f32.mrb[68].mxu1 }
 0x795   : > { %v13001_v8 = vadd.f32 %v4032_v27, %v12968_v47  ;;  %v4034_v53 = vpop.f32.mrb[69].mxu1  ;;  %v10640_v47 = vld [vmem:[#allocation13 + $0x768] ss:$16 sps:$4 sm:$0xff]   ;;  %v10697_v27 = vld [vmem:[#allocation13 + $0x9c0] ss:$16 sps:$4 sm:$0xff]  }
 0x796   : > { %v13004_v6 = vadd.f32 %v4034_v53, %v12970_v56  ;;  %v4036_v35 = vpop.f32.mrb[70].mxu1  ;;  %5021 = vmatpush1.bf16.msra.mxu1 %v10628_v60  ;;  %v10643_v56 = vld [vmem:[#allocation13 + $0x788] ss:$16 sps:$4 sm:$0xff]   ;;  %v10694_v60 = vld [vmem:[#allocation13 + $0x9a0] ss:$16 sps:$4 sm:$0xff]  }
 0x797   : > { %v4037_v15 = vpop.f32.mrb[71].mxu1  ;;  %5022 = vmatprep.subr.bf16.mxu1 %v10633_v52  ;;  %v10699_v52 = vld [vmem:[#allocation13 + $0x9c4] ss:$16 sps:$4 sm:$0xff]   ;;  %v10700_v35 = vld [vmem:[#allocation13 + $0x9e0] ss:$16 sps:$4 sm:$0xff]  }
 0x798   : > { %v10702_v53 = vld [vmem:[#allocation13 + $0x9e4] ss:$16 sps:$4 sm:$0xff]   ;;  %v13025_v15 = vrot.slane %v12909_v43, 2  ;;  %v10709_v43 = vld [vmem:[#allocation13 + $0x848] ss:$16 sps:$4 sm:$0xff]  }
 0x79a   : > { %5023 = vmatpush1.bf16.msra.mxu1 %v10631_v62  ;;  %v10705_v62 = vld [vmem:[#allocation13 + $0x80c] ss:$16 sps:$4 sm:$0xff]  }
 0x79b   : > { %5024 = vmatprep.subr.bf16.mxu1 %v10636_v24  ;;  %v5134_v24 = vrot.slane %v12889_v41, 2  ;;  %v10712_v41 = vld [vmem:[#allocation13 + $0x868] ss:$16 sps:$4 sm:$0xff]  }
 0x79e   : > { %5025 = vmatpush1.bf16.msra.mxu1 %v10634_v58  ;;  %v10703_v58 = vld [vmem:[#allocation13 + $0x808] ss:$16 sps:$4 sm:$0xff]  }
 0x79f   : > { %5026 = vmatprep.subr.bf16.mxu1 %v10639_v44  ;;  %v10708_v44 = vld [vmem:[#allocation13 + $0x82c] ss:$16 sps:$4 sm:$0xff]  }
 0x7a2   : > { %5027 = vmatpush1.bf16.msra.mxu1 %v10637_v1  ;;  %v13030_v1 = vsel %vm1851_vm4, %v5134_v24, %v13025_v15 }
 0x7a3   : > { %5028 = vmatprep.subr.bf16.mxu1 %v10642_v42  ;;  %v10706_v42 = vld [vmem:[#allocation13 + $0x828] ss:$16 sps:$4 sm:$0xff]  }
 0x7a6   : > { %5029 = vmatpush1.bf16.msra.mxu1 %v10640_v47  ;;  %v10711_v47 = vld [vmem:[#allocation13 + $0x84c] ss:$16 sps:$4 sm:$0xff]  }
 0x7a7   : > { %5030 = vmatprep.subr.bf16.mxu1 %v10645_v25  ;;  %v10714_v25 = vld [vmem:[#allocation13 + $0x86c] ss:$16 sps:$4 sm:$0xff]  }
 0x7aa   : > { %5031 = vmatpush1.bf16.msra.mxu1 %v10643_v56  ;;  %v10717_v56 = vld [vmem:[#allocation13 + $0x88c] ss:$16 sps:$4 sm:$0xff]  }
 0x7ab   : > { %5032 = vmatprep.subr.bf16.mxu1 %v10648_v32  ;;  %v10715_v32 = vld [vmem:[#allocation13 + $0x888] ss:$16 sps:$4 sm:$0xff]  }
 0x7ae   : > { %5033 = vmatpush1.bf16.msra.mxu1 %v10646_v20  ;;  %v10720_v20 = vld [vmem:[#allocation13 + $0x8ac] ss:$16 sps:$4 sm:$0xff]  }
 0x7af   : > { %5034 = vmatprep.subr.bf16.mxu1 %v10651_v34  ;;  %v10718_v34 = vld [vmem:[#allocation13 + $0x8a8] ss:$16 sps:$4 sm:$0xff]  }
 0x7b2   : > { %5035 = vmatpush1.bf16.msra.mxu1 %v10649_v36  ;;  %v10723_v36 = vld [vmem:[#allocation13 + $0x8cc] ss:$16 sps:$4 sm:$0xff]  }
 0x7b3   : > { %5036 = vmatprep.subr.bf16.mxu1 %v10654_v40  ;;  %v10721_v40 = vld [vmem:[#allocation13 + $0x8c8] ss:$16 sps:$4 sm:$0xff]  }
 0x7b6   : > { %5037 = vmatpush1.bf16.msra.mxu1 %v10652_v31  ;;  %v10726_v31 = vld [vmem:[#allocation13 + $0x8ec] ss:$16 sps:$4 sm:$0xff]  }
 0x7b7   : > { %5464 = vmatprep.subr.bf16.mxu1 %v10657_v18  ;;  %v10724_v18 = vld [vmem:[#allocation13 + $0x8e8] ss:$16 sps:$4 sm:$0xff]  }
 0x7b9   : > { %5039 = vmatmul.mubr.bf16.vlgmr.msra.gmra.mrb[56].mxu1 %v12994_v50 }
 0x7ba   : > { %5048 = vmatprep.mubr.bf16.mxu1 %v12925_v33  ;;  %5465 = vmatpush1.bf16.msra.mxu1 %v10655_v46  ;;  %v10664_v33 = vld [vmem:[#allocation13 + $0x860] ss:$16 sps:$4 sm:$0xff]   ;;  %v10729_v46 = vld [vmem:[#allocation13 + $0x90c] ss:$16 sps:$4 sm:$0xff]  }
 0x7bb   : > { %5466 = vmatprep.subr.bf16.mxu1 %v10660_v4 }
 0x7be   : > { %5467 = vmatpush1.bf16.msra.mxu1 %v10658_v30 }
 0x7bf   : > { %5468 = vmatprep.subr.bf16.mxu1 %v10663_v61 }
 0x7c1   : > { %5049 = vmatmul.mubr.bf16.gmra.mrb[84].mxu1 %v12917_v26  ;;  %v10673_v26 = vld [vmem:[#allocation13 + $0x8c0] ss:$16 sps:$4 sm:$0xff]  }
 0x7c2   : > { %5469 = vmatpush1.bf16.msra.mxu1 %v10661_v59  ;;  %5496 = vmatprep.mubr.bf16.mxu1 %v13015_v28 }
 0x7c3   : > { %5470 = vmatprep.subr.bf16.mxu1 %v10666_v16  ;;  %v10727_v16 = vld [vmem:[#allocation13 + $0x908] ss:$16 sps:$4 sm:$0xff]  }
 0x7c6   : > { %5471 = vmatpush1.bf16.msra.mxu1 %v10664_v33  ;;  %v10732_v33 = vld [vmem:[#allocation13 + $0x92c] ss:$16 sps:$4 sm:$0xff]  }
 0x7c7   : > { %5472 = vmatprep.subr.bf16.mxu1 %v10669_v22  ;;  %v10730_v22 = vld [vmem:[#allocation13 + $0x928] ss:$16 sps:$4 sm:$0xff]  }
 0x7ca   : > { %5473 = vmatpush1.bf16.msra.mxu1 %v10667_v54  ;;  %v10735_v54 = vld [vmem:[#allocation13 + $0x94c] ss:$16 sps:$4 sm:$0xff]  }
 0x7cb   : > { %5474 = vmatprep.subr.bf16.mxu1 %v10672_v3  ;;  %v10733_v3 = vld [vmem:[#allocation13 + $0x948] ss:$16 sps:$4 sm:$0xff]  }
 0x7ce   : > { %5475 = vmatpush1.bf16.msra.mxu1 %v10670_v29  ;;  %v10738_v29 = vld [vmem:[#allocation13 + $0x96c] ss:$16 sps:$4 sm:$0xff]  }
 0x7cf   : > { %5476 = vmatprep.subr.bf16.mxu1 %v10675_v55  ;;  %v10736_v55 = vld [vmem:[#allocation13 + $0x968] ss:$16 sps:$4 sm:$0xff]  }
 0x7d2   : > { %5477 = vmatpush1.bf16.msra.mxu1 %v10673_v26  ;;  %v10744_v26 = vld [vmem:[#allocation13 + $0x9ac] ss:$16 sps:$4 sm:$0xff]  }
 0x7d3   : > { %5478 = vmatprep.subr.bf16.mxu1 %v10678_v7  ;;  %v10742_v7 = vld [vmem:[#allocation13 + $0x9a8] ss:$16 sps:$4 sm:$0xff]  }
 0x7d4   : > { %v4482_v48 = vpop.f32.mrb[72].mxu1 }
 0x7d5   : > { %v13019_v50 = vadd.f32 %v4482_v48, %v12984_v10  ;;  %v4484_v12 = vpop.f32.mrb[73].mxu1  ;;  %v10688_v10 = vld [vmem:[#allocation13 + $0x960] ss:$16 sps:$4 sm:$0xff]   ;;  %v10750_v48 = vld [vmem:[#allocation13 + $0x9ec] ss:$16 sps:$4 sm:$0xff]  }
 0x7d6   : > { %v13022_v9 = vadd.f32 %v4484_v12, %v12987_v11  ;;  %v4486_v63 = vpop.f32.mrb[74].mxu1  ;;  %5479 = vmatpush1.bf16.msra.mxu1 %v10676_v49  ;;  %v10691_v11 = vld [vmem:[#allocation13 + $0x980] ss:$16 sps:$4 sm:$0xff]   ;;  %v10747_v49 = vld [vmem:[#allocation13 + $0x9cc] ss:$16 sps:$4 sm:$0xff]  }
 0x7d7   : > { %v4487_v51 = vpop.f32.mrb[75].mxu1  ;;  %5480 = vmatprep.subr.bf16.mxu1 %v10681_v21  ;;  %v10745_v21 = vld [vmem:[#allocation13 + $0x9c8] ss:$16 sps:$4 sm:$0xff]  }
 0x7d8   : > { %v10748_v12 = vld [vmem:[#allocation13 + $0x9e8] ss:$16 sps:$4 sm:$0xff]  }
 0x7da   : > { %5481 = vmatpush1.bf16.msra.mxu1 %v10679_v13 }
 0x7db   : > { %5482 = vmatprep.subr.bf16.mxu1 %v10684_v45 }
 0x7de   : > { %5483 = vmatpush1.bf16.msra.mxu1 %v10682_v5 }
 0x7df   : > { %5484 = vmatprep.subr.bf16.mxu1 %v10687_v0 }
 0x7e2   : > { %5485 = vmatpush1.bf16.msra.mxu1 %v10685_v37 }
 0x7e3   : > { %5486 = vmatprep.subr.bf16.mxu1 %v10690_v2 }
 0x7e6   : > { %5487 = vmatpush1.bf16.msra.mxu1 %v10688_v10 }
 0x7e7   : > { %5488 = vmatprep.subr.bf16.mxu1 %v10693_v19 }
 0x7ea   : > { %5489 = vmatpush1.bf16.msra.mxu1 %v10691_v11 }
 0x7eb   : > { %5490 = vmatprep.subr.bf16.mxu1 %v10696_v39 }
 0x7ee   : > { %5491 = vmatpush1.bf16.msra.mxu1 %v10694_v60  ;;  %v13047_v60 = vld [vmem:[#allocation14] sm:$0xf] }
 0x7ef   : > { %5492 = vmatprep.subr.bf16.mxu1 %v10699_v52 }
 0x7f2   : > { %5493 = vmatpush1.bf16.msra.mxu1 %v10697_v27 }
 0x7f3   : > { %5494 = vmatprep.subr.bf16.mxu1 %v10702_v53 }
 0x7f6   : > { %5495 = vmatpush1.bf16.msra.mxu1 %v10700_v35 }
 0x7f7   : > { %5515 = vmatprep.subr.bf16.mxu1 %v10705_v62 }
 0x7f9   : > { %5497 = vmatmul.mubr.bf16.vlgmr.msra.gmra.mrb[48].mxu1 %v13030_v1 }
 0x7fa   : > { %5506 = vmatprep.mubr.bf16.mxu1 %v13009_v17  ;;  %5516 = vmatpush1.bf16.msra.mxu1 %v10703_v58 }
 0x7fb   : > { %5517 = vmatprep.subr.bf16.mxu1 %v10708_v44  ;;  %v10753_v44 = vld [vmem:[#allocation16 + $0x4] ss:$8 sps:$4 sm:$0xff]  }
 0x7fc   : > { %6064 = vmatprep.subr.bf16.mxu0 %v10753_v44 }
 0x7fe   : > { %5518 = vmatpush1.bf16.msra.mxu1 %v10706_v42 }
 0x7ff   : > { %5519 = vmatprep.subr.bf16.mxu1 %v10711_v47 }
 0x801   : > { %5507 = vmatmul.mubr.bf16.gmra.mrb[88].mxu1 %v13025_v15 }
 0x802   : > { %5520 = vmatpush1.bf16.msra.mxu1 %v10709_v43  ;;  %5547 = vmatprep.mubr.bf16.mxu1 %v13015_v28  ;;  %v10751_v43 = vld [vmem:[#allocation16] ss:$8 sps:$4 sm:$0xff]  }
 0x803   : > { %5521 = vmatprep.subr.bf16.mxu1 %v10714_v25  ;;  %v10756_v25 = vld [vmem:[#allocation16 + $0x14] ss:$8 sps:$4 sm:$0xff]   ;;  %6065 = vmatpush1.bf16.msra.mxu0 %v10751_v43 }
 0x804   : > { %6066 = vmatprep.subr.bf16.mxu0 %v10756_v25 }
 0x806   : > { %5522 = vmatpush1.bf16.msra.mxu1 %v10712_v41 }
 0x807   : > { %5523 = vmatprep.subr.bf16.mxu1 %v10717_v56 }
 0x80a   : > { %5524 = vmatpush1.bf16.msra.mxu1 %v10715_v32 }
 0x80b   : > { %5525 = vmatprep.subr.bf16.mxu1 %v10720_v20  ;;  %v10754_v20 = vld [vmem:[#allocation16 + $0x10] ss:$8 sps:$4 sm:$0xff]  }
 0x80c   : > { %6067 = vmatpush1.bf16.msra.mxu0 %v10754_v20 }
 0x80e   : > { %5526 = vmatpush1.bf16.msra.mxu1 %v10718_v34 }
 0x80f   : > { %5527 = vmatprep.subr.bf16.mxu1 %v10723_v36 }
 0x812   : > { %5528 = vmatpush1.bf16.msra.mxu1 %v10721_v40  ;;  %v10759_v40 = vld [vmem:[#allocation16 + $0x24] ss:$8 sps:$4 sm:$0xff]  }
 0x813   : > { %5529 = vmatprep.subr.bf16.mxu1 %v10726_v31  ;;  %6068 = vmatprep.subr.bf16.mxu0 %v10759_v40 }
 0x814   : > { %v4533_v4 = vpop.f32.mrb[76].mxu1 }
 0x815   : > { %v4550_v30 = vadd.f32 %v4533_v4, %v13001_v8  ;;  %v4535_v61 = vpop.f32.mrb[77].mxu1  ;;  %v10741_v8 = vld [vmem:[#allocation13 + $0x98c] ss:$16 sps:$4 sm:$0xff]  }
 0x816   : > { %v4551_v59 = vadd.f32 %v4535_v61, %v13004_v6  ;;  %v4537_v38 = vpop.f32.mrb[78].mxu1  ;;  %5530 = vmatpush1.bf16.msra.mxu1 %v10724_v18  ;;  %v10739_v6 = vld [vmem:[#allocation13 + $0x988] ss:$16 sps:$4 sm:$0xff]  }
 0x817   : > { %v4538_v28 = vpop.f32.mrb[79].mxu1  ;;  %5531 = vmatprep.subr.bf16.mxu1 %v10729_v46  ;;  %v10757_v38 = vld [vmem:[#allocation16 + $0x20] ss:$8 sps:$4 sm:$0xff]  }
 0x818   : > { %6069 = vmatpush1.bf16.msra.mxu0 %v10757_v38 }
 0x81a   : > { %5532 = vmatpush1.bf16.msra.mxu1 %v10727_v16  ;;  %v10762_v16 = vld [vmem:[#allocation16 + $0x34] ss:$8 sps:$4 sm:$0xff]  }
 0x81b   : > { %5533 = vmatprep.subr.bf16.mxu1 %v10732_v33  ;;  %v10760_v33 = vld [vmem:[#allocation16 + $0x30] ss:$8 sps:$4 sm:$0xff]   ;;  %6070 = vmatprep.subr.bf16.mxu0 %v10762_v16 }
 0x81c   : > { %6071 = vmatpush1.bf16.msra.mxu0 %v10760_v33 }
 0x81e   : > { %5534 = vmatpush1.bf16.msra.mxu1 %v10730_v22  ;;  %v10765_v22 = vld [vmem:[#allocation16 + $0x44] ss:$8 sps:$4 sm:$0xff]  }
 0x81f   : > { %5535 = vmatprep.subr.bf16.mxu1 %v10735_v54  ;;  %v10763_v54 = vld [vmem:[#allocation16 + $0x40] ss:$8 sps:$4 sm:$0xff]   ;;  %6072 = vmatprep.subr.bf16.mxu0 %v10765_v22 }
 0x820   : > { %6073 = vmatpush1.bf16.msra.mxu0 %v10763_v54 }
 0x822   : > { %5536 = vmatpush1.bf16.msra.mxu1 %v10733_v3  ;;  %v10768_v3 = vld [vmem:[#allocation16 + $0x54] ss:$8 sps:$4 sm:$0xff]  }
 0x823   : > { %5537 = vmatprep.subr.bf16.mxu1 %v10738_v29  ;;  %v10766_v29 = vld [vmem:[#allocation16 + $0x50] ss:$8 sps:$4 sm:$0xff]   ;;  %6074 = vmatprep.subr.bf16.mxu0 %v10768_v3 }
 0x824   : > { %6075 = vmatpush1.bf16.msra.mxu0 %v10766_v29 }
 0x826   : > { %5538 = vmatpush1.bf16.msra.mxu1 %v10736_v55  ;;  %v10771_v55 = vld [vmem:[#allocation16 + $0x64] ss:$8 sps:$4 sm:$0xff]  }
 0x827   : > { %5539 = vmatprep.subr.bf16.mxu1 %v10741_v8  ;;  %v10769_v8 = vld [vmem:[#allocation16 + $0x60] ss:$8 sps:$4 sm:$0xff]   ;;  %6076 = vmatprep.subr.bf16.mxu0 %v10771_v55 }
 0x828   : > { %6077 = vmatpush1.bf16.msra.mxu0 %v10769_v8 }
 0x82a   : > { %5540 = vmatpush1.bf16.msra.mxu1 %v10739_v6  ;;  %v10774_v6 = vld [vmem:[#allocation16 + $0x74] ss:$8 sps:$4 sm:$0xff]  }
 0x82b   : > { %5541 = vmatprep.subr.bf16.mxu1 %v10744_v26  ;;  %v10772_v26 = vld [vmem:[#allocation16 + $0x70] ss:$8 sps:$4 sm:$0xff]   ;;  %6078 = vmatprep.subr.bf16.mxu0 %v10774_v6 }
 0x82c   : > { %6079 = vmatpush1.bf16.msra.mxu0 %v10772_v26 }
 0x82e   : > { %5542 = vmatpush1.bf16.msra.mxu1 %v10742_v7  ;;  %v10777_v7 = vld [vmem:[#allocation16 + $0x84] ss:$8 sps:$4 sm:$0xff]  }
 0x82f   : > { %5543 = vmatprep.subr.bf16.mxu1 %v10747_v49  ;;  %v10775_v49 = vld [vmem:[#allocation16 + $0x80] ss:$8 sps:$4 sm:$0xff]   ;;  %6080 = vmatprep.subr.bf16.mxu0 %v10777_v7 }
 0x830   : > { %6081 = vmatpush1.bf16.msra.mxu0 %v10775_v49 }
 0x832   : > { %5544 = vmatpush1.bf16.msra.mxu1 %v10745_v21  ;;  %v10780_v21 = vld [vmem:[#allocation16 + $0x94] ss:$8 sps:$4 sm:$0xff]  }
 0x833   : > { %5545 = vmatprep.subr.bf16.mxu1 %v10750_v48  ;;  %v10778_v48 = vld [vmem:[#allocation16 + $0x90] ss:$8 sps:$4 sm:$0xff]   ;;  %6082 = vmatprep.subr.bf16.mxu0 %v10780_v21 }
 0x834   : > { %6083 = vmatpush1.bf16.msra.mxu0 %v10778_v48 }
 0x836   : > { %5546 = vmatpush1.bf16.msra.mxu1 %v10748_v12  ;;  %v10783_v12 = vld [vmem:[#allocation16 + $0xa4] ss:$8 sps:$4 sm:$0xff]  }
 0x837   : > { %6084 = vmatprep.subr.bf16.mxu0 %v10783_v12 }
 0x839   : > { %5548 = vmatmul.mubr.bf16.vlgmr.msra.gmra.mrb[56].mxu1 %v13030_v1 }
 0x83a   : > { %5557 = vmatprep.mubr.bf16.mxu1 %v13009_v17  ;;  %v13383_v17 = vsub.s32 1, %v12423_v14 }
 0x83c   : > { %v5587_v52 = vrot.slane %v13047_v60, %v13383_v17 }
 0x841   : > { %5558 = vmatmul.mubr.bf16.gmra.mrb[92].mxu1 %v13025_v15 }
 0x854   : > { %v4999_v63 = vpop.f32.mrb[80].mxu1 }
 0x855   : > { %v5065_v13 = vadd.f32 %v4999_v63, %v13019_v50  ;;  %v5001_v51 = vpop.f32.mrb[81].mxu1  ;;  %v10781_v63 = vld [vmem:[#allocation16 + $0xa0] ss:$8 sps:$4 sm:$0xff]  }
 0x856   : > { %v5066_v45 = vadd.f32 %v5001_v51, %v13022_v9  ;;  %v5003_v5 = vpop.f32.mrb[82].mxu1  ;;  %v13384_v9 = vsub.s32 0, %v12423_v14  ;;  %6085 = vmatpush1.bf16.msra.mxu0 %v10781_v63  ;;  %v10784_v51 = vld [vmem:[#allocation16 + $0xb0] ss:$8 sps:$4 sm:$0xff]  }
 0x857   : > { %v5004_v0 = vpop.f32.mrb[83].mxu1  ;;  %v10787_v5 = vld [vmem:[#allocation16 + $0xc0] ss:$8 sps:$4 sm:$0xff]  }
 0x858   : > { %v5583_v53 = vrot.slane %v13047_v60, %v13384_v9  ;;  %v10792_v0 = vld [vmem:[#allocation16 + $0xd4] ss:$8 sps:$4 sm:$0xff]  }
 0x894   : > { %v5050_v37 = vpop.f32.mrb[84].mxu1 }
 0x895   : > { %v13043_v2 = vadd.f32 %v5050_v37, %v4550_v30  ;;  %v5052_v10 = vpop.f32.mrb[85].mxu1  ;;  %v10790_v37 = vld [vmem:[#allocation16 + $0xd0] ss:$8 sps:$4 sm:$0xff]  }
 0x896   : > { %v13045_v19 = vadd.f32 %v5052_v10, %v4551_v59  ;;  %v5054_v11 = vpop.f32.mrb[86].mxu1  ;;  %v10795_v10 = vld [vmem:[#allocation16 + $0xe4] ss:$8 sps:$4 sm:$0xff]  }
 0x897   : > { %v5055_v39 = vpop.f32.mrb[87].mxu1  ;;  %v10793_v11 = vld [vmem:[#allocation16 + $0xe0] ss:$8 sps:$4 sm:$0xff]  }
 0x898   : > { %v13385_v39 = vsub.s32 2, %v12423_v14 }
 0x89a   : > { %v5591_v17 = vrot.slane %v13047_v60, %v13385_v39 }
 0x8cc   : > { %v5498_v50 = vpop.f32.mrb[48].mxu1 }
 0x8cd   : > { %v5500_v27 = vpop.f32.mrb[49].mxu1  ;;  %v13061_v1 = vadd.f32 %v5583_v53, %v5498_v50 }
 0x8ce   : > { %v13055_v35 = vadd.f32 %v5587_v52, %v5500_v27  ;;  %v5502_v62 = vpop.f32.mrb[50].mxu1  ;;  %v10796_v27 = vld [vmem:[#allocation16 + $0xf0] ss:$8 sps:$4 sm:$0xff]  }
 0x8cf   : > { %v5504_v15 = vpop.f32.mrb[51].mxu1  ;;  %v13057_v24 = vadd.f32 %v5583_v53, %v5502_v62  ;;  %v5612_v31 = vmax.f32 %v13061_v1, 0.0  ;;  %v10804_v1 = vld [vmem:[#allocation16 + $0x114] ss:$8 sps:$4 sm:$0xff]  }
 0x8d0   : > { %v13059_v58 = vadd.f32 %v5587_v52, %v5504_v15  ;;  %v5613_v42 = vmax.f32 %v13055_v35, 0.0  ;;  %v10802_v35 = vld [vmem:[#allocation16 + $0x110] ss:$8 sps:$4 sm:$0xff]  }
 0x8d1   : > { %v5616_v41 = vmax.f32 %v13057_v24, 0.0 }
 0x8d2   : > { %v5617_v47 = vmax.f32 %v13059_v58, 0.0 }
 0x8d3   : > { %v10046_v30 = vpack.i.bf16 %v5616_v41, %v5612_v31 }
 0x8d4   : > { %v10036_v56 = vpack.i.bf16 %v5617_v47, %v5613_v42  ;;  %v5508_v32 = vpop.f32.mrb[88].mxu1 }
 0x8d5   : > { %v5574_v34 = vadd.f32 %v5508_v32, %v5065_v13  ;;  %v5510_v36 = vpop.f32.mrb[89].mxu1  ;;  %v10786_v13 = vld [vmem:[#allocation16 + $0xb4] ss:$8 sps:$4 sm:$0xff]  }
 0x8d6   : > { %v5575_v18 = vadd.f32 %v5510_v36, %v5066_v45  ;;  %10037 = vrot.lane.b32.xlu1 %v10036_v56, %s11573_s1  ;;  %v5512_v46 = vpop.f32.mrb[90].mxu1  ;;  %6086 = vmatprep.subr.bf16.mxu0 %v10786_v13  ;;  %v10789_v45 = vld [vmem:[#allocation16 + $0xc4] ss:$8 sps:$4 sm:$0xff]  }
 0x8d7   : > { %v5513_v4 = vpop.f32.mrb[91].mxu1  ;;  %v13076_v61 = vadd.f32 %v5583_v53, %v5574_v34  ;;  %6087 = vmatpush1.bf16.msra.mxu0 %v10784_v51  ;;  %v10801_v56 = vld [vmem:[#allocation16 + $0x104] ss:$8 sps:$4 sm:$0xff]   ;;  %v13386_v34 = vsub.s32 3, %v12423_v14 }
 0x8d8   : > { %v13078_v59 = vadd.f32 %v5587_v52, %v5575_v18  ;;  %6088 = vmatprep.subr.bf16.mxu0 %v10789_v45  ;;  %v10798_v52 = vld [vmem:[#allocation16 + $0xf4] ss:$8 sps:$4 sm:$0xff]  }
 0x8d9   : > { %v5620_v28 = vmax.f32 %v13076_v61, 0.0  ;;  %v5595_v36 = vrot.slane %v13047_v60, %v13386_v34  ;;  %v10810_v61 = vld [vmem:[#allocation16 + $0x134] ss:$8 sps:$4 sm:$0xff]  }
 0x8da   : > { %10047 = vrot.lane.b32.xlu1 %v10046_v30, %s11573_s1  ;;  %v5621_v22 = vmax.f32 %v13078_v59, 0.0 }
 0x8db   : > { %6089 = vmatpush1.bf16.msra.mxu0 %v10787_v5 }
 0x8dc   : > { %6090 = vmatprep.subr.bf16.mxu0 %v10792_v0 }
 0x8de   : > { %5628 = vrot.lane.b32.xlu1 %v5620_v28, %s11573_s1 }
 0x8df   : > { %6091 = vmatpush1.bf16.msra.mxu0 %v10790_v37 }
 0x8e0   : > { %6092 = vmatprep.subr.bf16.mxu0 %v10795_v10 }
 0x8e3   : > { %6093 = vmatpush1.bf16.msra.mxu0 %v10793_v11  ;;  %v10799_v11 = vld [vmem:[#allocation16 + $0x100] ss:$8 sps:$4 sm:$0xff]  }
 0x8e4   : > { %6094 = vmatprep.subr.bf16.mxu0 %v10798_v52 }
 0x8e7   : > { %6095 = vmatpush1.bf16.msra.mxu0 %v10796_v27 }
 0x8e8   : > { %6115 = vmatprep.subr.bf16.mxu0 %v10801_v56  ;;  %v10805_v56 = vld [vmem:[#allocation16 + $0x120] ss:$8 sps:$4 sm:$0xff]  }
 0x90c   : > { %v5549_v50 = vpop.f32.mrb[56].mxu1 }
 0x90d   : > { %v13088_v9 = vadd.f32 %v5591_v17, %v5549_v50  ;;  %v5551_v53 = vpop.f32.mrb[57].mxu1 }
 0x90e   : > { %v5553_v62 = vpop.f32.mrb[58].mxu1  ;;  %v5603_v14 = vadd.f32 %v5595_v36, %v5551_v53 }
 0x90f   : > { %v13090_v15 = vadd.f32 %v5591_v17, %v5553_v62  ;;  %v5555_v44 = vpop.f32.mrb[59].mxu1  ;;  %v5614_v43 = vmax.f32 %v13088_v9, 0.0  ;;  %v10814_v9 = vld [vmem:[#allocation16 + $0x150] ss:$8 sps:$4 sm:$0xff]  }
 0x910   : > { %v13104_v30 = vadd.f32 %v5595_v36, %v5555_v44  ;;  %v5615_v3 = vmax.f32 %v5603_v14, 0.0  ;;  %v10813_v14 = vld [vmem:[#allocation16 + $0x144] ss:$8 sps:$4 sm:$0xff]  }
 0x911   : > { %v5618_v25 = vmax.f32 %v13090_v15, 0.0  ;;  %v10811_v15 = vld [vmem:[#allocation16 + $0x140] ss:$8 sps:$4 sm:$0xff]  }
 0x912   : > { %v5619_v54 = vmax.f32 %v13104_v30, 0.0 }
 0x913   : > { %v10041_v32 = vpack.i.bf16 %v5618_v25, %v5614_v43 }
 0x914   : > { %v5559_v20 = vpop.f32.mrb[92].mxu1  ;;  %v10056_v29 = vpack.i.bf16 %v5619_v54, %v5615_v3 }
 0x915   : > { %v5576_v40 = vadd.f32 %v5559_v20, %v13043_v2  ;;  %10042 = vrot.lane.b32.xlu0 %v10041_v32, %s11573_s1  ;;  %v5561_v18 = vpop.f32.mrb[93].mxu1 }
 0x916   : > { %v5577_v46 = vadd.f32 %v5561_v18, %v13045_v19  ;;  %v5563_v4 = vpop.f32.mrb[94].mxu1 }
 0x917   : > { %v13106_v38 = vadd.f32 %v5591_v17, %v5576_v40  ;;  %v5564_v16 = vpop.f32.mrb[95].mxu1 }
 0x918   : > { %v13108_v33 = vadd.f32 %v5595_v36, %v5577_v46  ;;  %v10808_v16 = vld [vmem:[#allocation16 + $0x130] ss:$8 sps:$4 sm:$0xff]  }
 0x919   : > { %v5622_v60 = vmax.f32 %v13106_v38, 0.0 }
 0x91a   : > { %v5623_v2 = vmax.f32 %v13108_v33, 0.0 }
 0x91b   : > { %v10051_v19 = vpack.i.bf16 %v5622_v60, %v5621_v22 }
 0x91c   : > { %5646 = vrot.lane.b32.xlu1 %v5623_v2, %s11573_s1 }
 0x91d   : > { %10052 = vrot.lane.b32.xlu0 %v10051_v19, %s11573_s1  ;;  %v10822_v19 = vld [vmem:[#allocation16 + $0x174] ss:$8 sps:$4 sm:$0xff]  }
 0x921   : > { %10057 = vrot.lane.b32.xlu0 %v10056_v29, %s11573_s1  ;;  %v10825_v29 = vld [vmem:[#allocation16 + $0x184] ss:$8 sps:$4 sm:$0xff]  }
 0x948   : > { %v10038_v59 = vpop.permute.xlu1 %10037 }
 0x949   : > { %v10040_v26 = vunpack.i.h.bf16 %v10038_v59  ;;  %v10039_v7 = vunpack.i.l.bf16 %v10038_v59  ;;  %v10823_v59 = vld [vmem:[#allocation16 + $0x180] ss:$8 sps:$4 sm:$0xff]  }
 0x94c   : > { %v10048_v55 = vpop.permute.xlu1 %10047 }
 0x94d   : > { %v10050_v8 = vunpack.i.h.bf16 %v10048_v55  ;;  %v10049_v6 = vunpack.i.l.bf16 %v10048_v55  ;;  %v10828_v55 = vld [vmem:[#allocation16 + $0x194] ss:$8 sps:$4 sm:$0xff]  }
 0x94f   : > { %v5654_v49 = vsel %vm2259_vm6, %v10049_v6, %v10039_v7  ;;  %v5655_v21 = vsel %vm2259_vm6, %v10050_v8, %v10040_v26 }
 0x950   : > { %v5660_v13 = vmax.f32 %v5612_v31, %v5654_v49  ;;  %v5664_v51 = vmax.f32 %v5616_v41, %v5655_v21  ;;  %v13141_v17 = vpop.permute.xlu1 %5628  ;;  %v10832_v49 = vld [vmem:[#allocation16 + $0x1b0] ss:$8 sps:$4 sm:$0xff]   ;;  %v10837_v21 = vld [vmem:[#allocation16 + $0x1c4] ss:$8 sps:$4 sm:$0xff]  }
 0x952   : > { %v5672_v39 = vpack.c.bf16 %v5664_v51, %v5660_v13  ;;  %v10843_v13 = vld [vmem:[#allocation16 + $0x1e4] ss:$8 sps:$4 sm:$0xff]  }
 0x987   : > { %v10043_v48 = vpop.permute.xlu0 %10042 }
 0x988   : > { %v10045_v12 = vunpack.i.h.bf16 %v10043_v48  ;;  %v10044_v63 = vunpack.i.l.bf16 %v10043_v48  ;;  %v10835_v48 = vld [vmem:[#allocation16 + $0x1c0] ss:$8 sps:$4 sm:$0xff]  }
 0x98a   : > { %v5652_v45 = vsel %vm2259_vm6, %v10040_v26, %v10045_v12  ;;  %v5651_v5 = vsel %vm2259_vm6, %v10039_v7, %v10044_v63  ;;  %v10829_v26 = vld [vmem:[#allocation16 + $0x1a0] ss:$8 sps:$4 sm:$0xff]   ;;  %v10834_v7 = vld [vmem:[#allocation16 + $0x1b4] ss:$8 sps:$4 sm:$0xff]  }
 0x98b   : > { %v5661_v0 = vmax.f32 %v5613_v42, %v5651_v5  ;;  %v5665_v37 = vmax.f32 %v5617_v47, %v5652_v45  ;;  %v10807_v42 = vld [vmem:[#allocation16 + $0x124] ss:$8 sps:$4 sm:$0xff]   ;;  %v10841_v45 = vld [vmem:[#allocation16 + $0x1e0] ss:$8 sps:$4 sm:$0xff]   ;;  %v10846_v5 = vld [vmem:[#allocation16 + $0x1f4] ss:$8 sps:$4 sm:$0xff]  }
 0x98d   : > { %v5673_v10 = vpack.c.bf16 %v5665_v37, %v5661_v0  ;;  %v10844_v37 = vld [vmem:[#allocation16 + $0x1f0] ss:$8 sps:$4 sm:$0xff]  }
 0x98e   : > { %v5647_v51 = vpop.permute.xlu1 %5646 }
 0x98f   : > { %6096 = vmatprep.mubr.bf16.mxu0 %v5673_v10  ;;  %v13137_v31 = vpop.permute.xlu0 %10052  ;;  %v5659_v0 = vsel %vm2259_vm6, %v5647_v51, %v13141_v17 }
 0x990   : > { %v10055_v24 = vunpack.i.h.bf16 %v13137_v31  ;;  %v10054_v41 = vunpack.i.l.bf16 %v13137_v31  ;;  %6097 = vmatmul.mubr.bf16.vlgmr.msra.gmra.mrb[56].mxu0 %v5672_v39  ;;  %v5671_v10 = vmax.f32 %v5623_v2, %v5659_v0  ;;  %v10876_v0 = vld [vmem:[#allocation20 + $0xa8] sm:$0xff]  }
 0x991   : > { %6116 = vmatpush1.bf16.msra.mxu0 %v10799_v11 }
 0x992   : > { %6117 = vmatprep.subr.bf16.mxu0 %v10804_v1  ;;  %v5653_v58 = vsel %vm2259_vm6, %v10054_v41, %v10055_v24  ;;  %v5656_v47 = vsel %vm2259_vm6, %v13141_v17, %v10054_v41  ;;  %v5679_v11 = vpack.c.bf16 %v5671_v10, %v5671_v10  ;;  %v5650_v39 = vsel %vm2259_vm6, %v10055_v24, %v5647_v51  ;;  %v10873_v51 = vld [vmem:[#allocation20 + $0xe0] sm:$0xff]   ;;  %v10878_v10 = vld [vmem:[#allocation20 + $0xb0] sm:$0xff]  }
 0x993   : > { %v10058_v52 = vpop.permute.xlu0 %10057  ;;  %v5669_v50 = vmax.f32 %v5621_v22, %v5653_v58  ;;  %v5668_v27 = vmax.f32 %v5620_v28, %v5656_v47  ;;  %v5670_v1 = vmax.f32 %v5622_v60, %v5650_v39  ;;  %v10880_v39 = vld [vmem:[#allocation20 + $0xb8] sm:$0xff]  }
 0x994   : > { %v10060_v53 = vunpack.i.h.bf16 %v10058_v52  ;;  %v10059_v62 = vunpack.i.l.bf16 %v10058_v52 }
 0x995   : > { %6118 = vmatpush1.bf16.msra.mxu0 %v10802_v35  ;;  %v5677_v44 = vpack.c.bf16 %v5669_v50, %v5669_v50  ;;  %v5676_v32 = vpack.c.bf16 %v5668_v27, %v5668_v27  ;;  %v5678_v41 = vpack.c.bf16 %v5670_v1, %v5670_v1  ;;  %v10847_v50 = vld [vmem:[#allocation17] sm:$0x3f]   ;;  %v10849_v27 = vld [vmem:[#allocation20 + $0x40] sm:$0xff]  }
 0x996   : > { %v5649_v20 = vsel %vm2259_vm6, %v10045_v12, %v10060_v53  ;;  %v5658_v34 = vsel %vm2259_vm6, %v10060_v53, %v10050_v8  ;;  %v5648_v36 = vsel %vm2259_vm6, %v10044_v63, %v10059_v62  ;;  %v5657_v40 = vsel %vm2259_vm6, %v10059_v62, %v10049_v6  ;;  %6119 = vmatprep.subr.bf16.mxu0 %v10807_v42  ;;  %v10826_v8 = vld [vmem:[#allocation16 + $0x190] ss:$8 sps:$4 sm:$0xff]   ;;  %v10831_v6 = vld [vmem:[#allocation16 + $0x1a4] ss:$8 sps:$4 sm:$0xff]   ;;  %v10840_v12 = vld [vmem:[#allocation16 + $0x1d4] ss:$8 sps:$4 sm:$0xff]  }
 0x997   : > { %v13162_v28 = vmax.f32 %v5618_v25, %v5649_v20  ;;  %v13166_v18 = vmax.f32 %v5614_v43, %v5648_v36  ;;  %6106 = vmatprep.mubr.bf16.mxu0 %v5677_v44  ;;  %v5663_v46 = vmax.f32 %v5615_v3, %v5657_v40  ;;  %v5667_v4 = vmax.f32 %v5619_v54, %v5658_v34  ;;  %v10816_v25 = vld [vmem:[#allocation16 + $0x154] ss:$8 sps:$4 sm:$0xff]   ;;  %v10819_v43 = vld [vmem:[#allocation16 + $0x164] ss:$8 sps:$4 sm:$0xff]   ;;  %v10817_v54 = vld [vmem:[#allocation16 + $0x160] ss:$8 sps:$4 sm:$0xff]  }
 0x998   : > { %6107 = vmatmul.mubr.bf16.gmra.mrb[60].mxu0 %v5676_v32  ;;  %v10820_v3 = vld [vmem:[#allocation16 + $0x170] ss:$8 sps:$4 sm:$0xff]   ;;  %v10848_v53 = vld [vmem:[#allocation19] sm:$0x3f]   ;;  %v10853_v32 = vld [vmem:[#allocation20 + $0x50] sm:$0xff]  }
 0x999   : > { %v5674_v30 = vpack.c.bf16 %v13162_v28, %v13166_v18  ;;  %6120 = vmatpush1.bf16.msra.mxu0 %v10805_v56  ;;  %v5675_v22 = vpack.c.bf16 %v5667_v4, %v5663_v46  ;;  %v10838_v63 = vld [vmem:[#allocation16 + $0x1d0] ss:$8 sps:$4 sm:$0xff]   ;;  %v10854_v20 = vld [vmem:[#allocation20 + $0x10] sm:$0xff]   ;;  %v10855_v34 = vld [vmem:[#allocation20 + $0x58] sm:$0xff]  }
 0x99a   : > { %6121 = vmatprep.subr.bf16.mxu0 %v10810_v61  ;;  %v10850_v62 = vld [vmem:[#allocation20] sm:$0xff]   ;;  %v10851_v44 = vld [vmem:[#allocation20 + $0x48] sm:$0xff]   ;;  %v10856_v36 = vld [vmem:[#allocation20 + $0x18] sm:$0xff]  }
 0x99b   : > { %6147 = vmatprep.mubr.bf16.mxu0 %v5675_v22  ;;  %v10852_v56 = vld [vmem:[#allocation20 + $0x8] sm:$0xff]   ;;  %v10858_v40 = vld [vmem:[#allocation20 + $0x20] sm:$0xff]   ;;  %v10861_v18 = vld [vmem:[#allocation20 + $0x70] sm:$0xff]  }
 0x99c   : > { %v10859_v61 = vld [vmem:[#allocation20 + $0x68] sm:$0xff]   ;;  %v10862_v46 = vld [vmem:[#allocation20 + $0x30] sm:$0xff]   ;;  %v10863_v4 = vld [vmem:[#allocation20 + $0x78] sm:$0xff]  }
 0x99d   : > { %6122 = vmatpush1.bf16.msra.mxu0 %v10808_v16  ;;  %v10860_v28 = vld [vmem:[#allocation20 + $0x28] sm:$0xff]   ;;  %v10865_v16 = vld [vmem:[#allocation20 + $0xc0] sm:$0xff]  }
 0x99e   : > { %6123 = vmatprep.subr.bf16.mxu0 %v10813_v14  ;;  %v10881_v1 = vld [vmem:[#allocation20 + $0x140] sm:$0xff]  }
 0x9a1   : > { %6124 = vmatpush1.bf16.msra.mxu0 %v10811_v15 }
 0x9a2   : > { %6125 = vmatprep.subr.bf16.mxu0 %v10816_v25 }
 0x9a5   : > { %6126 = vmatpush1.bf16.msra.mxu0 %v10814_v9 }
 0x9a6   : > { %6127 = vmatprep.subr.bf16.mxu0 %v10819_v43 }
 0x9a9   : > { %6128 = vmatpush1.bf16.msra.mxu0 %v10817_v54 }
 0x9aa   : > { %6129 = vmatprep.subr.bf16.mxu0 %v10822_v19 }
 0x9ad   : > { %6130 = vmatpush1.bf16.msra.mxu0 %v10820_v3 }
 0x9ae   : > { %6131 = vmatprep.subr.bf16.mxu0 %v10825_v29 }
 0x9b1   : > { %6132 = vmatpush1.bf16.msra.mxu0 %v10823_v59 }
 0x9b2   : > { %6133 = vmatprep.subr.bf16.mxu0 %v10828_v55 }
 0x9b5   : > { %6134 = vmatpush1.bf16.msra.mxu0 %v10826_v8 }
 0x9b6   : > { %6135 = vmatprep.subr.bf16.mxu0 %v10831_v6 }
 0x9b9   : > { %6136 = vmatpush1.bf16.msra.mxu0 %v10829_v26  ;;  %v10866_v26 = vld [vmem:[#allocation20 + $0x80] sm:$0xff]  }
 0x9ba   : > { %6137 = vmatprep.subr.bf16.mxu0 %v10834_v7  ;;  %v10867_v7 = vld [vmem:[#allocation20 + $0xc8] sm:$0xff]  }
 0x9bd   : > { %6138 = vmatpush1.bf16.msra.mxu0 %v10832_v49 }
 0x9be   : > { %6139 = vmatprep.subr.bf16.mxu0 %v10837_v21  ;;  %v10868_v21 = vld [vmem:[#allocation20 + $0x88] sm:$0xff]  }
 0x9c1   : > { %6140 = vmatpush1.bf16.msra.mxu0 %v10835_v48  ;;  %v10869_v48 = vld [vmem:[#allocation20 + $0xd0] sm:$0xff]  }
 0x9c2   : > { %6141 = vmatprep.subr.bf16.mxu0 %v10840_v12  ;;  %v10870_v12 = vld [vmem:[#allocation20 + $0x90] sm:$0xff]  }
 0x9c5   : > { %6142 = vmatpush1.bf16.msra.mxu0 %v10838_v63  ;;  %v10871_v63 = vld [vmem:[#allocation20 + $0xd8] sm:$0xff]  }
 0x9c6   : > { %6143 = vmatprep.subr.bf16.mxu0 %v10843_v13  ;;  %v10872_v13 = vld [vmem:[#allocation20 + $0x98] sm:$0xff]  }
 0x9c9   : > { %6144 = vmatpush1.bf16.msra.mxu0 %v10841_v45  ;;  %v10874_v45 = vld [vmem:[#allocation20 + $0xa0] sm:$0xff]  }
 0x9ca   : > { %6145 = vmatprep.subr.bf16.mxu0 %v10846_v5  ;;  %v10875_v5 = vld [vmem:[#allocation20 + $0xe8] sm:$0xff]  }
 0x9cd   : > { %6146 = vmatpush1.bf16.msra.mxu0 %v10844_v37  ;;  %v10877_v37 = vld [vmem:[#allocation20 + $0xf0] sm:$0xff]  }
 0x9d0   : > { %6148 = vmatmul.mubr.bf16.vlgmr.msra.gmra.mrb[56].mxu0 %v5674_v30  ;;  %v10864_v30 = vld [vmem:[#allocation20 + $0x38] sm:$0xff]  }
 0x9d1   : > { %6157 = vmatprep.mubr.bf16.mxu0 %v5679_v11  ;;  %v10879_v11 = vld [vmem:[#allocation20 + $0xf8] sm:$0xff]  }
 0x9d8   : > { %6158 = vmatmul.mubr.bf16.gmra.mrb[60].mxu0 %v5678_v41  ;;  %v10882_v41 = vld [vmem:[#allocation20 + $0x100] sm:$0xff]  }
 0x9d9   : > { %6220 = vmatprep.mubr.bf16.mxu0 %v13382_v23 }
 0xaa3   : > { %v6149_v17 = vpop.f32.mrb[56].mxu0 }
 0xaa4   : > { %v6151_v35 = vpop.f32.mrb[57].mxu0 }
 0xaa5   : > { %v6153_v33 = vpop.f32.mrb[58].mxu0 }
 0xaa6   : > { %v6166_v2 = vpack.c.bf16 %v6153_v33, %v6149_v17  ;;  %v6155_v58 = vpop.f32.mrb[59].mxu0 }
 0xaa7   : > { %v6167_v42 = vpack.c.bf16 %v6155_v58, %v6151_v35  ;;  %v10883_v35 = vld [vmem:[#allocation20 + $0x148] sm:$0xff]   ;;  %v10885_v58 = vld [vmem:[#allocation20 + $0x150] sm:$0xff]  }
 0xaa9   : > { %6188 = vmatprep.subr.bf16.mxu0 %v6167_v42 }
 0xaaa   : > { %6189 = vmatpush1.bf16.msra.mxu0 %v6166_v2 }
 0xaab   : > { %v6159_v31 = vpop.f32.mrb[60].mxu0 }
 0xaac   : > { %v6168_v57 = vpack.c.bf16 %v6159_v31, %v6159_v31  ;;  %v6161_v24 = vpop.f32.mrb[61].mxu0  ;;  %v10887_v31 = vld [vmem:[#allocation20 + $0x158] sm:$0xff]  }
 0xaad   : > { %v6169_v47 = vpack.c.bf16 %v6161_v24, %v6161_v24  ;;  %v6163_v52 = vpop.f32.mrb[62].mxu0  ;;  %v10889_v24 = vld [vmem:[#allocation20 + $0x160] sm:$0xff]  }
 0xaae   : > { %v6183_v38 = vsel %vm6181_vm9, %v6168_v57, 0  ;;  %v6164_v60 = vpop.f32.mrb[63].mxu0  ;;  %v10888_v57 = vld [vmem:[#allocation20 + $0x118] sm:$0xff]   ;;  %v10891_v52 = vld [vmem:[#allocation20 + $0x168] sm:$0xff]  }
 0xaaf   : > { %9148 = vmatprep.subr.msk.bf16.mxu0 %vm6181_vm9, %v6169_v47  ;;  %v10893_v60 = vld [vmem:[#allocation20 + $0x170] sm:$0xff]  }
 0xab0   : > { %6191 = vmatpush1.bf16.msra.mxu0 %v6183_v38 }
 0xab1   : > { %6241 = vmatprep.subr.bf16.mxu0 %v6167_v42  ;;  %v10886_v42 = vld [vmem:[#allocation20 + $0x110] sm:$0xff]  }
 0xab3   : > { %9149 = vmatmul.mubr.msk.bf16.vlgmr.msra.gmra.mrb[64].mxu0 %vm6177_vm10, %v10847_v50  ;;  %v10894_v50 = vld [vmem:[#allocation20 + $0x130] sm:$0xff]  }
 0xab4   : > { %6242 = vmatpush1.bf16.msra.mxu0 %v6166_v2  ;;  %6273 = vmatprep.mubr.bf16.mxu0 %v13382_v23  ;;  %v10857_v23 = vld [vmem:[#allocation20 + $0x60] sm:$0xff]   ;;  %v10884_v2 = vld [vmem:[#allocation20 + $0x108] sm:$0xff]  }
 0xab5   : > { %9151 = vmatprep.subr.msk.bf16.mxu0 %vm6181_vm9, %v6169_v47  ;;  %v10890_v47 = vld [vmem:[#allocation20 + $0x120] sm:$0xff]  }
 0xab8   : > { %6244 = vmatpush1.bf16.msra.mxu0 %v6183_v38  ;;  %v10892_v38 = vld [vmem:[#allocation20 + $0x128] sm:$0xff]  }
 0xab9   : > { %9340 = vmatprep.subr.bf16.mxu0 %v10849_v27  ;;  %v10895_v27 = vld [vmem:[#allocation20 + $0x178] sm:$0xff]  }
 0xabb   : > { %9152 = vmatmul.mubr.msk.bf16.vlgmr.msra.gmra.mrb[68].mxu0 %vm6177_vm10, %v10848_v53  ;;  %v10896_v53 = vld [vmem:[#allocation20 + $0x138] sm:$0xff]  }
 0xabc   : > { %9341 = vmatpush3.bf16.msra.mxu0 %v10850_v62  ;;  %v10897_v62 = vld [vmem:[#allocation20 + $0x1c0] sm:$0xff]  }
 0xabd   : > { %9342 = vmatprep.subr.bf16.mxu0 %v10851_v44  ;;  %v10898_v44 = vld [vmem:[#allocation20 + $0x180] sm:$0xff]  }
 0xac0   : > { %9343 = vmatpush3.bf16.msra.mxu0 %v10852_v56 }
 0xac1   : > { %9344 = vmatprep.subr.bf16.mxu0 %v10853_v32  ;;  %v10899_v32 = vld [vmem:[#allocation20 + $0x1c8] sm:$0xff]  }
 0xac4   : > { %9345 = vmatpush3.bf16.msra.mxu0 %v10854_v20 }
 0xac5   : > { %9346 = vmatprep.subr.bf16.mxu0 %v10855_v34  ;;  %v10900_v34 = vld [vmem:[#allocation20 + $0x188] sm:$0xff]  }
 0xac8   : > { %9347 = vmatpush3.bf16.msra.mxu0 %v10856_v36  ;;  %v10901_v36 = vld [vmem:[#allocation20 + $0x1d0] sm:$0xff]  }
 0xac9   : > { %9348 = vmatprep.subr.bf16.mxu0 %v10857_v23  ;;  %v10902_v23 = vld [vmem:[#allocation20 + $0x190] sm:$0xff]  }
 0xacc   : > { %9349 = vmatpush3.bf16.msra.mxu0 %v10858_v40  ;;  %v10903_v40 = vld [vmem:[#allocation20 + $0x1d8] sm:$0xff]  }
 0xacd   : > { %9350 = vmatprep.subr.bf16.mxu0 %v10859_v61  ;;  %v10904_v61 = vld [vmem:[#allocation20 + $0x198] sm:$0xff]  }
 0xad0   : > { %9351 = vmatpush3.bf16.msra.mxu0 %v10860_v28  ;;  %v10905_v28 = vld [vmem:[#allocation20 + $0x1e0] sm:$0xff]  }
 0xad1   : > { %9352 = vmatprep.subr.bf16.mxu0 %v10861_v18  ;;  %v10906_v18 = vld [vmem:[#allocation20 + $0x1a0] sm:$0xff]  }
 0xad4   : > { %9353 = vmatpush3.bf16.msra.mxu0 %v10862_v46  ;;  %v10907_v46 = vld [vmem:[#allocation20 + $0x1e8] sm:$0xff]  }
 0xad5   : > { %9354 = vmatprep.subr.bf16.mxu0 %v10863_v4  ;;  %v10908_v4 = vld [vmem:[#allocation20 + $0x1a8] sm:$0xff]  }
 0xad8   : > { %9355 = vmatpush3.bf16.msra.mxu0 %v10864_v30  ;;  %v10909_v30 = vld [vmem:[#allocation20 + $0x1f0] sm:$0xff]  }
 0xad9   : > { %9362 = vmatprep.subr.bf16.mxu0 %v10865_v16  ;;  %v10910_v16 = vld [vmem:[#allocation20 + $0x1b0] sm:$0xff]  }
 0xb86   : > { %v6222_v22 = vpop.f32.mrb[64].mxu0 }
 0xb87   : > { %v6224_v14 = vpop.f32.mrb[65].mxu0 }
 0xb88   : > { %v6226_v15 = vpop.f32.mrb[66].mxu0 }
 0xb89   : > { %v6228_v25 = vpop.f32.mrb[67].mxu0 }
 0xb8e   : > { %v6275_v9 = vpop.f32.mrb[68].mxu0 }
 0xb8f   : > { %v6284_v43 = vmax.f32 %v6222_v22, %v6275_v9  ;;  %v6277_v54 = vpop.f32.mrb[69].mxu0  ;;  %v10911_v22 = vld [vmem:[#allocation20 + $0x1f8] sm:$0xff]  }
 0xb90   : > { %v6285_v19 = vmax.f32 %v6224_v14, %v6277_v54  ;;  %v6279_v3 = vpop.f32.mrb[70].mxu0  ;;  %v10912_v14 = vld [vmem:[#allocation20 + $0x1b8] sm:$0xff]  }
 0xb91   : > { %v6286_v29 = vmax.f32 %v6226_v15, %v6279_v3  ;;  %v6281_v59 = vpop.f32.mrb[71].mxu0  ;;  %v10913_v15 = vld [vmem:[#allocation20 + $0x240] sm:$0xff]   ;;  %v10917_v3 = vld [vmem:[#allocation20 + $0x250] sm:$0xff]  }
 0xb92   : > { %v6287_v55 = vmax.f32 %v6228_v25, %v6281_v59  ;;  %v10914_v25 = vld [vmem:[#allocation20 + $0x200] sm:$0xff]   ;;  %v10919_v59 = vld [vmem:[#allocation20 + $0x258] sm:$0xff]  }
 0xb93   : > { %v13183_v8 = vpack.c.bf16 %v6286_v29, %v6284_v43  ;;  %v10915_v43 = vld [vmem:[#allocation20 + $0x248] sm:$0xff]   ;;  %v10918_v29 = vld [vmem:[#allocation20 + $0x210] sm:$0xff]  }
 0xb94   : > { %v13185_v6 = vpack.c.bf16 %v6287_v55, %v6285_v19  ;;  %v10916_v19 = vld [vmem:[#allocation20 + $0x208] sm:$0xff]   ;;  %v10920_v55 = vld [vmem:[#allocation20 + $0x218] sm:$0xff]  }
 0xb95   : > { %v13194_v17 = vshrl.u32 %v13183_v8, 16  ;;  %v6673_v56 = vrot.slane %v13183_v8, 1 }
 0xb96   : > { %6451 = vmatprep.mubr.bf16.mxu0 %v13185_v6  ;;  %v13189_v49 = vshrl.u32 %v13185_v6, 16  ;;  %v6674_v33 = vrot.slane %v13185_v6, 1  ;;  %v7022_v54 = vrot.slane %v13185_v6, 2 }
 0xb97   : > { %6452 = vmatmul.mubr.bf16.vlgmr.msra.gmra.mrb[72].mxu0 %v13183_v8  ;;  %v6847_v9 = vrot.slane %v13194_v17, 1 }
 0xb98   : > { %9363 = vmatpush3.bf16.msra.mxu0 %v10866_v26  ;;  %6629 = vmatprep.mubr.bf16.mxu0 %v13189_v49  ;;  %v6848_v20 = vrot.slane %v13189_v49, 1  ;;  %v10921_v26 = vld [vmem:[#allocation20 + $0x260] sm:$0xff]  }
 0xb99   : > { %9364 = vmatprep.subr.bf16.mxu0 %v10867_v7  ;;  %v10922_v7 = vld [vmem:[#allocation20 + $0x220] sm:$0xff]  }
 0xb9c   : > { %9365 = vmatpush3.bf16.msra.mxu0 %v10868_v21  ;;  %v10923_v21 = vld [vmem:[#allocation20 + $0x268] sm:$0xff]  }
 0xb9d   : > { %9366 = vmatprep.subr.bf16.mxu0 %v10869_v48  ;;  %v10924_v48 = vld [vmem:[#allocation20 + $0x228] sm:$0xff]  }
 0xba0   : > { %9367 = vmatpush3.bf16.msra.mxu0 %v10870_v12  ;;  %v10925_v12 = vld [vmem:[#allocation20 + $0x270] sm:$0xff]  }
 0xba1   : > { %9368 = vmatprep.subr.bf16.mxu0 %v10871_v63  ;;  %v10926_v63 = vld [vmem:[#allocation20 + $0x230] sm:$0xff]  }
 0xba4   : > { %9369 = vmatpush3.bf16.msra.mxu0 %v10872_v13  ;;  %v10927_v13 = vld [vmem:[#allocation20 + $0x278] sm:$0xff]  }
 0xba5   : > { %9370 = vmatprep.subr.bf16.mxu0 %v10873_v51  ;;  %v10928_v51 = vld [vmem:[#allocation20 + $0x238] sm:$0xff]  }
 0xba8   : > { %9371 = vmatpush3.bf16.msra.mxu0 %v10874_v45  ;;  %v10929_v45 = vld [vmem:[#allocation20 + $0x2c0] sm:$0xff]  }
 0xba9   : > { %9372 = vmatprep.subr.bf16.mxu0 %v10875_v5  ;;  %v10930_v5 = vld [vmem:[#allocation20 + $0x280] sm:$0xff]  }
 0xbac   : > { %9373 = vmatpush3.bf16.msra.mxu0 %v10876_v0  ;;  %v7021_v0 = vrot.slane %v13183_v8, 2 }
 0xbad   : > { %9374 = vmatprep.subr.bf16.mxu0 %v10877_v37  ;;  %v10931_v37 = vld [vmem:[#allocation20 + $0x2c8] sm:$0xff]  }
 0xbb0   : > { %9375 = vmatpush3.bf16.msra.mxu0 %v10878_v10  ;;  %v7196_v10 = vrot.slane %v13189_v49, 2 }
 0xbb1   : > { %9376 = vmatprep.subr.bf16.mxu0 %v10879_v11  ;;  %v10932_v11 = vld [vmem:[#allocation20 + $0x288] sm:$0xff]  }
 0xbb4   : > { %9377 = vmatpush3.bf16.msra.mxu0 %v10880_v39  ;;  %v10933_v39 = vld [vmem:[#allocation20 + $0x2d0] sm:$0xff]  }
 0xbb5   : > { %9384 = vmatprep.subr.bf16.mxu0 %v10881_v1  ;;  %v10934_v1 = vld [vmem:[#allocation20 + $0x290] sm:$0xff]  }
 0xbb7   : > { %6630 = vmatmul.mubr.bf16.vlgmr.msra.gmra.mrb[76].mxu0 %v13194_v17 }
 0xbb8   : > { %9385 = vmatpush3.bf16.msra.mxu0 %v10882_v41  ;;  %6805 = vmatprep.mubr.bf16.mxu0 %v6674_v33  ;;  %v10935_v41 = vld [vmem:[#allocation20 + $0x2d8] sm:$0xff]   ;;  %v10937_v33 = vld [vmem:[#allocation20 + $0x2e0] sm:$0xff]  }
 0xbb9   : > { %9386 = vmatprep.subr.bf16.mxu0 %v10883_v35  ;;  %v10936_v35 = vld [vmem:[#allocation20 + $0x298] sm:$0xff]  }
 0xbbc   : > { %9387 = vmatpush3.bf16.msra.mxu0 %v10884_v2  ;;  %v10938_v2 = vld [vmem:[#allocation20 + $0x2a0] sm:$0xff]  }
 0xbbd   : > { %9388 = vmatprep.subr.bf16.mxu0 %v10885_v58  ;;  %v10939_v58 = vld [vmem:[#allocation20 + $0x2e8] sm:$0xff]  }
 0xbc0   : > { %9389 = vmatpush3.bf16.msra.mxu0 %v10886_v42  ;;  %v10940_v42 = vld [vmem:[#allocation20 + $0x2a8] sm:$0xff]  }
 0xbc1   : > { %9390 = vmatprep.subr.bf16.mxu0 %v10887_v31  ;;  %v10941_v31 = vld [vmem:[#allocation20 + $0x2f0] sm:$0xff]  }
 0xbc4   : > { %9391 = vmatpush3.bf16.msra.mxu0 %v10888_v57  ;;  %v10942_v57 = vld [vmem:[#allocation20 + $0x2b0] sm:$0xff]  }
 0xbc5   : > { %9392 = vmatprep.subr.bf16.mxu0 %v10889_v24  ;;  %v10943_v24 = vld [vmem:[#allocation20 + $0x2f8] sm:$0xff]  }
 0xbc8   : > { %9393 = vmatpush3.bf16.msra.mxu0 %v10890_v47  ;;  %v10944_v47 = vld [vmem:[#allocation20 + $0x2b8] sm:$0xff]  }
 0xbc9   : > { %9394 = vmatprep.subr.bf16.mxu0 %v10891_v52  ;;  %v10945_v52 = vld [vmem:[#allocation20 + $0x340] sm:$0xff]  }
 0xbcc   : > { %9395 = vmatpush3.bf16.msra.mxu0 %v10892_v38  ;;  %v10946_v38 = vld [vmem:[#allocation20 + $0x300] sm:$0xff]  }
 0xbcd   : > { %9396 = vmatprep.subr.bf16.mxu0 %v10893_v60  ;;  %v7195_v60 = vrot.slane %v13194_v17, 2 }
 0xbd0   : > { %9397 = vmatpush3.bf16.msra.mxu0 %v10894_v50  ;;  %v10947_v50 = vld [vmem:[#allocation20 + $0x348] sm:$0xff]  }
 0xbd1   : > { %9398 = vmatprep.subr.bf16.mxu0 %v10895_v27  ;;  %v7370_v27 = vrot.slane %v13185_v6, 3 }
 0xbd4   : > { %9399 = vmatpush3.bf16.msra.mxu0 %v10896_v53  ;;  %v10948_v53 = vld [vmem:[#allocation20 + $0x308] sm:$0xff]  }
 0xbd5   : > { %9406 = vmatprep.subr.bf16.mxu0 %v10897_v62  ;;  %v10949_v62 = vld [vmem:[#allocation20 + $0x350] sm:$0xff]  }
 0xbd7   : > { %6806 = vmatmul.mubr.bf16.vlgmr.msra.gmra.mrb[80].mxu0 %v6673_v56  ;;  %v10951_v56 = vld [vmem:[#allocation20 + $0x358] sm:$0xff]  }
 0xbd8   : > { %9407 = vmatpush3.bf16.msra.mxu0 %v10898_v44  ;;  %6979 = vmatprep.mubr.bf16.mxu0 %v6848_v20  ;;  %v10950_v44 = vld [vmem:[#allocation20 + $0x310] sm:$0xff]   ;;  %v10953_v20 = vld [vmem:[#allocation20 + $0x360] sm:$0xff]  }
 0xbd9   : > { %9408 = vmatprep.subr.bf16.mxu0 %v10899_v32  ;;  %v10952_v32 = vld [vmem:[#allocation20 + $0x318] sm:$0xff]  }
 0xbdc   : > { %9409 = vmatpush3.bf16.msra.mxu0 %v10900_v34  ;;  %v10954_v34 = vld [vmem:[#allocation20 + $0x320] sm:$0xff]  }
 0xbdd   : > { %9410 = vmatprep.subr.bf16.mxu0 %v10901_v36  ;;  %v10955_v36 = vld [vmem:[#allocation20 + $0x368] sm:$0xff]  }
 0xbe0   : > { %9411 = vmatpush3.bf16.msra.mxu0 %v10902_v23  ;;  %v10956_v23 = vld [vmem:[#allocation20 + $0x328] sm:$0xff]  }
 0xbe1   : > { %9412 = vmatprep.subr.bf16.mxu0 %v10903_v40  ;;  %v10957_v40 = vld [vmem:[#allocation20 + $0x370] sm:$0xff]  }
 0xbe4   : > { %9413 = vmatpush3.bf16.msra.mxu0 %v10904_v61  ;;  %v10958_v61 = vld [vmem:[#allocation20 + $0x330] sm:$0xff]  }
 0xbe5   : > { %9414 = vmatprep.subr.bf16.mxu0 %v10905_v28  ;;  %v10959_v28 = vld [vmem:[#allocation20 + $0x378] sm:$0xff]  }
 0xbe8   : > { %9415 = vmatpush3.bf16.msra.mxu0 %v10906_v18  ;;  %v10960_v18 = vld [vmem:[#allocation20 + $0x338] sm:$0xff]  }
 0xbe9   : > { %9416 = vmatprep.subr.bf16.mxu0 %v10907_v46  ;;  %v10961_v46 = vld [vmem:[#allocation20 + $0x3c0] sm:$0xff]  }
 0xbec   : > { %9417 = vmatpush3.bf16.msra.mxu0 %v10908_v4  ;;  %v10962_v4 = vld [vmem:[#allocation20 + $0x380] sm:$0xff]  }
 0xbed   : > { %9418 = vmatprep.subr.bf16.mxu0 %v10909_v30  ;;  %v7369_v30 = vrot.slane %v13183_v8, 3 }
 0xbf0   : > { %9419 = vmatpush3.bf16.msra.mxu0 %v10910_v16  ;;  %v10963_v16 = vld [vmem:[#allocation20 + $0x3c8] sm:$0xff]  }
 0xbf1   : > { %9420 = vmatprep.subr.bf16.mxu0 %v10911_v22  ;;  %v7544_v22 = vrot.slane %v13189_v49, 3 }
 0xbf4   : > { %9421 = vmatpush3.bf16.msra.mxu0 %v10912_v14  ;;  %v10964_v14 = vld [vmem:[#allocation20 + $0x388] sm:$0xff]  }
 0xbf5   : > { %9428 = vmatprep.subr.bf16.mxu0 %v10913_v15  ;;  %v10965_v15 = vld [vmem:[#allocation20 + $0x3d0] sm:$0xff]  }
 0xbf7   : > { %6980 = vmatmul.mubr.bf16.vlgmr.msra.gmra.mrb[84].mxu0 %v6847_v9  ;;  %v10967_v9 = vld [vmem:[#allocation20 + $0x3d8] sm:$0xff]  }
 0xbf8   : > { %9429 = vmatpush3.bf16.msra.mxu0 %v10914_v25  ;;  %7153 = vmatprep.mubr.bf16.mxu0 %v7022_v54  ;;  %v10966_v25 = vld [vmem:[#allocation20 + $0x390] sm:$0xff]   ;;  %v10969_v54 = vld [vmem:[#allocation20 + $0x3e0] sm:$0xff]  }
 0xbf9   : > { %9430 = vmatprep.subr.bf16.mxu0 %v10915_v43  ;;  %v10968_v43 = vld [vmem:[#allocation20 + $0x398] sm:$0xff]  }
 0xbfc   : > { %9431 = vmatpush3.bf16.msra.mxu0 %v10916_v19  ;;  %v10970_v19 = vld [vmem:[#allocation20 + $0x3a0] sm:$0xff]  }
 0xbfd   : > { %9432 = vmatprep.subr.bf16.mxu0 %v10917_v3  ;;  %v10971_v3 = vld [vmem:[#allocation20 + $0x3e8] sm:$0xff]  }
 0xc00   : > { %9433 = vmatpush3.bf16.msra.mxu0 %v10918_v29  ;;  %v10972_v29 = vld [vmem:[#allocation20 + $0x3a8] sm:$0xff]  }
 0xc01   : > { %9434 = vmatprep.subr.bf16.mxu0 %v10919_v59  ;;  %v10973_v59 = vld [vmem:[#allocation20 + $0x3f0] sm:$0xff]  }
 0xc04   : > { %9435 = vmatpush3.bf16.msra.mxu0 %v10920_v55 }
 0xc05   : > { %9436 = vmatprep.subr.bf16.mxu0 %v10921_v26 }
 0xc08   : > { %9437 = vmatpush3.bf16.msra.mxu0 %v10922_v7 }
 0xc09   : > { %9438 = vmatprep.subr.bf16.mxu0 %v10923_v21 }
 0xc0c   : > { %9439 = vmatpush3.bf16.msra.mxu0 %v10924_v48  ;;  %v10974_v48 = vld [vmem:[#allocation20 + $0x3b0] sm:$0xff]  }
 0xc0d   : > { %9440 = vmatprep.subr.bf16.mxu0 %v10925_v12 }
 0xc10   : > { %9441 = vmatpush3.bf16.msra.mxu0 %v10926_v63  ;;  %v10975_v63 = vld [vmem:[#allocation20 + $0x3f8] sm:$0xff]  }
 0xc11   : > { %9442 = vmatprep.subr.bf16.mxu0 %v10927_v13  ;;  %v10976_v13 = vld [vmem:[#allocation20 + $0x3b8] sm:$0xff]  }
 0xc14   : > { %9443 = vmatpush3.bf16.msra.mxu0 %v10928_v51  ;;  %v10977_v51 = vld [vmem:[#allocation20 + $0x440] sm:$0xff]  }
 0xc15   : > { %9450 = vmatprep.subr.bf16.mxu0 %v10929_v45  ;;  %v10978_v45 = vld [vmem:[#allocation20 + $0x400] sm:$0xff]  }
 0xc17   : > { %7154 = vmatmul.mubr.bf16.vlgmr.msra.gmra.mrb[88].mxu0 %v7021_v0  ;;  %v10979_v0 = vld [vmem:[#allocation20 + $0x448] sm:$0xff]  }
 0xc18   : > { %9451 = vmatpush3.bf16.msra.mxu0 %v10930_v5  ;;  %7327 = vmatprep.mubr.bf16.mxu0 %v7196_v10  ;;  %v7543_v5 = vrot.slane %v13194_v17, 3  ;;  %v10980_v10 = vld [vmem:[#allocation20 + $0x408] sm:$0xff]  }
 0xc19   : > { %9452 = vmatprep.subr.bf16.mxu0 %v10931_v37  ;;  %v7718_v37 = vrot.slane %v13185_v6, 4 }
 0xc1c   : > { %9453 = vmatpush3.bf16.msra.mxu0 %v10932_v11  ;;  %v10981_v11 = vld [vmem:[#allocation20 + $0x450] sm:$0xff]  }
 0xc1d   : > { %9454 = vmatprep.subr.bf16.mxu0 %v10933_v39  ;;  %v10982_v39 = vld [vmem:[#allocation20 + $0x410] sm:$0xff]  }
 0xc20   : > { %9455 = vmatpush3.bf16.msra.mxu0 %v10934_v1  ;;  %v10983_v1 = vld [vmem:[#allocation20 + $0x458] sm:$0xff]  }
 0xc21   : > { %9456 = vmatprep.subr.bf16.mxu0 %v10935_v41  ;;  %v10984_v41 = vld [vmem:[#allocation20 + $0x418] sm:$0xff]  }
 0xc24   : > { %9457 = vmatpush3.bf16.msra.mxu0 %v10936_v35  ;;  %v10985_v35 = vld [vmem:[#allocation20 + $0x460] sm:$0xff]  }
 0xc25   : > { %9458 = vmatprep.subr.bf16.mxu0 %v10937_v33  ;;  %v10986_v33 = vld [vmem:[#allocation20 + $0x420] sm:$0xff]  }
 0xc28   : > { %9459 = vmatpush3.bf16.msra.mxu0 %v10938_v2  ;;  %v10987_v2 = vld [vmem:[#allocation20 + $0x468] sm:$0xff]  }
 0xc29   : > { %9460 = vmatprep.subr.bf16.mxu0 %v10939_v58  ;;  %v10988_v58 = vld [vmem:[#allocation20 + $0x428] sm:$0xff]  }
 0xc2c   : > { %9461 = vmatpush3.bf16.msra.mxu0 %v10940_v42  ;;  %v6290_v42 = vld [vmem:[#allocation22] sm:$0x1] }
 0xc2d   : > { %9462 = vmatprep.subr.bf16.mxu0 %v10941_v31  ;;  %v10989_v31 = vld [vmem:[#allocation20 + $0x470] sm:$0xff]  }
 0xc30   : > { %9463 = vmatpush3.bf16.msra.mxu0 %v10942_v57 }
 0xc31   : > { %9464 = vmatprep.subr.bf16.mxu0 %v10943_v24 }
 0xc34   : > { %9465 = vmatpush3.bf16.msra.mxu0 %v10944_v47 }
 0xc35   : > { %9472 = vmatprep.subr.bf16.mxu0 %v10945_v52 }
 0xc37   : > { %7328 = vmatmul.mubr.bf16.vlgmr.msra.gmra.mrb[92].mxu0 %v7195_v60  ;;  %v10990_v60 = vld [vmem:[#allocation20 + $0x430] sm:$0xff]  }
 0xc38   : > { %9473 = vmatpush3.bf16.msra.mxu0 %v10946_v38  ;;  %7501 = vmatprep.mubr.bf16.mxu0 %v7370_v27  ;;  %v10991_v27 = vld [vmem:[#allocation20 + $0x478] sm:$0xff]  }
 0xc39   : > { %9474 = vmatprep.subr.bf16.mxu0 %v10947_v50 }
 0xc3c   : > { %9475 = vmatpush3.bf16.msra.mxu0 %v10948_v53 }
 0xc3d   : > { %9476 = vmatprep.subr.bf16.mxu0 %v10949_v62  ;;  %v10992_v62 = vld [vmem:[#allocation20 + $0x438] sm:$0xff]  }
 0xc40   : > { %9477 = vmatpush3.bf16.msra.mxu0 %v10950_v44  ;;  %v10993_v44 = vld [vmem:[#allocation20 + $0x4c0] sm:$0xff]  }
 0xc41   : > { %9478 = vmatprep.subr.bf16.mxu0 %v10951_v56  ;;  %v10994_v56 = vld [vmem:[#allocation20 + $0x480] sm:$0xff]  }
 0xc44   : > { %9479 = vmatpush3.bf16.msra.mxu0 %v10952_v32  ;;  %v7717_v32 = vrot.slane %v13183_v8, 4 }
 0xc45   : > { %9480 = vmatprep.subr.bf16.mxu0 %v10953_v20  ;;  %v10995_v20 = vld [vmem:[#allocation20 + $0x4c8] sm:$0xff]  }
 0xc48   : > { %9481 = vmatpush3.bf16.msra.mxu0 %v10954_v34  ;;  %v7892_v34 = vrot.slane %v13189_v49, 4  ;;  %v11004_v49 = vld [vmem:[#allocation20 + $0x4a8] sm:$0xff]  }
 0xc49   : > { %9482 = vmatprep.subr.bf16.mxu0 %v10955_v36  ;;  %v10996_v36 = vld [vmem:[#allocation20 + $0x488] sm:$0xff]  }
 0xc4c   : > { %9483 = vmatpush3.bf16.msra.mxu0 %v10956_v23  ;;  %v10997_v23 = vld [vmem:[#allocation20 + $0x4d0] sm:$0xff]  }
 0xc4d   : > { %9484 = vmatprep.subr.bf16.mxu0 %v10957_v40  ;;  %v10998_v40 = vld [vmem:[#allocation20 + $0x490] sm:$0xff]  }
 0xc50   : > { %9485 = vmatpush3.bf16.msra.mxu0 %v10958_v61  ;;  %v10999_v61 = vld [vmem:[#allocation20 + $0x4d8] sm:$0xff]  }
 0xc51   : > { %9486 = vmatprep.subr.bf16.mxu0 %v10959_v28  ;;  %v11000_v28 = vld [vmem:[#allocation20 + $0x498] sm:$0xff]  }
 0xc54   : > { %9487 = vmatpush3.bf16.msra.mxu0 %v10960_v18  ;;  %v11001_v18 = vld [vmem:[#allocation20 + $0x4e0] sm:$0xff]  }
 0xc55   : > { %9494 = vmatprep.subr.bf16.mxu0 %v10961_v46  ;;  %v11002_v46 = vld [vmem:[#allocation20 + $0x4a0] sm:$0xff]  }
 0xc57   : > { %7502 = vmatmul.mubr.bf16.vlgmr.msra.gmra.mrb[96].mxu0 %v7369_v30  ;;  %v11005_v30 = vld [vmem:[#allocation20 + $0x4f0] sm:$0xff]  }
 0xc58   : > { %9495 = vmatpush3.bf16.msra.mxu0 %v10962_v4  ;;  %7675 = vmatprep.mubr.bf16.mxu0 %v7544_v22  ;;  %v11003_v4 = vld [vmem:[#allocation20 + $0x4e8] sm:$0xff]  }
 0xc59   : > { %9496 = vmatprep.subr.bf16.mxu0 %v10963_v16 }
 0xc5c   : > { %9497 = vmatpush3.bf16.msra.mxu0 %v10964_v14 }
 0xc5d   : > { %9498 = vmatprep.subr.bf16.mxu0 %v10965_v15 }
 0xc60   : > { %9499 = vmatpush3.bf16.msra.mxu0 %v10966_v25  ;;  %v11006_v25 = vld [vmem:[#allocation20 + $0x4b0] sm:$0xff]  }
 0xc61   : > { %9500 = vmatprep.subr.bf16.mxu0 %v10967_v9 }
 0xc64   : > { %9501 = vmatpush3.bf16.msra.mxu0 %v10968_v43  ;;  %v11007_v43 = vld [vmem:[#allocation20 + $0x4f8] sm:$0xff]  }
 0xc65   : > { %9502 = vmatprep.subr.bf16.mxu0 %v10969_v54 }
 0xc68   : > { %9503 = vmatpush3.bf16.msra.mxu0 %v10970_v19  ;;  %v11008_v19 = vld [vmem:[#allocation20 + $0x4b8] sm:$0xff]  }
 0xc69   : > { %9504 = vmatprep.subr.bf16.mxu0 %v10971_v3  ;;  %v11009_v3 = vld [vmem:[#allocation20 + $0x540] sm:$0xff]  }
 0xc6a   : > { %v9356_v55 = vpop.f32.mrb[72].mxu0 }
 0xc6b   : > { %v9357_v26 = vpop.f32.mrb[73].mxu0 }
 0xc6c   : > { %v9358_v7 = vadd.f32 %v9357_v26, %v9356_v55  ;;  %9505 = vmatpush3.bf16.msra.mxu0 %v10972_v29  ;;  %v9359_v21 = vpop.f32.mrb[74].mxu0  ;;  %v11010_v29 = vld [vmem:[#allocation20 + $0x500] sm:$0xff]   ;;  %v11011_v55 = vld [vmem:[#allocation20 + $0x548] sm:$0xff]   ;;  %v8066_v26 = vrot.slane %v13185_v6, 5 }
 0xc6d   : > { %v9360_v12 = vpop.f32.mrb[75].mxu0  ;;  %9506 = vmatprep.subr.bf16.mxu0 %v10973_v59  ;;  %v7891_v59 = vrot.slane %v13194_v17, 4  ;;  %v11013_v21 = vld [vmem:[#allocation20 + $0x550] sm:$0xff]   ;;  %v11018_v17 = vld [vmem:[#allocation20 + $0x520] sm:$0xff]   ;;  %v11020_v6 = vld [vmem:[#allocation20 + $0x528] sm:$0xff]  }
 0xc6e   : > { %v6459_v47 = vadd.f32 %v9358_v7, %v6290_v42  ;;  %v11012_v7 = vld [vmem:[#allocation20 + $0x508] sm:$0xff]   ;;  %v11015_v12 = vld [vmem:[#allocation20 + $0x558] sm:$0xff]  }
 0xc70   : > { %9507 = vmatpush3.bf16.msra.mxu0 %v10974_v48  ;;  %v11014_v48 = vld [vmem:[#allocation20 + $0x510] sm:$0xff]  }
 0xc71   : > { %9508 = vmatprep.subr.bf16.mxu0 %v10975_v63  ;;  %v11016_v63 = vld [vmem:[#allocation20 + $0x518] sm:$0xff]  }
 0xc74   : > { %9509 = vmatpush3.bf16.msra.mxu0 %v10976_v13  ;;  %v11017_v13 = vld [vmem:[#allocation20 + $0x560] sm:$0xff]  }
 0xc75   : > { %9516 = vmatprep.subr.bf16.mxu0 %v10977_v51  ;;  %v11019_v51 = vld [vmem:[#allocation20 + $0x568] sm:$0xff]  }
 0xc77   : > { %7676 = vmatmul.mubr.bf16.vlgmr.msra.gmra.mrb[100].mxu0 %v7543_v5 }
 0xc78   : > { %9517 = vmatpush3.bf16.msra.mxu0 %v10978_v45  ;;  %7849 = vmatprep.mubr.bf16.mxu0 %v7718_v37  ;;  %v11021_v45 = vld [vmem:[#allocation20 + $0x570] sm:$0xff]  }
 0xc79   : > { %9518 = vmatprep.subr.bf16.mxu0 %v10979_v0 }
 0xc7c   : > { %9519 = vmatpush3.bf16.msra.mxu0 %v10980_v10 }
 0xc7d   : > { %9520 = vmatprep.subr.bf16.mxu0 %v10981_v11  ;;  %v11022_v11 = vld [vmem:[#allocation20 + $0x530] sm:$0xff]  }
 0xc80   : > { %9521 = vmatpush3.bf16.msra.mxu0 %v10982_v39 }
 0xc81   : > { %9522 = vmatprep.subr.bf16.mxu0 %v10983_v1  ;;  %v11023_v1 = vld [vmem:[#allocation20 + $0x578] sm:$0xff]  }
 0xc84   : > { %9523 = vmatpush3.bf16.msra.mxu0 %v10984_v41 }
 0xc85   : > { %9524 = vmatprep.subr.bf16.mxu0 %v10985_v35  ;;  %v11024_v35 = vld [vmem:[#allocation20 + $0x538] sm:$0xff]  }
 0xc88   : > { %9525 = vmatpush3.bf16.msra.mxu0 %v10986_v33  ;;  %v8065_v33 = vrot.slane %v13183_v8, 5  ;;  %v11027_v8 = vld [vmem:[#allocation23 + $0x10] sm:$0xff]  }
 0xc89   : > { %9526 = vmatprep.subr.bf16.mxu0 %v10987_v2 }
 0xc8a   : > { %v9378_v57 = vpop.f32.mrb[76].mxu0 }
 0xc8b   : > { %v9379_v24 = vpop.f32.mrb[77].mxu0 }
 0xc8c   : > { %v9380_v52 = vadd.f32 %v9379_v24, %v9378_v57  ;;  %v9381_v38 = vpop.f32.mrb[78].mxu0  ;;  %9527 = vmatpush3.bf16.msra.mxu0 %v10988_v58 }
 0xc8d   : > { %v9382_v50 = vpop.f32.mrb[79].mxu0  ;;  %9528 = vmatprep.subr.bf16.mxu0 %v10989_v31 }
 0xc8e   : > { %v6637_v53 = vadd.f32 %v9380_v52, %v6459_v47 }
 0xc90   : > { %9529 = vmatpush3.bf16.msra.mxu0 %v10990_v60 }
 0xc91   : > { %9530 = vmatprep.subr.bf16.mxu0 %v10991_v27 }
 0xc94   : > { %9531 = vmatpush3.bf16.msra.mxu0 %v10992_v62  ;;  %v11574_v62 = vmov 0.0  }
 0xc95   : > { %9538 = vmatprep.subr.bf16.mxu0 %v10993_v44  ;;  %v11026_v44 = vld [vmem:[#allocation23 + $0x8] sm:$0xff]  }
 0xc97   : > { %7850 = vmatmul.mubr.bf16.vlgmr.msra.gmra.mrb[104].mxu0 %v7717_v32  ;;  %v11029_v32 = vld [vmem:[#allocation23 + $0x20] sm:$0xff]  }
 0xc98   : > { %9539 = vmatpush3.bf16.msra.mxu0 %v10994_v56  ;;  %8023 = vmatprep.mubr.bf16.mxu0 %v7892_v34  ;;  %v11028_v56 = vld [vmem:[#allocation23 + $0x18] sm:$0xff]  }
 0xc99   : > { %9540 = vmatprep.subr.bf16.mxu0 %v10995_v20  ;;  %v11030_v20 = vld [vmem:[#allocation23 + $0x28] sm:$0xff]  }
 0xc9c   : > { %9541 = vmatpush3.bf16.msra.mxu0 %v10996_v36 }
 0xc9d   : > { %9542 = vmatprep.subr.bf16.mxu0 %v10997_v23 }
 0xca0   : > { %9543 = vmatpush3.bf16.msra.mxu0 %v10998_v40 }
 0xca1   : > { %9544 = vmatprep.subr.bf16.mxu0 %v10999_v61 }
 0xca4   : > { %9545 = vmatpush3.bf16.msra.mxu0 %v11000_v28 }
 0xca5   : > { %9546 = vmatprep.subr.bf16.mxu0 %v11001_v18  ;;  %v11031_v18 = vld [vmem:[#allocation23 + $0x30] sm:$0xff]  }
 0xca8   : > { %9547 = vmatpush3.bf16.msra.mxu0 %v11002_v46  ;;  %v11032_v46 = vld [vmem:[#allocation23 + $0x38] sm:$0xff]  }
 0xca9   : > { %9548 = vmatprep.subr.bf16.mxu0 %v11003_v4 }
 0xcaa   : > { %v9400_v16 = vpop.f32.mrb[80].mxu0 }
 0xcab   : > { %v9401_v22 = vpop.f32.mrb[81].mxu0 }
 0xcac   : > { %v9402_v14 = vadd.f32 %v9401_v22, %v9400_v16  ;;  %v9403_v15 = vpop.f32.mrb[82].mxu0  ;;  %9549 = vmatpush3.bf16.msra.mxu0 %v11004_v49 }
 0xcad   : > { %v9404_v9 = vpop.f32.mrb[83].mxu0  ;;  %9550 = vmatprep.subr.bf16.mxu0 %v11005_v30 }
 0xcae   : > { %v6813_v54 = vadd.f32 %v9402_v14, %v6637_v53  ;;  %v11025_v53 = vld [vmem:[#allocation23] sm:$0xff]  }
 0xcb0   : > { %9551 = vmatpush3.bf16.msra.mxu0 %v11006_v25 }
 0xcb1   : > { %9552 = vmatprep.subr.bf16.mxu0 %v11007_v43 }
 0xcb4   : > { %9553 = vmatpush3.bf16.msra.mxu0 %v11008_v19 }
 0xcb5   : > { %9560 = vmatprep.subr.bf16.mxu0 %v11009_v3 }
 0xcb7   : > { %8024 = vmatmul.mubr.bf16.vlgmr.msra.gmra.mrb[108].mxu0 %v7891_v59 }
 0xcb8   : > { %9561 = vmatpush3.bf16.msra.mxu0 %v11010_v29  ;;  %8197 = vmatprep.mubr.bf16.mxu0 %v8066_v26 }
 0xcb9   : > { %9562 = vmatprep.subr.bf16.mxu0 %v11011_v55 }
 0xcbc   : > { %9563 = vmatpush3.bf16.msra.mxu0 %v11012_v7 }
 0xcbd   : > { %9564 = vmatprep.subr.bf16.mxu0 %v11013_v21 }
 0xcc0   : > { %9565 = vmatpush3.bf16.msra.mxu0 %v11014_v48 }
 0xcc1   : > { %9566 = vmatprep.subr.bf16.mxu0 %v11015_v12 }
 0xcc4   : > { %9567 = vmatpush3.bf16.msra.mxu0 %v11016_v63 }
 0xcc5   : > { %9568 = vmatprep.subr.bf16.mxu0 %v11017_v13 }
 0xcc8   : > { %9569 = vmatpush3.bf16.msra.mxu0 %v11018_v17 }
 0xcc9   : > { %9570 = vmatprep.subr.bf16.mxu0 %v11019_v51 }
 0xcca   : > { %v9422_v5 = vpop.f32.mrb[84].mxu0 }
 0xccb   : > { %v9423_v0 = vpop.f32.mrb[85].mxu0 }
 0xccc   : > { %v9424_v37 = vadd.f32 %v9423_v0, %v9422_v5  ;;  %v9425_v10 = vpop.f32.mrb[86].mxu0  ;;  %9571 = vmatpush3.bf16.msra.mxu0 %v11020_v6 }
 0xccd   : > { %v9426_v39 = vpop.f32.mrb[87].mxu0  ;;  %9572 = vmatprep.subr.bf16.mxu0 %v11021_v45  ;;  %v8224_v45 = vld [vmem:[#allocation25] sm:$0x1] }
 0xcce   : > { %v6987_v41 = vadd.f32 %v9424_v37, %v6813_v54 }
 0xcd0   : > { %9573 = vmatpush3.bf16.msra.mxu0 %v11022_v11 }
 0xcd1   : > { %9574 = vmatprep.subr.bf16.mxu0 %v11023_v1 }
 0xcd4   : > { %9575 = vmatpush3.bf16.msra.mxu0 %v11024_v35 }
 0xcd5   : > { %9591 = vmatprep.subr.bf16.mxu0 %v11574_v62 }
 0xcd7   : > { %8198 = vmatmul.mubr.bf16.vlgmr.msra.gmra.mrb[112].mxu0 %v8065_v33 }
 0xcd8   : > { %9592 = vmatpush3.bf16.msra.mxu0 %v11025_v53  ;;  %9607 = vmatprep.mubr.msk.bf16.mxu0 %vm11575_vm11, %v11574_v62 }
 0xcd9   : > { %9593 = vmatprep.subr.bf16.mxu0 %v11574_v62 }
 0xcdc   : > { %9594 = vmatpush3.bf16.msra.mxu0 %v11026_v44 }
 0xcdd   : > { %9595 = vmatprep.subr.bf16.mxu0 %v11574_v62 }
 0xce0   : > { %9596 = vmatpush3.bf16.msra.mxu0 %v11027_v8 }
 0xce1   : > { %9597 = vmatprep.subr.bf16.mxu0 %v11574_v62 }
 0xce4   : > { %9598 = vmatpush3.bf16.msra.mxu0 %v11028_v56 }
 0xce5   : > { %9599 = vmatprep.subr.bf16.mxu0 %v11574_v62 }
 0xce8   : > { %9600 = vmatpush3.bf16.msra.mxu0 %v11029_v32 }
 0xce9   : > { %9601 = vmatprep.subr.bf16.mxu0 %v11574_v62 }
 0xcea   : > { %v9444_v2 = vpop.f32.mrb[88].mxu0 }
 0xceb   : > { %v9445_v58 = vpop.f32.mrb[89].mxu0 }
 0xcec   : > { %v9446_v42 = vadd.f32 %v9445_v58, %v9444_v2  ;;  %v9447_v31 = vpop.f32.mrb[90].mxu0  ;;  %9602 = vmatpush3.bf16.msra.mxu0 %v11030_v20 }
 0xced   : > { %v9448_v57 = vpop.f32.mrb[91].mxu0  ;;  %9603 = vmatprep.subr.bf16.mxu0 %v11574_v62 }
 0xcee   : > { %v7161_v24 = vadd.f32 %v9446_v42, %v6987_v41 }
 0xcf0   : > { %9604 = vmatpush3.bf16.msra.mxu0 %v11031_v18 }
 0xcf1   : > { %9605 = vmatprep.subr.bf16.mxu0 %v11574_v62 }
 0xcf4   : > { %9606 = vmatpush3.bf16.msra.mxu0 %v11032_v46 }
 0xd0a   : > { %v9466_v47 = vpop.f32.mrb[92].mxu0 }
 0xd0b   : > { %v9467_v52 = vpop.f32.mrb[93].mxu0 }
 0xd0c   : > { %v9468_v38 = vadd.f32 %v9467_v52, %v9466_v47  ;;  %v9469_v60 = vpop.f32.mrb[94].mxu0 }
 0xd0d   : > { %v9470_v50 = vpop.f32.mrb[95].mxu0 }
 0xd0e   : > { %v7335_v27 = vadd.f32 %v9468_v38, %v7161_v24 }
 0xd2a   : > { %v9488_v34 = vpop.f32.mrb[96].mxu0 }
 0xd2b   : > { %v9489_v36 = vpop.f32.mrb[97].mxu0 }
 0xd2c   : > { %v9490_v23 = vadd.f32 %v9489_v36, %v9488_v34  ;;  %v9491_v40 = vpop.f32.mrb[98].mxu0 }
 0xd2d   : > { %v9492_v61 = vpop.f32.mrb[99].mxu0 }
 0xd2e   : > { %v7509_v28 = vadd.f32 %v9490_v23, %v7335_v27 }
 0xd4a   : > { %v9510_v4 = vpop.f32.mrb[100].mxu0 }
 0xd4b   : > { %v9511_v49 = vpop.f32.mrb[101].mxu0 }
 0xd4c   : > { %v9512_v30 = vadd.f32 %v9511_v49, %v9510_v4  ;;  %v9513_v16 = vpop.f32.mrb[102].mxu0 }
 0xd4d   : > { %v9514_v22 = vpop.f32.mrb[103].mxu0 }
 0xd4e   : > { %v7683_v14 = vadd.f32 %v9512_v30, %v7509_v28 }
 0xd6a   : > { %v9532_v15 = vpop.f32.mrb[104].mxu0 }
 0xd6b   : > { %v9533_v25 = vpop.f32.mrb[105].mxu0 }
 0xd6c   : > { %v9534_v9 = vadd.f32 %v9533_v25, %v9532_v15  ;;  %v9535_v43 = vpop.f32.mrb[106].mxu0 }
 0xd6d   : > { %v9536_v54 = vpop.f32.mrb[107].mxu0 }
 0xd6e   : > { %v7857_v19 = vadd.f32 %v9534_v9, %v7683_v14 }
 0xd8a   : > { %v9554_v3 = vpop.f32.mrb[108].mxu0 }
 0xd8b   : > { %v9555_v29 = vpop.f32.mrb[109].mxu0 }
 0xd8c   : > { %v9556_v59 = vadd.f32 %v9555_v29, %v9554_v3  ;;  %v9557_v55 = vpop.f32.mrb[110].mxu0 }
 0xd8d   : > { %v9558_v26 = vpop.f32.mrb[111].mxu0 }
 0xd8e   : > { %v8031_v7 = vadd.f32 %v9556_v59, %v7857_v19 }
 0xdaa   : > { %v9576_v21 = vpop.f32.mrb[112].mxu0 }
 0xdab   : > { %v9577_v48 = vpop.f32.mrb[113].mxu0 }
 0xdac   : > { %v9578_v12 = vadd.f32 %v9577_v48, %v9576_v21  ;;  %v9579_v63 = vpop.f32.mrb[114].mxu0 }
 0xdad   : > { %v9580_v13 = vpop.f32.mrb[115].mxu0 }
 0xdae   : > { %v8205_v17 = vadd.f32 %v9578_v12, %v8031_v7 }
 0xdb0   : > { %v8206_v51 = vmax.f32 %v8205_v17, 0.0 }
 0xdb2   : > { %v8207_v6 = vpack.c.bf16 %v8206_v51, %v8206_v51 }
 0xdb4   : > { %9608 = vmatmul.mubr.bf16.vlgmr.msra.gmra.mrb[116].mxu0 %v8207_v6 }
 0xe87   : > { %v8307_v5 = vpop.f32.mrb[116].mxu0 }
 0xe88   : > { %v8308_v0 = vadd.f32 %v8307_v5, %v8224_v45  ;;  %v9609_v37 = vpop.f32.mrb[117].mxu0 }
 0xe89   : > { %v8310_v10 = vpop.f32.mrb[118].mxu0 }
 0xe8a   : > { %8313 = vst [vmem:[%s706_s0] sm:$0x1] %v8308_v0  ;;  %v9610_v11 = vpop.f32.mrb[119].mxu0 }
 0xe8b   : > { %11468 = shalt.err (!%p11465_p5)
}
 0xe8c   : > { %s11469_s29 = scalar_lea.hbm %s13220_s5, 16  ;;  %s11473_s25 = scalar_lea.hbm %s13388_s28, 32 }
 0xe8d   : > { %p11470_p10 = scmp.ne.s32.totalorder %s13220_s5, %s11469_s29  ;;  %p11474_p12 = scmp.lt.u32.totalorder %s13220_s5, %s13388_s28 }
 0xe8e   : > { %p11475_p13 = scmp.lt.u32.totalorder %s11473_s25, %s11469_s29  ;;  %p11477_p7 = scmp.lt.u32.totalorder %s11469_s29, %s13220_s5 }
 0xe8f   : > { %p11471_p1 = pnand %p11470_p10, %p13389_p9 }
 0xe90   : > { %p11476_p8 = por %p11475_p13, %p11474_p12 }
 0xe91   : > { %p11472_p11 = pneg %p11471_p1 }
 0xe92   : > { %p11478_p4 = por %p11477_p7, %p11476_p8 }
 0xe94   : > { %p11479_p3 = pnand %p11478_p4, %p11472_p11 }
 0xe96   : > { %11482 = shalt.err (!%p11479_p3)
}
 0xe97   : > { %9832 = dma.vmem_to_hbm [thread:$0]  (%p13389_p9), %s13222_s3, 16, %s13220_s5, %s8315_s4  }
 0xe98 PF: > { %s13390_s27 = sld [smem:[#allocation36_spill]]  ;;  %p13391_p6 = scmp.ne.s32.totalorder %s13349_s26, 0 }
 0xe99   : > { %p13392_p2 = scmp.ge.s32.totalorder %s11549_s21, 2 }
 0xe9b   : > { %p9882_p0 = pnand %p13392_p2, %p13391_p6 }
 0xe9e   : > { %s8339_s18 = sand.u32 1, %s13390_s27  }
 0xe9f   : > { %s8340_s6 = scalar_lea.sflag [#allocation4], %s8339_s18 }
 0xea0   : > { %11532 = dma.done.wait (!%p9882_p0), %s8340_s6, 16  }
 0xea1   : > { %11534 = vsyncadd (!%p9882_p0), %s8340_s6, 4294967280  ;;  %s13393_s18 = sld [smem:[#allocation37_spill]]  ;;  %p35_p5 = scmp.ge.s32.totalorder %s12043_s22, 4  }
 0xea2   : > { %s13394_s19 = smov %s11545_s20  ;;  %s13395_s20 = smov %s12054_s17 }
 0xea3   : > { %s13396_s21 = smov %s12043_s22  ;;  %37 = sbr.rel (!%p35_p5) target bundleno = 21 (0x15), region = 199 }
 0xeaa   :  { %8344 = vsyncpa [#allocation3], 1 }
 0xeab   :  { %8346 = vsyncpa [#allocation3 + $0x1], 1 }
 0xeac   :  { %8347 = vsyncpa [#allocation6], 1 }
 0xead   :  { %8348 = vsyncpa [#allocation9], 1 }
 0xeae   :  { %8349 = vsyncpa [#allocation12], 1 }
 0xeaf   :  { %8350 = vsyncpa [#allocation15], 1 }
 0xeb0   :  { %8351 = vsyncpa [#allocation18], 1 }
 0xeb1   :  { %8352 = vsyncpa [#allocation21], 1 }
 0xeb2   :  { %8353 = vsyncpa [#allocation24], 1 }
 0xeb3   :  { %8354 = vsyncpa [#allocation4], 1 }
 0xeb4   :  { %8356 = vsyncpa [#allocation4 + $0x1], 1 }

</bundles_post_ra>
